<compile_context>
chip_gen: v7x
topology: tpu7x:2x2x1
jax: 0.10.0
libtpu: 0.0.40
codegen_flags: <defaults>
</compile_context>

<pallas_src>
import math
from functools import partial

import jax
import jax.numpy as jnp
import numpy as np
from jax.experimental import pallas as pl
from jax.experimental.pallas import tpu as pltpu


# Fully unroll spatial loops up to this many output positions; above it use
# lax.fori_loop (keeps the instruction stream small for e.g. 84x84 inputs).
_UNROLL_LIMIT = 32


def _spatial_loop(count, body):
    """Run body(o) for o in [0, count): python-unrolled when small, fori_loop otherwise."""
    if count <= _UNROLL_LIMIT:
        for o in range(count):
            body(o)
    else:
        def fbody(o, carry):
            body(o)
            return carry
        jax.lax.fori_loop(0, count, fbody, 0)


# ----------------------------------------------------------------------------
# Fused kernel factory: one block of B images per grid step.
# Row layout of every intermediate: row = spatial_position * B + image_in_block.
# ----------------------------------------------------------------------------
def _make_encoder_kernel(B, oh1, ow1, oh2, ow2, oh3, ow3):
    M2 = oh2 * ow2
    M3 = oh3 * ow3
    dyn2 = M2 > _UNROLL_LIMIT
    dyn3 = M3 > _UNROLL_LIMIT

    def row_ds(start, dynamic):
        if dynamic:
            start = pl.multiple_of(start, B)
        return pl.ds(start, B)

    def kernel(cols1_ref, w1_ref, b1_ref, w2_ref, b2_ref, w3_ref, b3_ref,
               out_ref, y1_s, c2_s, y2_s, c3_s):
        # ---- conv1: one (B*M1, K1) @ (K1, 32) matmul, f32 acc, bias+ReLU ----
        y1 = jnp.dot(cols1_ref[0], w1_ref[...],
                     preferred_element_type=jnp.float32)
        y1_s[...] = jnp.maximum(y1 + b1_ref[...], 0.0).astype(y1_s.dtype)

        # ---- conv2 im2col: contiguous (B, 32) row-block copies (bf16) ----
        def c2_row(o2):
            p = o2 // ow2
            q = o2 % ow2
            dst = row_ds(o2 * B, dyn2)
            for ki in range(4):
                for kj in range(4):
                    o1 = (2 * p + ki) * ow1 + (2 * q + kj)
                    c0 = 32 * (4 * ki + kj)
                    c2_s[dst, c0:c0 + 32] = y1_s[row_ds(o1 * B, dyn2), :]
        _spatial_loop(M2, c2_row)

        # ---- conv2: one (B*M2, 512) @ (512, 64) matmul ----
        y2 = jnp.dot(c2_s[...], w2_ref[...],
                     preferred_element_type=jnp.float32)
        y2_s[...] = jnp.maximum(y2 + b2_ref[...], 0.0).astype(y2_s.dtype)

        # ---- conv3 im2col: contiguous (B, 64) row-block copies (bf16) ----
        def c3_row(o3):
            p = o3 // ow3
            q = o3 % ow3
            dst = row_ds(o3 * B, dyn3)
            for ki in range(3):
                for kj in range(3):
                    o2 = (p + ki) * ow2 + (q + kj)
                    t = 3 * ki + kj
                    c3_s[dst, 64 * t:64 * (t + 1)] = y2_s[row_ds(o2 * B, dyn3), :]
        _spatial_loop(M3, c3_row)

        # ---- conv3: one (B*M3, 576) @ (576, 64) matmul ----
        y3 = jnp.dot(c3_s[...], w3_ref[...],
                     preferred_element_type=jnp.float32)
        out_ref[0] = jnp.maximum(y3 + b3_ref[...], 0.0).astype(out_ref.dtype)

    return kernel


# ----------------------------------------------------------------------------
# Wrapper glue.
# ----------------------------------------------------------------------------
def _im2col_nhwc(x, kh, kw, stride):
    """conv1 patch extraction: (N,H,W,C) -> (N, OH*OW, KH*KW*C), (ki,kj,c) column order."""
    n, h, w, c = x.shape
    oh = (h - kh) // stride + 1
    ow = (w - kw) // stride + 1
    slabs = []
    for i in range(kh):
        for j in range(kw):
            slabs.append(x[:, i:i + stride * oh:stride,
                           j:j + stride * ow:stride, :])
    cols = jnp.concatenate(slabs, axis=-1)          # (N, OH, OW, KH*KW*C)
    return cols.reshape(n, oh * ow, kh * kw * c), oh, ow


def _choose_batch_block(n, m1, k1, m2, m3, max_b=64, vmem_budget=24 << 20):
    """Batch-block size: multiple of 16 (bf16 sublane tile), capped by a VMEM budget
    (keeps double-buffered input + scratch well under v7x's 64 MiB)."""
    b = min(max_b, max(n, 1))
    b = -(-b // 16) * 16

    def vmem_bytes(bb):
        inp = 2 * m1 * bb * k1 * 2                       # cols1 block, double-buffered, bf16
        scr = (m1 * bb * 32 + m2 * bb * 512 + m2 * bb * 64 + m3 * bb * 576) * 2
        out = 2 * m3 * bb * 64 * 4
        return inp + scr + out

    while b > 16 and vmem_bytes(b) > vmem_budget:
        b -= 16
    return b


@partial(jax.jit, static_argnums=2)
def encoder_forward(x_nchw, params, feature_dim):
    """x_nchw: (N, Cin, H, W) f32 -> (M, feature_dim) f32 (PyTorch view order)."""
    (w1, b1), (w2, b2), (w3, b3) = params
    n, cin, h, w = x_nchw.shape

    x_nhwc = jnp.transpose(x_nchw, (0, 2, 3, 1))
    cols1, oh1, ow1 = _im2col_nhwc(x_nhwc, 8, 8, 4)           # (N, M1, K1)

    oh2, ow2 = (oh1 - 4) // 2 + 1, (ow1 - 4) // 2 + 1
    oh3, ow3 = oh2 - 2, ow2 - 2
    assert oh2 >= 3 and ow2 >= 3, "input too small for the canonical encoder"
    M1, M2, M3 = oh1 * ow1, oh2 * ow2, oh3 * ow3
    K1, K2, K3 = cin * 64, 512, 576

    B = _choose_batch_block(n, M1, K1, M2, M3)
    G = -(-n // B)
    n_pad = G * B
    if n_pad != n:
        cols1 = jnp.pad(cols1, ((0, n_pad - n), (0, 0), (0, 0)))

    # (G, M1*B, K1), rows ordered o1*B + b: batch-contiguous per spatial position,
    # so all in-kernel im2col copies are contiguous (B, C) row blocks.
    cols1 = (cols1.reshape(G, B, M1, K1)
                  .transpose(0, 2, 1, 3)
                  .reshape(G, M1 * B, K1)
                  .astype(jnp.bfloat16))

    # (KH, KW, Cin, Cout) flatten matches the (ki, kj, c) im2col column ordering.
    w1m = jnp.transpose(w1, (2, 3, 1, 0)).reshape(K1, 32).astype(jnp.bfloat16)
    w2m = jnp.transpose(w2, (2, 3, 1, 0)).reshape(K2, 64).astype(jnp.bfloat16)
    w3m = jnp.transpose(w3, (2, 3, 1, 0)).reshape(K3, 64).astype(jnp.bfloat16)
    b1r = b1.reshape(1, 32).astype(jnp.float32)
    b2r = b2.reshape(1, 64).astype(jnp.float32)
    b3r = b3.reshape(1, 64).astype(jnp.float32)

    kernel = _make_encoder_kernel(B, oh1, ow1, oh2, ow2, oh3, ow3)

    flops = 2 * n_pad * (M1 * K1 * 32 + M2 * K2 * 64 + M3 * K3 * 64)
    bytes_accessed = (n_pad * M1 * K1 * 2
                      + (K1 * 32 + K2 * 64 + K3 * 64) * 2
                      + (32 + 64 + 64) * 4
                      + n_pad * M3 * 64 * 4)

    out = pl.pallas_call(
        kernel,
        out_shape=jax.ShapeDtypeStruct((G, M3 * B, 64), jnp.float32),
        grid_spec=pltpu.PrefetchScalarGridSpec(
            num_scalar_prefetch=0,
            grid=(G,),
            in_specs=[
                pl.BlockSpec((1, M1 * B, K1), lambda i: (i, 0, 0)),  # per-block cols1
                pl.BlockSpec((K1, 32), lambda i: (0, 0)),            # weights VMEM-resident
                pl.BlockSpec((1, 32), lambda i: (0, 0)),
                pl.BlockSpec((K2, 64), lambda i: (0, 0)),
                pl.BlockSpec((1, 64), lambda i: (0, 0)),
                pl.BlockSpec((K3, 64), lambda i: (0, 0)),
                pl.BlockSpec((1, 64), lambda i: (0, 0)),
            ],
            out_specs=pl.BlockSpec((1, M3 * B, 64), lambda i: (i, 0, 0)),
            scratch_shapes=[
                pltpu.VMEM((M1 * B, 32), jnp.bfloat16),   # conv1 output
                pltpu.VMEM((M2 * B, K2), jnp.bfloat16),   # conv2 im2col
                pltpu.VMEM((M2 * B, 64), jnp.bfloat16),   # conv2 output
                pltpu.VMEM((M3 * B, K3), jnp.bfloat16),   # conv3 im2col
            ],
        ),
        compiler_params=pltpu.CompilerParams(
            dimension_semantics=("parallel",),
        ),
        cost_estimate=pl.CostEstimate(
            flops=flops, transcendentals=0, bytes_accessed=bytes_accessed),
    )(cols1, w1m, b1r, w2m, b2r, w3m, b3r)

    # Kernel rows are o3*B + b per block; reorder to PyTorch's NCHW flatten
    # (per image: feature index = c*M3 + o3).
    out = out.reshape(G, M3, B, 64).transpose(0, 2, 3, 1).reshape(n_pad, 64 * M3)
    out = out[:n]
    return out.reshape(-1, feature_dim)


# ----------------------------------------------------------------------------
# Parameter init (deterministic, PyTorch-style uniform bounds).
# ----------------------------------------------------------------------------
def init_conv_params(key, cout, cin, kh, kw):
    fan_in = cin * kh * kw
    bound = 1.0 / math.sqrt(fan_in)
    kw_key, kb_key = jax.random.split(key)
    w = jax.random.uniform(kw_key, (cout, cin, kh, kw), jnp.float32, -bound, bound)
    b = jax.random.uniform(kb_key, (cout,), jnp.float32, -bound, bound)
    return w, b


# ----------------------------------------------------------------------------
# Pure-JAX f32 reference for a correctness sanity check.
# ----------------------------------------------------------------------------
def encoder_reference(x_nchw, params, feature_dim):
    x = x_nchw
    strides = (4, 2, 1)
    for (w, b), s in zip(params, strides):
        x = jax.lax.conv_general_dilated(
            x, w, window_strides=(s, s), padding="VALID",
            dimension_numbers=("NCHW", "OIHW", "NCHW"),
        )
        x = jax.nn.relu(x + b.reshape(1, -1, 1, 1))
    return x.reshape(-1, feature_dim)


if __name__ == "__main__":
    # Canonical arch minimal shapes:
    # 36 -> (36-8)/4+1=8 -> (8-4)/2+1=3 -> (3-3)/1+1=1  => feature_dim = 64
    batch, in_dim, spatial = 5, 4, 36
    feature_dim = 64

    key = jax.random.PRNGKey(0)
    kx, k1, k2, k3 = jax.random.split(key, 4)
    x = jax.random.uniform(kx, (batch, in_dim, spatial, spatial),
                           jnp.float32, -1.0, 1.0)

    params = (
        init_conv_params(k1, 32, in_dim, 8, 8),
        init_conv_params(k2, 64, 32, 4, 4),
        init_conv_params(k3, 64, 64, 3, 3),
    )

    out = jax.block_until_ready(encoder_forward(x, params, feature_dim))
    ref = jax.block_until_ready(encoder_reference(x, params, feature_dim))

    assert out.shape == (batch, feature_dim), out.shape
    # bf16 MXU operands / bf16 intermediates with f32 accumulation -> loosened tolerance.
    np.testing.assert_allclose(np.asarray(out), np.asarray(ref),
                               rtol=5e-2, atol=5e-2)

    print("KERNEL_OK")
</pallas_src>

<mosaic_0001>
module attributes {stable_mosaic.version = 11 : i64} {
  func.func @kernel(%arg0: i32, %arg1: memref<1x1024x256xbf16, #tpu.memory_space<vmem>>, %arg2: memref<256x32xbf16, #tpu.memory_space<vmem>>, %arg3: memref<1x32xf32, #tpu.memory_space<vmem>>, %arg4: memref<512x64xbf16, #tpu.memory_space<vmem>>, %arg5: memref<1x64xf32, #tpu.memory_space<vmem>>, %arg6: memref<576x64xbf16, #tpu.memory_space<vmem>>, %arg7: memref<1x64xf32, #tpu.memory_space<vmem>>, %arg8: memref<1x16x64xf32, #tpu.memory_space<vmem>>, %arg9: memref<1024x32xbf16, #tpu.memory_space<vmem>>, %arg10: memref<144x512xbf16, #tpu.memory_space<vmem>>, %arg11: memref<144x64xbf16, #tpu.memory_space<vmem>>, %arg12: memref<16x576xbf16, #tpu.memory_space<vmem>>) attributes {dimension_semantics = [#tpu.dimension_semantics<parallel>], iteration_bounds = array<i64: 1>, scalar_prefetch = 0 : i64, scratch_operands = 4 : i64, tpu.core_type = #tpu.core_type<tc>, window_params = [{transform_indices = @transform_0, window_bounds = array<i64: 1, 1024, 256>}, {pipeline_mode = #tpu.pipeline_mode<synchronous>, transform_indices = @transform_1, window_bounds = array<i64: 256, 32>}, {pipeline_mode = #tpu.pipeline_mode<synchronous>, transform_indices = @transform_2, window_bounds = array<i64: 1, 32>}, {pipeline_mode = #tpu.pipeline_mode<synchronous>, transform_indices = @transform_3, window_bounds = array<i64: 512, 64>}, {pipeline_mode = #tpu.pipeline_mode<synchronous>, transform_indices = @transform_4, window_bounds = array<i64: 1, 64>}, {pipeline_mode = #tpu.pipeline_mode<synchronous>, transform_indices = @transform_5, window_bounds = array<i64: 576, 64>}, {pipeline_mode = #tpu.pipeline_mode<synchronous>, transform_indices = @transform_6, window_bounds = array<i64: 1, 64>}, {transform_indices = @transform_7, window_bounds = array<i64: 1, 16, 64>}]} {
    %c0 = arith.constant 0 : index
    %c0_0 = arith.constant 0 : index
    %c0_1 = arith.constant 0 : index
    %0 = vector.load %arg1[%c0, %c0_0, %c0_1] : memref<1x1024x256xbf16, #tpu.memory_space<vmem>>, vector<1x1024x256xbf16>
    %1 = vector.shape_cast %0 : vector<1x1024x256xbf16> to vector<1024x256xbf16>
    %c0_2 = arith.constant 0 : index
    %c0_3 = arith.constant 0 : index
    %2 = vector.load %arg2[%c0_2, %c0_3] : memref<256x32xbf16, #tpu.memory_space<vmem>>, vector<256x32xbf16>
    %cst = arith.constant dense<0.000000e+00> : vector<1024x32xf32>
    %3 = tpu.matmul %1, %2, %cst {dimension_numbers = #tpu.dot_dimension_numbers<[1], [0], [0], [1], [0, 0, 1, 1], [], []>} : vector<1024x256xbf16>, vector<256x32xbf16>, vector<1024x32xf32> -> vector<1024x32xf32>
    %c0_4 = arith.constant 0 : index
    %c0_5 = arith.constant 0 : index
    %4 = vector.load %arg3[%c0_4, %c0_5] : memref<1x32xf32, #tpu.memory_space<vmem>>, vector<1x32xf32>
    %5 = vector.broadcast %4 : vector<1x32xf32> to vector<1024x32xf32>
    %6 = arith.addf %3, %5 : vector<1024x32xf32>
    %cst_6 = arith.constant 0.000000e+00 : f32
    %7 = vector.broadcast %cst_6 : f32 to vector<1024x32xf32>
    %8 = arith.maximumf %6, %7 : vector<1024x32xf32>
    %9 = arith.truncf %8 : vector<1024x32xf32> to vector<1024x32xbf16>
    %c0_7 = arith.constant 0 : index
    %c0_8 = arith.constant 0 : index
    %10 = vector.load %arg9[%c0_7, %c0_8] : memref<1024x32xbf16, #tpu.memory_space<vmem>>, vector<1024x32xbf16>
    tpu.vector_store %arg9[%c0_7, %c0_8], %9 {strides = array<i32>} : memref<1024x32xbf16, #tpu.memory_space<vmem>>, vector<1024x32xbf16>,
    %c0_9 = arith.constant 0 : index
    %c0_10 = arith.constant 0 : index
    %11 = vector.load %arg9[%c0_9, %c0_10] : memref<1024x32xbf16, #tpu.memory_space<vmem>>, vector<16x32xbf16>
    %c0_11 = arith.constant 0 : index
    %c0_12 = arith.constant 0 : index
    %12 = vector.load %arg10[%c0_11, %c0_12] : memref<144x512xbf16, #tpu.memory_space<vmem>>, vector<16x32xbf16>
    tpu.vector_store %arg10[%c0_11, %c0_12], %11 {strides = array<i32>} : memref<144x512xbf16, #tpu.memory_space<vmem>>, vector<16x32xbf16>,
    %c16 = arith.constant 16 : index
    %c0_13 = arith.constant 0 : index
    %13 = vector.load %arg9[%c16, %c0_13] : memref<1024x32xbf16, #tpu.memory_space<vmem>>, vector<16x32xbf16>
    %c0_14 = arith.constant 0 : index
    %c32 = arith.constant 32 : index
    %14 = vector.load %arg10[%c0_14, %c32] : memref<144x512xbf16, #tpu.memory_space<vmem>>, vector<16x32xbf16>
    tpu.vector_store %arg10[%c0_14, %c32], %13 {strides = array<i32>} : memref<144x512xbf16, #tpu.memory_space<vmem>>, vector<16x32xbf16>,
    %c32_15 = arith.constant 32 : index
    %c0_16 = arith.constant 0 : index
    %15 = vector.load %arg9[%c32_15, %c0_16] : memref<1024x32xbf16, #tpu.memory_space<vmem>>, vector<16x32xbf16>
    %c0_17 = arith.constant 0 : index
    %c64 = arith.constant 64 : index
    %16 = vector.load %arg10[%c0_17, %c64] : memref<144x512xbf16, #tpu.memory_space<vmem>>, vector<16x32xbf16>
    tpu.vector_store %arg10[%c0_17, %c64], %15 {strides = array<i32>} : memref<144x512xbf16, #tpu.memory_space<vmem>>, vector<16x32xbf16>,
    %c48 = arith.constant 48 : index
    %c0_18 = arith.constant 0 : index
    %17 = vector.load %arg9[%c48, %c0_18] : memref<1024x32xbf16, #tpu.memory_space<vmem>>, vector<16x32xbf16>
    %c0_19 = arith.constant 0 : index
    %c96 = arith.constant 96 : index
    %18 = vector.load %arg10[%c0_19, %c96] : memref<144x512xbf16, #tpu.memory_space<vmem>>, vector<16x32xbf16>
    tpu.vector_store %arg10[%c0_19, %c96], %17 {strides = array<i32>} : memref<144x512xbf16, #tpu.memory_space<vmem>>, vector<16x32xbf16>,
    %c128 = arith.constant 128 : index
    %c0_20 = arith.constant 0 : index
    %19 = vector.load %arg9[%c128, %c0_20] : memref<1024x32xbf16, #tpu.memory_space<vmem>>, vector<16x32xbf16>
    %c0_21 = arith.constant 0 : index
    %c128_22 = arith.constant 128 : index
    %20 = vector.load %arg10[%c0_21, %c128_22] : memref<144x512xbf16, #tpu.memory_space<vmem>>, vector<16x32xbf16>
    tpu.vector_store %arg10[%c0_21, %c128_22], %19 {strides = array<i32>} : memref<144x512xbf16, #tpu.memory_space<vmem>>, vector<16x32xbf16>,
    %c144 = arith.constant 144 : index
    %c0_23 = arith.constant 0 : index
    %21 = vector.load %arg9[%c144, %c0_23] : memref<1024x32xbf16, #tpu.memory_space<vmem>>, vector<16x32xbf16>
    %c0_24 = arith.constant 0 : index
    %c160 = arith.constant 160 : index
    %22 = vector.load %arg10[%c0_24, %c160] : memref<144x512xbf16, #tpu.memory_space<vmem>>, vector<16x32xbf16>
    tpu.vector_store %arg10[%c0_24, %c160], %21 {strides = array<i32>} : memref<144x512xbf16, #tpu.memory_space<vmem>>, vector<16x32xbf16>,
    %c160_25 = arith.constant 160 : index
    %c0_26 = arith.constant 0 : index
    %23 = vector.load %arg9[%c160_25, %c0_26] : memref<1024x32xbf16, #tpu.memory_space<vmem>>, vector<16x32xbf16>
    %c0_27 = arith.constant 0 : index
    %c192 = arith.constant 192 : index
    %24 = vector.load %arg10[%c0_27, %c192] : memref<144x512xbf16, #tpu.memory_space<vmem>>, vector<16x32xbf16>
    tpu.vector_store %arg10[%c0_27, %c192], %23 {strides = array<i32>} : memref<144x512xbf16, #tpu.memory_space<vmem>>, vector<16x32xbf16>,
    %c176 = arith.constant 176 : index
    %c0_28 = arith.constant 0 : index
    %25 = vector.load %arg9[%c176, %c0_28] : memref<1024x32xbf16, #tpu.memory_space<vmem>>, vector<16x32xbf16>
    %c0_29 = arith.constant 0 : index
    %c224 = arith.constant 224 : index
    %26 = vector.load %arg10[%c0_29, %c224] : memref<144x512xbf16, #tpu.memory_space<vmem>>, vector<16x32xbf16>
    tpu.vector_store %arg10[%c0_29, %c224], %25 {strides = array<i32>} : memref<144x512xbf16, #tpu.memory_space<vmem>>, vector<16x32xbf16>,
    %c256 = arith.constant 256 : index
    %c0_30 = arith.constant 0 : index
    %27 = vector.load %arg9[%c256, %c0_30] : memref<1024x32xbf16, #tpu.memory_space<vmem>>, vector<16x32xbf16>
    %c0_31 = arith.constant 0 : index
    %c256_32 = arith.constant 256 : index
    %28 = vector.load %arg10[%c0_31, %c256_32] : memref<144x512xbf16, #tpu.memory_space<vmem>>, vector<16x32xbf16>
    tpu.vector_store %arg10[%c0_31, %c256_32], %27 {strides = array<i32>} : memref<144x512xbf16, #tpu.memory_space<vmem>>, vector<16x32xbf16>,
    %c272 = arith.constant 272 : index
    %c0_33 = arith.constant 0 : index
    %29 = vector.load %arg9[%c272, %c0_33] : memref<1024x32xbf16, #tpu.memory_space<vmem>>, vector<16x32xbf16>
    %c0_34 = arith.constant 0 : index
    %c288 = arith.constant 288 : index
    %30 = vector.load %arg10[%c0_34, %c288] : memref<144x512xbf16, #tpu.memory_space<vmem>>, vector<16x32xbf16>
    tpu.vector_store %arg10[%c0_34, %c288], %29 {strides = array<i32>} : memref<144x512xbf16, #tpu.memory_space<vmem>>, vector<16x32xbf16>,
    %c288_35 = arith.constant 288 : index
    %c0_36 = arith.constant 0 : index
    %31 = vector.load %arg9[%c288_35, %c0_36] : memref<1024x32xbf16, #tpu.memory_space<vmem>>, vector<16x32xbf16>
    %c0_37 = arith.constant 0 : index
    %c320 = arith.constant 320 : index
    %32 = vector.load %arg10[%c0_37, %c320] : memref<144x512xbf16, #tpu.memory_space<vmem>>, vector<16x32xbf16>
    tpu.vector_store %arg10[%c0_37, %c320], %31 {strides = array<i32>} : memref<144x512xbf16, #tpu.memory_space<vmem>>, vector<16x32xbf16>,
    %c304 = arith.constant 304 : index
    %c0_38 = arith.constant 0 : index
    %33 = vector.load %arg9[%c304, %c0_38] : memref<1024x32xbf16, #tpu.memory_space<vmem>>, vector<16x32xbf16>
    %c0_39 = arith.constant 0 : index
    %c352 = arith.constant 352 : index
    %34 = vector.load %arg10[%c0_39, %c352] : memref<144x512xbf16, #tpu.memory_space<vmem>>, vector<16x32xbf16>
    tpu.vector_store %arg10[%c0_39, %c352], %33 {strides = array<i32>} : memref<144x512xbf16, #tpu.memory_space<vmem>>, vector<16x32xbf16>,
    %c384 = arith.constant 384 : index
    %c0_40 = arith.constant 0 : index
    %35 = vector.load %arg9[%c384, %c0_40] : memref<1024x32xbf16, #tpu.memory_space<vmem>>, vector<16x32xbf16>
    %c0_41 = arith.constant 0 : index
    %c384_42 = arith.constant 384 : index
    %36 = vector.load %arg10[%c0_41, %c384_42] : memref<144x512xbf16, #tpu.memory_space<vmem>>, vector<16x32xbf16>
    tpu.vector_store %arg10[%c0_41, %c384_42], %35 {strides = array<i32>} : memref<144x512xbf16, #tpu.memory_space<vmem>>, vector<16x32xbf16>,
    %c400 = arith.constant 400 : index
    %c0_43 = arith.constant 0 : index
    %37 = vector.load %arg9[%c400, %c0_43] : memref<1024x32xbf16, #tpu.memory_space<vmem>>, vector<16x32xbf16>
    %c0_44 = arith.constant 0 : index
    %c416 = arith.constant 416 : index
    %38 = vector.load %arg10[%c0_44, %c416] : memref<144x512xbf16, #tpu.memory_space<vmem>>, vector<16x32xbf16>
    tpu.vector_store %arg10[%c0_44, %c416], %37 {strides = array<i32>} : memref<144x512xbf16, #tpu.memory_space<vmem>>, vector<16x32xbf16>,
    %c416_45 = arith.constant 416 : index
    %c0_46 = arith.constant 0 : index
    %39 = vector.load %arg9[%c416_45, %c0_46] : memref<1024x32xbf16, #tpu.memory_space<vmem>>, vector<16x32xbf16>
    %c0_47 = arith.constant 0 : index
    %c448 = arith.constant 448 : index
    %40 = vector.load %arg10[%c0_47, %c448] : memref<144x512xbf16, #tpu.memory_space<vmem>>, vector<16x32xbf16>
    tpu.vector_store %arg10[%c0_47, %c448], %39 {strides = array<i32>} : memref<144x512xbf16, #tpu.memory_space<vmem>>, vector<16x32xbf16>,
    %c432 = arith.constant 432 : index
    %c0_48 = arith.constant 0 : index
    %41 = vector.load %arg9[%c432, %c0_48] : memref<1024x32xbf16, #tpu.memory_space<vmem>>, vector<16x32xbf16>
    %c0_49 = arith.constant 0 : index
    %c480 = arith.constant 480 : index
    %42 = vector.load %arg10[%c0_49, %c480] : memref<144x512xbf16, #tpu.memory_space<vmem>>, vector<16x32xbf16>
    tpu.vector_store %arg10[%c0_49, %c480], %41 {strides = array<i32>} : memref<144x512xbf16, #tpu.memory_space<vmem>>, vector<16x32xbf16>,
    %c32_50 = arith.constant 32 : index
    %c0_51 = arith.constant 0 : index
    %43 = vector.load %arg9[%c32_50, %c0_51] : memref<1024x32xbf16, #tpu.memory_space<vmem>>, vector<16x32xbf16>
    %c16_52 = arith.constant 16 : index
    %c0_53 = arith.constant 0 : index
    %44 = vector.load %arg10[%c16_52, %c0_53] : memref<144x512xbf16, #tpu.memory_space<vmem>>, vector<16x32xbf16>
    tpu.vector_store %arg10[%c16_52, %c0_53], %43 {strides = array<i32>} : memref<144x512xbf16, #tpu.memory_space<vmem>>, vector<16x32xbf16>,
    %c48_54 = arith.constant 48 : index
    %c0_55 = arith.constant 0 : index
    %45 = vector.load %arg9[%c48_54, %c0_55] : memref<1024x32xbf16, #tpu.memory_space<vmem>>, vector<16x32xbf16>
    %c16_56 = arith.constant 16 : index
    %c32_57 = arith.constant 32 : index
    %46 = vector.load %arg10[%c16_56, %c32_57] : memref<144x512xbf16, #tpu.memory_space<vmem>>, vector<16x32xbf16>
    tpu.vector_store %arg10[%c16_56, %c32_57], %45 {strides = array<i32>} : memref<144x512xbf16, #tpu.memory_space<vmem>>, vector<16x32xbf16>,
    %c64_58 = arith.constant 64 : index
    %c0_59 = arith.constant 0 : index
    %47 = vector.load %arg9[%c64_58, %c0_59] : memref<1024x32xbf16, #tpu.memory_space<vmem>>, vector<16x32xbf16>
    %c16_60 = arith.constant 16 : index
    %c64_61 = arith.constant 64 : index
    %48 = vector.load %arg10[%c16_60, %c64_61] : memref<144x512xbf16, #tpu.memory_space<vmem>>, vector<16x32xbf16>
    tpu.vector_store %arg10[%c16_60, %c64_61], %47 {strides = array<i32>} : memref<144x512xbf16, #tpu.memory_space<vmem>>, vector<16x32xbf16>,
    %c80 = arith.constant 80 : index
    %c0_62 = arith.constant 0 : index
    %49 = vector.load %arg9[%c80, %c0_62] : memref<1024x32xbf16, #tpu.memory_space<vmem>>, vector<16x32xbf16>
    %c16_63 = arith.constant 16 : index
    %c96_64 = arith.constant 96 : index
    %50 = vector.load %arg10[%c16_63, %c96_64] : memref<144x512xbf16, #tpu.memory_space<vmem>>, vector<16x32xbf16>
    tpu.vector_store %arg10[%c16_63, %c96_64], %49 {strides = array<i32>} : memref<144x512xbf16, #tpu.memory_space<vmem>>, vector<16x32xbf16>,
    %c160_65 = arith.constant 160 : index
    %c0_66 = arith.constant 0 : index
    %51 = vector.load %arg9[%c160_65, %c0_66] : memref<1024x32xbf16, #tpu.memory_space<vmem>>, vector<16x32xbf16>
    %c16_67 = arith.constant 16 : index
    %c128_68 = arith.constant 128 : index
    %52 = vector.load %arg10[%c16_67, %c128_68] : memref<144x512xbf16, #tpu.memory_space<vmem>>, vector<16x32xbf16>
    tpu.vector_store %arg10[%c16_67, %c128_68], %51 {strides = array<i32>} : memref<144x512xbf16, #tpu.memory_space<vmem>>, vector<16x32xbf16>,
    %c176_69 = arith.constant 176 : index
    %c0_70 = arith.constant 0 : index
    %53 = vector.load %arg9[%c176_69, %c0_70] : memref<1024x32xbf16, #tpu.memory_space<vmem>>, vector<16x32xbf16>
    %c16_71 = arith.constant 16 : index
    %c160_72 = arith.constant 160 : index
    %54 = vector.load %arg10[%c16_71, %c160_72] : memref<144x512xbf16, #tpu.memory_space<vmem>>, vector<16x32xbf16>
    tpu.vector_store %arg10[%c16_71, %c160_72], %53 {strides = array<i32>} : memref<144x512xbf16, #tpu.memory_space<vmem>>, vector<16x32xbf16>,
    %c192_73 = arith.constant 192 : index
    %c0_74 = arith.constant 0 : index
    %55 = vector.load %arg9[%c192_73, %c0_74] : memref<1024x32xbf16, #tpu.memory_space<vmem>>, vector<16x32xbf16>
    %c16_75 = arith.constant 16 : index
    %c192_76 = arith.constant 192 : index
    %56 = vector.load %arg10[%c16_75, %c192_76] : memref<144x512xbf16, #tpu.memory_space<vmem>>, vector<16x32xbf16>
    tpu.vector_store %arg10[%c16_75, %c192_76], %55 {strides = array<i32>} : memref<144x512xbf16, #tpu.memory_space<vmem>>, vector<16x32xbf16>,
    %c208 = arith.constant 208 : index
    %c0_77 = arith.constant 0 : index
    %57 = vector.load %arg9[%c208, %c0_77] : memref<1024x32xbf16, #tpu.memory_space<vmem>>, vector<16x32xbf16>
    %c16_78 = arith.constant 16 : index
    %c224_79 = arith.constant 224 : index
    %58 = vector.load %arg10[%c16_78, %c224_79] : memref<144x512xbf16, #tpu.memory_space<vmem>>, vector<16x32xbf16>
    tpu.vector_store %arg10[%c16_78, %c224_79], %57 {strides = array<i32>} : memref<144x512xbf16, #tpu.memory_space<vmem>>, vector<16x32xbf16>,
    %c288_80 = arith.constant 288 : index
    %c0_81 = arith.constant 0 : index
    %59 = vector.load %arg9[%c288_80, %c0_81] : memref<1024x32xbf16, #tpu.memory_space<vmem>>, vector<16x32xbf16>
    %c16_82 = arith.constant 16 : index
    %c256_83 = arith.constant 256 : index
    %60 = vector.load %arg10[%c16_82, %c256_83] : memref<144x512xbf16, #tpu.memory_space<vmem>>, vector<16x32xbf16>
    tpu.vector_store %arg10[%c16_82, %c256_83], %59 {strides = array<i32>} : memref<144x512xbf16, #tpu.memory_space<vmem>>, vector<16x32xbf16>,
    %c304_84 = arith.constant 304 : index
    %c0_85 = arith.constant 0 : index
    %61 = vector.load %arg9[%c304_84, %c0_85] : memref<1024x32xbf16, #tpu.memory_space<vmem>>, vector<16x32xbf16>
    %c16_86 = arith.constant 16 : index
    %c288_87 = arith.constant 288 : index
    %62 = vector.load %arg10[%c16_86, %c288_87] : memref<144x512xbf16, #tpu.memory_space<vmem>>, vector<16x32xbf16>
    tpu.vector_store %arg10[%c16_86, %c288_87], %61 {strides = array<i32>} : memref<144x512xbf16, #tpu.memory_space<vmem>>, vector<16x32xbf16>,
    %c320_88 = arith.constant 320 : index
    %c0_89 = arith.constant 0 : index
    %63 = vector.load %arg9[%c320_88, %c0_89] : memref<1024x32xbf16, #tpu.memory_space<vmem>>, vector<16x32xbf16>
    %c16_90 = arith.constant 16 : index
    %c320_91 = arith.constant 320 : index
    %64 = vector.load %arg10[%c16_90, %c320_91] : memref<144x512xbf16, #tpu.memory_space<vmem>>, vector<16x32xbf16>
    tpu.vector_store %arg10[%c16_90, %c320_91], %63 {strides = array<i32>} : memref<144x512xbf16, #tpu.memory_space<vmem>>, vector<16x32xbf16>,
    %c336 = arith.constant 336 : index
    %c0_92 = arith.constant 0 : index
    %65 = vector.load %arg9[%c336, %c0_92] : memref<1024x32xbf16, #tpu.memory_space<vmem>>, vector<16x32xbf16>
    %c16_93 = arith.constant 16 : index
    %c352_94 = arith.constant 352 : index
    %66 = vector.load %arg10[%c16_93, %c352_94] : memref<144x512xbf16, #tpu.memory_space<vmem>>, vector<16x32xbf16>
    tpu.vector_store %arg10[%c16_93, %c352_94], %65 {strides = array<i32>} : memref<144x512xbf16, #tpu.memory_space<vmem>>, vector<16x32xbf16>,
    %c416_95 = arith.constant 416 : index
    %c0_96 = arith.constant 0 : index
    %67 = vector.load %arg9[%c416_95, %c0_96] : memref<1024x32xbf16, #tpu.memory_space<vmem>>, vector<16x32xbf16>
    %c16_97 = arith.constant 16 : index
    %c384_98 = arith.constant 384 : index
    %68 = vector.load %arg10[%c16_97, %c384_98] : memref<144x512xbf16, #tpu.memory_space<vmem>>, vector<16x32xbf16>
    tpu.vector_store %arg10[%c16_97, %c384_98], %67 {strides = array<i32>} : memref<144x512xbf16, #tpu.memory_space<vmem>>, vector<16x32xbf16>,
    %c432_99 = arith.constant 432 : index
    %c0_100 = arith.constant 0 : index
    %69 = vector.load %arg9[%c432_99, %c0_100] : memref<1024x32xbf16, #tpu.memory_space<vmem>>, vector<16x32xbf16>
    %c16_101 = arith.constant 16 : index
    %c416_102 = arith.constant 416 : index
    %70 = vector.load %arg10[%c16_101, %c416_102] : memref<144x512xbf16, #tpu.memory_space<vmem>>, vector<16x32xbf16>
    tpu.vector_store %arg10[%c16_101, %c416_102], %69 {strides = array<i32>} : memref<144x512xbf16, #tpu.memory_space<vmem>>, vector<16x32xbf16>,
    %c448_103 = arith.constant 448 : index
    %c0_104 = arith.constant 0 : index
    %71 = vector.load %arg9[%c448_103, %c0_104] : memref<1024x32xbf16, #tpu.memory_space<vmem>>, vector<16x32xbf16>
    %c16_105 = arith.constant 16 : index
    %c448_106 = arith.constant 448 : index
    %72 = vector.load %arg10[%c16_105, %c448_106] : memref<144x512xbf16, #tpu.memory_space<vmem>>, vector<16x32xbf16>
    tpu.vector_store %arg10[%c16_105, %c448_106], %71 {strides = array<i32>} : memref<144x512xbf16, #tpu.memory_space<vmem>>, vector<16x32xbf16>,
    %c464 = arith.constant 464 : index
    %c0_107 = arith.constant 0 : index
    %73 = vector.load %arg9[%c464, %c0_107] : memref<1024x32xbf16, #tpu.memory_space<vmem>>, vector<16x32xbf16>
    %c16_108 = arith.constant 16 : index
    %c480_109 = arith.constant 480 : index
    %74 = vector.load %arg10[%c16_108, %c480_109] : memref<144x512xbf16, #tpu.memory_space<vmem>>, vector<16x32xbf16>
    tpu.vector_store %arg10[%c16_108, %c480_109], %73 {strides = array<i32>} : memref<144x512xbf16, #tpu.memory_space<vmem>>, vector<16x32xbf16>,
    %c64_110 = arith.constant 64 : index
    %c0_111 = arith.constant 0 : index
    %75 = vector.load %arg9[%c64_110, %c0_111] : memref<1024x32xbf16, #tpu.memory_space<vmem>>, vector<16x32xbf16>
    %c32_112 = arith.constant 32 : index
    %c0_113 = arith.constant 0 : index
    %76 = vector.load %arg10[%c32_112, %c0_113] : memref<144x512xbf16, #tpu.memory_space<vmem>>, vector<16x32xbf16>
    tpu.vector_store %arg10[%c32_112, %c0_113], %75 {strides = array<i32>} : memref<144x512xbf16, #tpu.memory_space<vmem>>, vector<16x32xbf16>,
    %c80_114 = arith.constant 80 : index
    %c0_115 = arith.constant 0 : index
    %77 = vector.load %arg9[%c80_114, %c0_115] : memref<1024x32xbf16, #tpu.memory_space<vmem>>, vector<16x32xbf16>
    %c32_116 = arith.constant 32 : index
    %c32_117 = arith.constant 32 : index
    %78 = vector.load %arg10[%c32_116, %c32_117] : memref<144x512xbf16, #tpu.memory_space<vmem>>, vector<16x32xbf16>
    tpu.vector_store %arg10[%c32_116, %c32_117], %77 {strides = array<i32>} : memref<144x512xbf16, #tpu.memory_space<vmem>>, vector<16x32xbf16>,
    %c96_118 = arith.constant 96 : index
    %c0_119 = arith.constant 0 : index
    %79 = vector.load %arg9[%c96_118, %c0_119] : memref<1024x32xbf16, #tpu.memory_space<vmem>>, vector<16x32xbf16>
    %c32_120 = arith.constant 32 : index
    %c64_121 = arith.constant 64 : index
    %80 = vector.load %arg10[%c32_120, %c64_121] : memref<144x512xbf16, #tpu.memory_space<vmem>>, vector<16x32xbf16>
    tpu.vector_store %arg10[%c32_120, %c64_121], %79 {strides = array<i32>} : memref<144x512xbf16, #tpu.memory_space<vmem>>, vector<16x32xbf16>,
    %c112 = arith.constant 112 : index
    %c0_122 = arith.constant 0 : index
    %81 = vector.load %arg9[%c112, %c0_122] : memref<1024x32xbf16, #tpu.memory_space<vmem>>, vector<16x32xbf16>
    %c32_123 = arith.constant 32 : index
    %c96_124 = arith.constant 96 : index
    %82 = vector.load %arg10[%c32_123, %c96_124] : memref<144x512xbf16, #tpu.memory_space<vmem>>, vector<16x32xbf16>
    tpu.vector_store %arg10[%c32_123, %c96_124], %81 {strides = array<i32>} : memref<144x512xbf16, #tpu.memory_space<vmem>>, vector<16x32xbf16>,
    %c192_125 = arith.constant 192 : index
    %c0_126 = arith.constant 0 : index
    %83 = vector.load %arg9[%c192_125, %c0_126] : memref<1024x32xbf16, #tpu.memory_space<vmem>>, vector<16x32xbf16>
    %c32_127 = arith.constant 32 : index
    %c128_128 = arith.constant 128 : index
    %84 = vector.load %arg10[%c32_127, %c128_128] : memref<144x512xbf16, #tpu.memory_space<vmem>>, vector<16x32xbf16>
    tpu.vector_store %arg10[%c32_127, %c128_128], %83 {strides = array<i32>} : memref<144x512xbf16, #tpu.memory_space<vmem>>, vector<16x32xbf16>,
    %c208_129 = arith.constant 208 : index
    %c0_130 = arith.constant 0 : index
    %85 = vector.load %arg9[%c208_129, %c0_130] : memref<1024x32xbf16, #tpu.memory_space<vmem>>, vector<16x32xbf16>
    %c32_131 = arith.constant 32 : index
    %c160_132 = arith.constant 160 : index
    %86 = vector.load %arg10[%c32_131, %c160_132] : memref<144x512xbf16, #tpu.memory_space<vmem>>, vector<16x32xbf16>
    tpu.vector_store %arg10[%c32_131, %c160_132], %85 {strides = array<i32>} : memref<144x512xbf16, #tpu.memory_space<vmem>>, vector<16x32xbf16>,
    %c224_133 = arith.constant 224 : index
    %c0_134 = arith.constant 0 : index
    %87 = vector.load %arg9[%c224_133, %c0_134] : memref<1024x32xbf16, #tpu.memory_space<vmem>>, vector<16x32xbf16>
    %c32_135 = arith.constant 32 : index
    %c192_136 = arith.constant 192 : index
    %88 = vector.load %arg10[%c32_135, %c192_136] : memref<144x512xbf16, #tpu.memory_space<vmem>>, vector<16x32xbf16>
    tpu.vector_store %arg10[%c32_135, %c192_136], %87 {strides = array<i32>} : memref<144x512xbf16, #tpu.memory_space<vmem>>, vector<16x32xbf16>,
    %c240 = arith.constant 240 : index
    %c0_137 = arith.constant 0 : index
    %89 = vector.load %arg9[%c240, %c0_137] : memref<1024x32xbf16, #tpu.memory_space<vmem>>, vector<16x32xbf16>
    %c32_138 = arith.constant 32 : index
    %c224_139 = arith.constant 224 : index
    %90 = vector.load %arg10[%c32_138, %c224_139] : memref<144x512xbf16, #tpu.memory_space<vmem>>, vector<16x32xbf16>
    tpu.vector_store %arg10[%c32_138, %c224_139], %89 {strides = array<i32>} : memref<144x512xbf16, #tpu.memory_space<vmem>>, vector<16x32xbf16>,
    %c320_140 = arith.constant 320 : index
    %c0_141 = arith.constant 0 : index
    %91 = vector.load %arg9[%c320_140, %c0_141] : memref<1024x32xbf16, #tpu.memory_space<vmem>>, vector<16x32xbf16>
    %c32_142 = arith.constant 32 : index
    %c256_143 = arith.constant 256 : index
    %92 = vector.load %arg10[%c32_142, %c256_143] : memref<144x512xbf16, #tpu.memory_space<vmem>>, vector<16x32xbf16>
    tpu.vector_store %arg10[%c32_142, %c256_143], %91 {strides = array<i32>} : memref<144x512xbf16, #tpu.memory_space<vmem>>, vector<16x32xbf16>,
    %c336_144 = arith.constant 336 : index
    %c0_145 = arith.constant 0 : index
    %93 = vector.load %arg9[%c336_144, %c0_145] : memref<1024x32xbf16, #tpu.memory_space<vmem>>, vector<16x32xbf16>
    %c32_146 = arith.constant 32 : index
    %c288_147 = arith.constant 288 : index
    %94 = vector.load %arg10[%c32_146, %c288_147] : memref<144x512xbf16, #tpu.memory_space<vmem>>, vector<16x32xbf16>
    tpu.vector_store %arg10[%c32_146, %c288_147], %93 {strides = array<i32>} : memref<144x512xbf16, #tpu.memory_space<vmem>>, vector<16x32xbf16>,
    %c352_148 = arith.constant 352 : index
    %c0_149 = arith.constant 0 : index
    %95 = vector.load %arg9[%c352_148, %c0_149] : memref<1024x32xbf16, #tpu.memory_space<vmem>>, vector<16x32xbf16>
    %c32_150 = arith.constant 32 : index
    %c320_151 = arith.constant 320 : index
    %96 = vector.load %arg10[%c32_150, %c320_151] : memref<144x512xbf16, #tpu.memory_space<vmem>>, vector<16x32xbf16>
    tpu.vector_store %arg10[%c32_150, %c320_151], %95 {strides = array<i32>} : memref<144x512xbf16, #tpu.memory_space<vmem>>, vector<16x32xbf16>,
    %c368 = arith.constant 368 : index
    %c0_152 = arith.constant 0 : index
    %97 = vector.load %arg9[%c368, %c0_152] : memref<1024x32xbf16, #tpu.memory_space<vmem>>, vector<16x32xbf16>
    %c32_153 = arith.constant 32 : index
    %c352_154 = arith.constant 352 : index
    %98 = vector.load %arg10[%c32_153, %c352_154] : memref<144x512xbf16, #tpu.memory_space<vmem>>, vector<16x32xbf16>
    tpu.vector_store %arg10[%c32_153, %c352_154], %97 {strides = array<i32>} : memref<144x512xbf16, #tpu.memory_space<vmem>>, vector<16x32xbf16>,
    %c448_155 = arith.constant 448 : index
    %c0_156 = arith.constant 0 : index
    %99 = vector.load %arg9[%c448_155, %c0_156] : memref<1024x32xbf16, #tpu.memory_space<vmem>>, vector<16x32xbf16>
    %c32_157 = arith.constant 32 : index
    %c384_158 = arith.constant 384 : index
    %100 = vector.load %arg10[%c32_157, %c384_158] : memref<144x512xbf16, #tpu.memory_space<vmem>>, vector<16x32xbf16>
    tpu.vector_store %arg10[%c32_157, %c384_158], %99 {strides = array<i32>} : memref<144x512xbf16, #tpu.memory_space<vmem>>, vector<16x32xbf16>,
    %c464_159 = arith.constant 464 : index
    %c0_160 = arith.constant 0 : index
    %101 = vector.load %arg9[%c464_159, %c0_160] : memref<1024x32xbf16, #tpu.memory_space<vmem>>, vector<16x32xbf16>
    %c32_161 = arith.constant 32 : index
    %c416_162 = arith.constant 416 : index
    %102 = vector.load %arg10[%c32_161, %c416_162] : memref<144x512xbf16, #tpu.memory_space<vmem>>, vector<16x32xbf16>
    tpu.vector_store %arg10[%c32_161, %c416_162], %101 {strides = array<i32>} : memref<144x512xbf16, #tpu.memory_space<vmem>>, vector<16x32xbf16>,
    %c480_163 = arith.constant 480 : index
    %c0_164 = arith.constant 0 : index
    %103 = vector.load %arg9[%c480_163, %c0_164] : memref<1024x32xbf16, #tpu.memory_space<vmem>>, vector<16x32xbf16>
    %c32_165 = arith.constant 32 : index
    %c448_166 = arith.constant 448 : index
    %104 = vector.load %arg10[%c32_165, %c448_166] : memref<144x512xbf16, #tpu.memory_space<vmem>>, vector<16x32xbf16>
    tpu.vector_store %arg10[%c32_165, %c448_166], %103 {strides = array<i32>} : memref<144x512xbf16, #tpu.memory_space<vmem>>, vector<16x32xbf16>,
    %c496 = arith.constant 496 : index
    %c0_167 = arith.constant 0 : index
    %105 = vector.load %arg9[%c496, %c0_167] : memref<1024x32xbf16, #tpu.memory_space<vmem>>, vector<16x32xbf16>
    %c32_168 = arith.constant 32 : index
    %c480_169 = arith.constant 480 : index
    %106 = vector.load %arg10[%c32_168, %c480_169] : memref<144x512xbf16, #tpu.memory_space<vmem>>, vector<16x32xbf16>
    tpu.vector_store %arg10[%c32_168, %c480_169], %105 {strides = array<i32>} : memref<144x512xbf16, #tpu.memory_space<vmem>>, vector<16x32xbf16>,
    %c256_170 = arith.constant 256 : index
    %c0_171 = arith.constant 0 : index
    %107 = vector.load %arg9[%c256_170, %c0_171] : memref<1024x32xbf16, #tpu.memory_space<vmem>>, vector<16x32xbf16>
    %c48_172 = arith.constant 48 : index
    %c0_173 = arith.constant 0 : index
    %108 = vector.load %arg10[%c48_172, %c0_173] : memref<144x512xbf16, #tpu.memory_space<vmem>>, vector<16x32xbf16>
    tpu.vector_store %arg10[%c48_172, %c0_173], %107 {strides = array<i32>} : memref<144x512xbf16, #tpu.memory_space<vmem>>, vector<16x32xbf16>,
    %c272_174 = arith.constant 272 : index
    %c0_175 = arith.constant 0 : index
    %109 = vector.load %arg9[%c272_174, %c0_175] : memref<1024x32xbf16, #tpu.memory_space<vmem>>, vector<16x32xbf16>
    %c48_176 = arith.constant 48 : index
    %c32_177 = arith.constant 32 : index
    %110 = vector.load %arg10[%c48_176, %c32_177] : memref<144x512xbf16, #tpu.memory_space<vmem>>, vector<16x32xbf16>
    tpu.vector_store %arg10[%c48_176, %c32_177], %109 {strides = array<i32>} : memref<144x512xbf16, #tpu.memory_space<vmem>>, vector<16x32xbf16>,
    %c288_178 = arith.constant 288 : index
    %c0_179 = arith.constant 0 : index
    %111 = vector.load %arg9[%c288_178, %c0_179] : memref<1024x32xbf16, #tpu.memory_space<vmem>>, vector<16x32xbf16>
    %c48_180 = arith.constant 48 : index
    %c64_181 = arith.constant 64 : index
    %112 = vector.load %arg10[%c48_180, %c64_181] : memref<144x512xbf16, #tpu.memory_space<vmem>>, vector<16x32xbf16>
    tpu.vector_store %arg10[%c48_180, %c64_181], %111 {strides = array<i32>} : memref<144x512xbf16, #tpu.memory_space<vmem>>, vector<16x32xbf16>,
    %c304_182 = arith.constant 304 : index
    %c0_183 = arith.constant 0 : index
    %113 = vector.load %arg9[%c304_182, %c0_183] : memref<1024x32xbf16, #tpu.memory_space<vmem>>, vector<16x32xbf16>
    %c48_184 = arith.constant 48 : index
    %c96_185 = arith.constant 96 : index
    %114 = vector.load %arg10[%c48_184, %c96_185] : memref<144x512xbf16, #tpu.memory_space<vmem>>, vector<16x32xbf16>
    tpu.vector_store %arg10[%c48_184, %c96_185], %113 {strides = array<i32>} : memref<144x512xbf16, #tpu.memory_space<vmem>>, vector<16x32xbf16>,
    %c384_186 = arith.constant 384 : index
    %c0_187 = arith.constant 0 : index
    %115 = vector.load %arg9[%c384_186, %c0_187] : memref<1024x32xbf16, #tpu.memory_space<vmem>>, vector<16x32xbf16>
    %c48_188 = arith.constant 48 : index
    %c128_189 = arith.constant 128 : index
    %116 = vector.load %arg10[%c48_188, %c128_189] : memref<144x512xbf16, #tpu.memory_space<vmem>>, vector<16x32xbf16>
    tpu.vector_store %arg10[%c48_188, %c128_189], %115 {strides = array<i32>} : memref<144x512xbf16, #tpu.memory_space<vmem>>, vector<16x32xbf16>,
    %c400_190 = arith.constant 400 : index
    %c0_191 = arith.constant 0 : index
    %117 = vector.load %arg9[%c400_190, %c0_191] : memref<1024x32xbf16, #tpu.memory_space<vmem>>, vector<16x32xbf16>
    %c48_192 = arith.constant 48 : index
    %c160_193 = arith.constant 160 : index
    %118 = vector.load %arg10[%c48_192, %c160_193] : memref<144x512xbf16, #tpu.memory_space<vmem>>, vector<16x32xbf16>
    tpu.vector_store %arg10[%c48_192, %c160_193], %117 {strides = array<i32>} : memref<144x512xbf16, #tpu.memory_space<vmem>>, vector<16x32xbf16>,
    %c416_194 = arith.constant 416 : index
    %c0_195 = arith.constant 0 : index
    %119 = vector.load %arg9[%c416_194, %c0_195] : memref<1024x32xbf16, #tpu.memory_space<vmem>>, vector<16x32xbf16>
    %c48_196 = arith.constant 48 : index
    %c192_197 = arith.constant 192 : index
    %120 = vector.load %arg10[%c48_196, %c192_197] : memref<144x512xbf16, #tpu.memory_space<vmem>>, vector<16x32xbf16>
    tpu.vector_store %arg10[%c48_196, %c192_197], %119 {strides = array<i32>} : memref<144x512xbf16, #tpu.memory_space<vmem>>, vector<16x32xbf16>,
    %c432_198 = arith.constant 432 : index
    %c0_199 = arith.constant 0 : index
    %121 = vector.load %arg9[%c432_198, %c0_199] : memref<1024x32xbf16, #tpu.memory_space<vmem>>, vector<16x32xbf16>
    %c48_200 = arith.constant 48 : index
    %c224_201 = arith.constant 224 : index
    %122 = vector.load %arg10[%c48_200, %c224_201] : memref<144x512xbf16, #tpu.memory_space<vmem>>, vector<16x32xbf16>
    tpu.vector_store %arg10[%c48_200, %c224_201], %121 {strides = array<i32>} : memref<144x512xbf16, #tpu.memory_space<vmem>>, vector<16x32xbf16>,
    %c512 = arith.constant 512 : index
    %c0_202 = arith.constant 0 : index
    %123 = vector.load %arg9[%c512, %c0_202] : memref<1024x32xbf16, #tpu.memory_space<vmem>>, vector<16x32xbf16>
    %c48_203 = arith.constant 48 : index
    %c256_204 = arith.constant 256 : index
    %124 = vector.load %arg10[%c48_203, %c256_204] : memref<144x512xbf16, #tpu.memory_space<vmem>>, vector<16x32xbf16>
    tpu.vector_store %arg10[%c48_203, %c256_204], %123 {strides = array<i32>} : memref<144x512xbf16, #tpu.memory_space<vmem>>, vector<16x32xbf16>,
    %c528 = arith.constant 528 : index
    %c0_205 = arith.constant 0 : index
    %125 = vector.load %arg9[%c528, %c0_205] : memref<1024x32xbf16, #tpu.memory_space<vmem>>, vector<16x32xbf16>
    %c48_206 = arith.constant 48 : index
    %c288_207 = arith.constant 288 : index
    %126 = vector.load %arg10[%c48_206, %c288_207] : memref<144x512xbf16, #tpu.memory_space<vmem>>, vector<16x32xbf16>
    tpu.vector_store %arg10[%c48_206, %c288_207], %125 {strides = array<i32>} : memref<144x512xbf16, #tpu.memory_space<vmem>>, vector<16x32xbf16>,
    %c544 = arith.constant 544 : index
    %c0_208 = arith.constant 0 : index
    %127 = vector.load %arg9[%c544, %c0_208] : memref<1024x32xbf16, #tpu.memory_space<vmem>>, vector<16x32xbf16>
    %c48_209 = arith.constant 48 : index
    %c320_210 = arith.constant 320 : index
    %128 = vector.load %arg10[%c48_209, %c320_210] : memref<144x512xbf16, #tpu.memory_space<vmem>>, vector<16x32xbf16>
    tpu.vector_store %arg10[%c48_209, %c320_210], %127 {strides = array<i32>} : memref<144x512xbf16, #tpu.memory_space<vmem>>, vector<16x32xbf16>,
    %c560 = arith.constant 560 : index
    %c0_211 = arith.constant 0 : index
    %129 = vector.load %arg9[%c560, %c0_211] : memref<1024x32xbf16, #tpu.memory_space<vmem>>, vector<16x32xbf16>
    %c48_212 = arith.constant 48 : index
    %c352_213 = arith.constant 352 : index
    %130 = vector.load %arg10[%c48_212, %c352_213] : memref<144x512xbf16, #tpu.memory_space<vmem>>, vector<16x32xbf16>
    tpu.vector_store %arg10[%c48_212, %c352_213], %129 {strides = array<i32>} : memref<144x512xbf16, #tpu.memory_space<vmem>>, vector<16x32xbf16>,
    %c640 = arith.constant 640 : index
    %c0_214 = arith.constant 0 : index
    %131 = vector.load %arg9[%c640, %c0_214] : memref<1024x32xbf16, #tpu.memory_space<vmem>>, vector<16x32xbf16>
    %c48_215 = arith.constant 48 : index
    %c384_216 = arith.constant 384 : index
    %132 = vector.load %arg10[%c48_215, %c384_216] : memref<144x512xbf16, #tpu.memory_space<vmem>>, vector<16x32xbf16>
    tpu.vector_store %arg10[%c48_215, %c384_216], %131 {strides = array<i32>} : memref<144x512xbf16, #tpu.memory_space<vmem>>, vector<16x32xbf16>,
    %c656 = arith.constant 656 : index
    %c0_217 = arith.constant 0 : index
    %133 = vector.load %arg9[%c656, %c0_217] : memref<1024x32xbf16, #tpu.memory_space<vmem>>, vector<16x32xbf16>
    %c48_218 = arith.constant 48 : index
    %c416_219 = arith.constant 416 : index
    %134 = vector.load %arg10[%c48_218, %c416_219] : memref<144x512xbf16, #tpu.memory_space<vmem>>, vector<16x32xbf16>
    tpu.vector_store %arg10[%c48_218, %c416_219], %133 {strides = array<i32>} : memref<144x512xbf16, #tpu.memory_space<vmem>>, vector<16x32xbf16>,
    %c672 = arith.constant 672 : index
    %c0_220 = arith.constant 0 : index
    %135 = vector.load %arg9[%c672, %c0_220] : memref<1024x32xbf16, #tpu.memory_space<vmem>>, vector<16x32xbf16>
    %c48_221 = arith.constant 48 : index
    %c448_222 = arith.constant 448 : index
    %136 = vector.load %arg10[%c48_221, %c448_222] : memref<144x512xbf16, #tpu.memory_space<vmem>>, vector<16x32xbf16>
    tpu.vector_store %arg10[%c48_221, %c448_222], %135 {strides = array<i32>} : memref<144x512xbf16, #tpu.memory_space<vmem>>, vector<16x32xbf16>,
    %c688 = arith.constant 688 : index
    %c0_223 = arith.constant 0 : index
    %137 = vector.load %arg9[%c688, %c0_223] : memref<1024x32xbf16, #tpu.memory_space<vmem>>, vector<16x32xbf16>
    %c48_224 = arith.constant 48 : index
    %c480_225 = arith.constant 480 : index
    %138 = vector.load %arg10[%c48_224, %c480_225] : memref<144x512xbf16, #tpu.memory_space<vmem>>, vector<16x32xbf16>
    tpu.vector_store %arg10[%c48_224, %c480_225], %137 {strides = array<i32>} : memref<144x512xbf16, #tpu.memory_space<vmem>>, vector<16x32xbf16>,
    %c288_226 = arith.constant 288 : index
    %c0_227 = arith.constant 0 : index
    %139 = vector.load %arg9[%c288_226, %c0_227] : memref<1024x32xbf16, #tpu.memory_space<vmem>>, vector<16x32xbf16>
    %c64_228 = arith.constant 64 : index
    %c0_229 = arith.constant 0 : index
    %140 = vector.load %arg10[%c64_228, %c0_229] : memref<144x512xbf16, #tpu.memory_space<vmem>>, vector<16x32xbf16>
    tpu.vector_store %arg10[%c64_228, %c0_229], %139 {strides = array<i32>} : memref<144x512xbf16, #tpu.memory_space<vmem>>, vector<16x32xbf16>,
    %c304_230 = arith.constant 304 : index
    %c0_231 = arith.constant 0 : index
    %141 = vector.load %arg9[%c304_230, %c0_231] : memref<1024x32xbf16, #tpu.memory_space<vmem>>, vector<16x32xbf16>
    %c64_232 = arith.constant 64 : index
    %c32_233 = arith.constant 32 : index
    %142 = vector.load %arg10[%c64_232, %c32_233] : memref<144x512xbf16, #tpu.memory_space<vmem>>, vector<16x32xbf16>
    tpu.vector_store %arg10[%c64_232, %c32_233], %141 {strides = array<i32>} : memref<144x512xbf16, #tpu.memory_space<vmem>>, vector<16x32xbf16>,
    %c320_234 = arith.constant 320 : index
    %c0_235 = arith.constant 0 : index
    %143 = vector.load %arg9[%c320_234, %c0_235] : memref<1024x32xbf16, #tpu.memory_space<vmem>>, vector<16x32xbf16>
    %c64_236 = arith.constant 64 : index
    %c64_237 = arith.constant 64 : index
    %144 = vector.load %arg10[%c64_236, %c64_237] : memref<144x512xbf16, #tpu.memory_space<vmem>>, vector<16x32xbf16>
    tpu.vector_store %arg10[%c64_236, %c64_237], %143 {strides = array<i32>} : memref<144x512xbf16, #tpu.memory_space<vmem>>, vector<16x32xbf16>,
    %c336_238 = arith.constant 336 : index
    %c0_239 = arith.constant 0 : index
    %145 = vector.load %arg9[%c336_238, %c0_239] : memref<1024x32xbf16, #tpu.memory_space<vmem>>, vector<16x32xbf16>
    %c64_240 = arith.constant 64 : index
    %c96_241 = arith.constant 96 : index
    %146 = vector.load %arg10[%c64_240, %c96_241] : memref<144x512xbf16, #tpu.memory_space<vmem>>, vector<16x32xbf16>
    tpu.vector_store %arg10[%c64_240, %c96_241], %145 {strides = array<i32>} : memref<144x512xbf16, #tpu.memory_space<vmem>>, vector<16x32xbf16>,
    %c416_242 = arith.constant 416 : index
    %c0_243 = arith.constant 0 : index
    %147 = vector.load %arg9[%c416_242, %c0_243] : memref<1024x32xbf16, #tpu.memory_space<vmem>>, vector<16x32xbf16>
    %c64_244 = arith.constant 64 : index
    %c128_245 = arith.constant 128 : index
    %148 = vector.load %arg10[%c64_244, %c128_245] : memref<144x512xbf16, #tpu.memory_space<vmem>>, vector<16x32xbf16>
    tpu.vector_store %arg10[%c64_244, %c128_245], %147 {strides = array<i32>} : memref<144x512xbf16, #tpu.memory_space<vmem>>, vector<16x32xbf16>,
    %c432_246 = arith.constant 432 : index
    %c0_247 = arith.constant 0 : index
    %149 = vector.load %arg9[%c432_246, %c0_247] : memref<1024x32xbf16, #tpu.memory_space<vmem>>, vector<16x32xbf16>
    %c64_248 = arith.constant 64 : index
    %c160_249 = arith.constant 160 : index
    %150 = vector.load %arg10[%c64_248, %c160_249] : memref<144x512xbf16, #tpu.memory_space<vmem>>, vector<16x32xbf16>
    tpu.vector_store %arg10[%c64_248, %c160_249], %149 {strides = array<i32>} : memref<144x512xbf16, #tpu.memory_space<vmem>>, vector<16x32xbf16>,
    %c448_250 = arith.constant 448 : index
    %c0_251 = arith.constant 0 : index
    %151 = vector.load %arg9[%c448_250, %c0_251] : memref<1024x32xbf16, #tpu.memory_space<vmem>>, vector<16x32xbf16>
    %c64_252 = arith.constant 64 : index
    %c192_253 = arith.constant 192 : index
    %152 = vector.load %arg10[%c64_252, %c192_253] : memref<144x512xbf16, #tpu.memory_space<vmem>>, vector<16x32xbf16>
    tpu.vector_store %arg10[%c64_252, %c192_253], %151 {strides = array<i32>} : memref<144x512xbf16, #tpu.memory_space<vmem>>, vector<16x32xbf16>,
    %c464_254 = arith.constant 464 : index
    %c0_255 = arith.constant 0 : index
    %153 = vector.load %arg9[%c464_254, %c0_255] : memref<1024x32xbf16, #tpu.memory_space<vmem>>, vector<16x32xbf16>
    %c64_256 = arith.constant 64 : index
    %c224_257 = arith.constant 224 : index
    %154 = vector.load %arg10[%c64_256, %c224_257] : memref<144x512xbf16, #tpu.memory_space<vmem>>, vector<16x32xbf16>
    tpu.vector_store %arg10[%c64_256, %c224_257], %153 {strides = array<i32>} : memref<144x512xbf16, #tpu.memory_space<vmem>>, vector<16x32xbf16>,
    %c544_258 = arith.constant 544 : index
    %c0_259 = arith.constant 0 : index
    %155 = vector.load %arg9[%c544_258, %c0_259] : memref<1024x32xbf16, #tpu.memory_space<vmem>>, vector<16x32xbf16>
    %c64_260 = arith.constant 64 : index
    %c256_261 = arith.constant 256 : index
    %156 = vector.load %arg10[%c64_260, %c256_261] : memref<144x512xbf16, #tpu.memory_space<vmem>>, vector<16x32xbf16>
    tpu.vector_store %arg10[%c64_260, %c256_261], %155 {strides = array<i32>} : memref<144x512xbf16, #tpu.memory_space<vmem>>, vector<16x32xbf16>,
    %c560_262 = arith.constant 560 : index
    %c0_263 = arith.constant 0 : index
    %157 = vector.load %arg9[%c560_262, %c0_263] : memref<1024x32xbf16, #tpu.memory_space<vmem>>, vector<16x32xbf16>
    %c64_264 = arith.constant 64 : index
    %c288_265 = arith.constant 288 : index
    %158 = vector.load %arg10[%c64_264, %c288_265] : memref<144x512xbf16, #tpu.memory_space<vmem>>, vector<16x32xbf16>
    tpu.vector_store %arg10[%c64_264, %c288_265], %157 {strides = array<i32>} : memref<144x512xbf16, #tpu.memory_space<vmem>>, vector<16x32xbf16>,
    %c576 = arith.constant 576 : index
    %c0_266 = arith.constant 0 : index
    %159 = vector.load %arg9[%c576, %c0_266] : memref<1024x32xbf16, #tpu.memory_space<vmem>>, vector<16x32xbf16>
    %c64_267 = arith.constant 64 : index
    %c320_268 = arith.constant 320 : index
    %160 = vector.load %arg10[%c64_267, %c320_268] : memref<144x512xbf16, #tpu.memory_space<vmem>>, vector<16x32xbf16>
    tpu.vector_store %arg10[%c64_267, %c320_268], %159 {strides = array<i32>} : memref<144x512xbf16, #tpu.memory_space<vmem>>, vector<16x32xbf16>,
    %c592 = arith.constant 592 : index
    %c0_269 = arith.constant 0 : index
    %161 = vector.load %arg9[%c592, %c0_269] : memref<1024x32xbf16, #tpu.memory_space<vmem>>, vector<16x32xbf16>
    %c64_270 = arith.constant 64 : index
    %c352_271 = arith.constant 352 : index
    %162 = vector.load %arg10[%c64_270, %c352_271] : memref<144x512xbf16, #tpu.memory_space<vmem>>, vector<16x32xbf16>
    tpu.vector_store %arg10[%c64_270, %c352_271], %161 {strides = array<i32>} : memref<144x512xbf16, #tpu.memory_space<vmem>>, vector<16x32xbf16>,
    %c672_272 = arith.constant 672 : index
    %c0_273 = arith.constant 0 : index
    %163 = vector.load %arg9[%c672_272, %c0_273] : memref<1024x32xbf16, #tpu.memory_space<vmem>>, vector<16x32xbf16>
    %c64_274 = arith.constant 64 : index
    %c384_275 = arith.constant 384 : index
    %164 = vector.load %arg10[%c64_274, %c384_275] : memref<144x512xbf16, #tpu.memory_space<vmem>>, vector<16x32xbf16>
    tpu.vector_store %arg10[%c64_274, %c384_275], %163 {strides = array<i32>} : memref<144x512xbf16, #tpu.memory_space<vmem>>, vector<16x32xbf16>,
    %c688_276 = arith.constant 688 : index
    %c0_277 = arith.constant 0 : index
    %165 = vector.load %arg9[%c688_276, %c0_277] : memref<1024x32xbf16, #tpu.memory_space<vmem>>, vector<16x32xbf16>
    %c64_278 = arith.constant 64 : index
    %c416_279 = arith.constant 416 : index
    %166 = vector.load %arg10[%c64_278, %c416_279] : memref<144x512xbf16, #tpu.memory_space<vmem>>, vector<16x32xbf16>
    tpu.vector_store %arg10[%c64_278, %c416_279], %165 {strides = array<i32>} : memref<144x512xbf16, #tpu.memory_space<vmem>>, vector<16x32xbf16>,
    %c704 = arith.constant 704 : index
    %c0_280 = arith.constant 0 : index
    %167 = vector.load %arg9[%c704, %c0_280] : memref<1024x32xbf16, #tpu.memory_space<vmem>>, vector<16x32xbf16>
    %c64_281 = arith.constant 64 : index
    %c448_282 = arith.constant 448 : index
    %168 = vector.load %arg10[%c64_281, %c448_282] : memref<144x512xbf16, #tpu.memory_space<vmem>>, vector<16x32xbf16>
    tpu.vector_store %arg10[%c64_281, %c448_282], %167 {strides = array<i32>} : memref<144x512xbf16, #tpu.memory_space<vmem>>, vector<16x32xbf16>,
    %c720 = arith.constant 720 : index
    %c0_283 = arith.constant 0 : index
    %169 = vector.load %arg9[%c720, %c0_283] : memref<1024x32xbf16, #tpu.memory_space<vmem>>, vector<16x32xbf16>
    %c64_284 = arith.constant 64 : index
    %c480_285 = arith.constant 480 : index
    %170 = vector.load %arg10[%c64_284, %c480_285] : memref<144x512xbf16, #tpu.memory_space<vmem>>, vector<16x32xbf16>
    tpu.vector_store %arg10[%c64_284, %c480_285], %169 {strides = array<i32>} : memref<144x512xbf16, #tpu.memory_space<vmem>>, vector<16x32xbf16>,
    %c320_286 = arith.constant 320 : index
    %c0_287 = arith.constant 0 : index
    %171 = vector.load %arg9[%c320_286, %c0_287] : memref<1024x32xbf16, #tpu.memory_space<vmem>>, vector<16x32xbf16>
    %c80_288 = arith.constant 80 : index
    %c0_289 = arith.constant 0 : index
    %172 = vector.load %arg10[%c80_288, %c0_289] : memref<144x512xbf16, #tpu.memory_space<vmem>>, vector<16x32xbf16>
    tpu.vector_store %arg10[%c80_288, %c0_289], %171 {strides = array<i32>} : memref<144x512xbf16, #tpu.memory_space<vmem>>, vector<16x32xbf16>,
    %c336_290 = arith.constant 336 : index
    %c0_291 = arith.constant 0 : index
    %173 = vector.load %arg9[%c336_290, %c0_291] : memref<1024x32xbf16, #tpu.memory_space<vmem>>, vector<16x32xbf16>
    %c80_292 = arith.constant 80 : index
    %c32_293 = arith.constant 32 : index
    %174 = vector.load %arg10[%c80_292, %c32_293] : memref<144x512xbf16, #tpu.memory_space<vmem>>, vector<16x32xbf16>
    tpu.vector_store %arg10[%c80_292, %c32_293], %173 {strides = array<i32>} : memref<144x512xbf16, #tpu.memory_space<vmem>>, vector<16x32xbf16>,
    %c352_294 = arith.constant 352 : index
    %c0_295 = arith.constant 0 : index
    %175 = vector.load %arg9[%c352_294, %c0_295] : memref<1024x32xbf16, #tpu.memory_space<vmem>>, vector<16x32xbf16>
    %c80_296 = arith.constant 80 : index
    %c64_297 = arith.constant 64 : index
    %176 = vector.load %arg10[%c80_296, %c64_297] : memref<144x512xbf16, #tpu.memory_space<vmem>>, vector<16x32xbf16>
    tpu.vector_store %arg10[%c80_296, %c64_297], %175 {strides = array<i32>} : memref<144x512xbf16, #tpu.memory_space<vmem>>, vector<16x32xbf16>,
    %c368_298 = arith.constant 368 : index
    %c0_299 = arith.constant 0 : index
    %177 = vector.load %arg9[%c368_298, %c0_299] : memref<1024x32xbf16, #tpu.memory_space<vmem>>, vector<16x32xbf16>
    %c80_300 = arith.constant 80 : index
    %c96_301 = arith.constant 96 : index
    %178 = vector.load %arg10[%c80_300, %c96_301] : memref<144x512xbf16, #tpu.memory_space<vmem>>, vector<16x32xbf16>
    tpu.vector_store %arg10[%c80_300, %c96_301], %177 {strides = array<i32>} : memref<144x512xbf16, #tpu.memory_space<vmem>>, vector<16x32xbf16>,
    %c448_302 = arith.constant 448 : index
    %c0_303 = arith.constant 0 : index
    %179 = vector.load %arg9[%c448_302, %c0_303] : memref<1024x32xbf16, #tpu.memory_space<vmem>>, vector<16x32xbf16>
    %c80_304 = arith.constant 80 : index
    %c128_305 = arith.constant 128 : index
    %180 = vector.load %arg10[%c80_304, %c128_305] : memref<144x512xbf16, #tpu.memory_space<vmem>>, vector<16x32xbf16>
    tpu.vector_store %arg10[%c80_304, %c128_305], %179 {strides = array<i32>} : memref<144x512xbf16, #tpu.memory_space<vmem>>, vector<16x32xbf16>,
    %c464_306 = arith.constant 464 : index
    %c0_307 = arith.constant 0 : index
    %181 = vector.load %arg9[%c464_306, %c0_307] : memref<1024x32xbf16, #tpu.memory_space<vmem>>, vector<16x32xbf16>
    %c80_308 = arith.constant 80 : index
    %c160_309 = arith.constant 160 : index
    %182 = vector.load %arg10[%c80_308, %c160_309] : memref<144x512xbf16, #tpu.memory_space<vmem>>, vector<16x32xbf16>
    tpu.vector_store %arg10[%c80_308, %c160_309], %181 {strides = array<i32>} : memref<144x512xbf16, #tpu.memory_space<vmem>>, vector<16x32xbf16>,
    %c480_310 = arith.constant 480 : index
    %c0_311 = arith.constant 0 : index
    %183 = vector.load %arg9[%c480_310, %c0_311] : memref<1024x32xbf16, #tpu.memory_space<vmem>>, vector<16x32xbf16>
    %c80_312 = arith.constant 80 : index
    %c192_313 = arith.constant 192 : index
    %184 = vector.load %arg10[%c80_312, %c192_313] : memref<144x512xbf16, #tpu.memory_space<vmem>>, vector<16x32xbf16>
    tpu.vector_store %arg10[%c80_312, %c192_313], %183 {strides = array<i32>} : memref<144x512xbf16, #tpu.memory_space<vmem>>, vector<16x32xbf16>,
    %c496_314 = arith.constant 496 : index
    %c0_315 = arith.constant 0 : index
    %185 = vector.load %arg9[%c496_314, %c0_315] : memref<1024x32xbf16, #tpu.memory_space<vmem>>, vector<16x32xbf16>
    %c80_316 = arith.constant 80 : index
    %c224_317 = arith.constant 224 : index
    %186 = vector.load %arg10[%c80_316, %c224_317] : memref<144x512xbf16, #tpu.memory_space<vmem>>, vector<16x32xbf16>
    tpu.vector_store %arg10[%c80_316, %c224_317], %185 {strides = array<i32>} : memref<144x512xbf16, #tpu.memory_space<vmem>>, vector<16x32xbf16>,
    %c576_318 = arith.constant 576 : index
    %c0_319 = arith.constant 0 : index
    %187 = vector.load %arg9[%c576_318, %c0_319] : memref<1024x32xbf16, #tpu.memory_space<vmem>>, vector<16x32xbf16>
    %c80_320 = arith.constant 80 : index
    %c256_321 = arith.constant 256 : index
    %188 = vector.load %arg10[%c80_320, %c256_321] : memref<144x512xbf16, #tpu.memory_space<vmem>>, vector<16x32xbf16>
    tpu.vector_store %arg10[%c80_320, %c256_321], %187 {strides = array<i32>} : memref<144x512xbf16, #tpu.memory_space<vmem>>, vector<16x32xbf16>,
    %c592_322 = arith.constant 592 : index
    %c0_323 = arith.constant 0 : index
    %189 = vector.load %arg9[%c592_322, %c0_323] : memref<1024x32xbf16, #tpu.memory_space<vmem>>, vector<16x32xbf16>
    %c80_324 = arith.constant 80 : index
    %c288_325 = arith.constant 288 : index
    %190 = vector.load %arg10[%c80_324, %c288_325] : memref<144x512xbf16, #tpu.memory_space<vmem>>, vector<16x32xbf16>
    tpu.vector_store %arg10[%c80_324, %c288_325], %189 {strides = array<i32>} : memref<144x512xbf16, #tpu.memory_space<vmem>>, vector<16x32xbf16>,
    %c608 = arith.constant 608 : index
    %c0_326 = arith.constant 0 : index
    %191 = vector.load %arg9[%c608, %c0_326] : memref<1024x32xbf16, #tpu.memory_space<vmem>>, vector<16x32xbf16>
    %c80_327 = arith.constant 80 : index
    %c320_328 = arith.constant 320 : index
    %192 = vector.load %arg10[%c80_327, %c320_328] : memref<144x512xbf16, #tpu.memory_space<vmem>>, vector<16x32xbf16>
    tpu.vector_store %arg10[%c80_327, %c320_328], %191 {strides = array<i32>} : memref<144x512xbf16, #tpu.memory_space<vmem>>, vector<16x32xbf16>,
    %c624 = arith.constant 624 : index
    %c0_329 = arith.constant 0 : index
    %193 = vector.load %arg9[%c624, %c0_329] : memref<1024x32xbf16, #tpu.memory_space<vmem>>, vector<16x32xbf16>
    %c80_330 = arith.constant 80 : index
    %c352_331 = arith.constant 352 : index
    %194 = vector.load %arg10[%c80_330, %c352_331] : memref<144x512xbf16, #tpu.memory_space<vmem>>, vector<16x32xbf16>
    tpu.vector_store %arg10[%c80_330, %c352_331], %193 {strides = array<i32>} : memref<144x512xbf16, #tpu.memory_space<vmem>>, vector<16x32xbf16>,
    %c704_332 = arith.constant 704 : index
    %c0_333 = arith.constant 0 : index
    %195 = vector.load %arg9[%c704_332, %c0_333] : memref<1024x32xbf16, #tpu.memory_space<vmem>>, vector<16x32xbf16>
    %c80_334 = arith.constant 80 : index
    %c384_335 = arith.constant 384 : index
    %196 = vector.load %arg10[%c80_334, %c384_335] : memref<144x512xbf16, #tpu.memory_space<vmem>>, vector<16x32xbf16>
    tpu.vector_store %arg10[%c80_334, %c384_335], %195 {strides = array<i32>} : memref<144x512xbf16, #tpu.memory_space<vmem>>, vector<16x32xbf16>,
    %c720_336 = arith.constant 720 : index
    %c0_337 = arith.constant 0 : index
    %197 = vector.load %arg9[%c720_336, %c0_337] : memref<1024x32xbf16, #tpu.memory_space<vmem>>, vector<16x32xbf16>
    %c80_338 = arith.constant 80 : index
    %c416_339 = arith.constant 416 : index
    %198 = vector.load %arg10[%c80_338, %c416_339] : memref<144x512xbf16, #tpu.memory_space<vmem>>, vector<16x32xbf16>
    tpu.vector_store %arg10[%c80_338, %c416_339], %197 {strides = array<i32>} : memref<144x512xbf16, #tpu.memory_space<vmem>>, vector<16x32xbf16>,
    %c736 = arith.constant 736 : index
    %c0_340 = arith.constant 0 : index
    %199 = vector.load %arg9[%c736, %c0_340] : memref<1024x32xbf16, #tpu.memory_space<vmem>>, vector<16x32xbf16>
    %c80_341 = arith.constant 80 : index
    %c448_342 = arith.constant 448 : index
    %200 = vector.load %arg10[%c80_341, %c448_342] : memref<144x512xbf16, #tpu.memory_space<vmem>>, vector<16x32xbf16>
    tpu.vector_store %arg10[%c80_341, %c448_342], %199 {strides = array<i32>} : memref<144x512xbf16, #tpu.memory_space<vmem>>, vector<16x32xbf16>,
    %c752 = arith.constant 752 : index
    %c0_343 = arith.constant 0 : index
    %201 = vector.load %arg9[%c752, %c0_343] : memref<1024x32xbf16, #tpu.memory_space<vmem>>, vector<16x32xbf16>
    %c80_344 = arith.constant 80 : index
    %c480_345 = arith.constant 480 : index
    %202 = vector.load %arg10[%c80_344, %c480_345] : memref<144x512xbf16, #tpu.memory_space<vmem>>, vector<16x32xbf16>
    tpu.vector_store %arg10[%c80_344, %c480_345], %201 {strides = array<i32>} : memref<144x512xbf16, #tpu.memory_space<vmem>>, vector<16x32xbf16>,
    %c512_346 = arith.constant 512 : index
    %c0_347 = arith.constant 0 : index
    %203 = vector.load %arg9[%c512_346, %c0_347] : memref<1024x32xbf16, #tpu.memory_space<vmem>>, vector<16x32xbf16>
    %c96_348 = arith.constant 96 : index
    %c0_349 = arith.constant 0 : index
    %204 = vector.load %arg10[%c96_348, %c0_349] : memref<144x512xbf16, #tpu.memory_space<vmem>>, vector<16x32xbf16>
    tpu.vector_store %arg10[%c96_348, %c0_349], %203 {strides = array<i32>} : memref<144x512xbf16, #tpu.memory_space<vmem>>, vector<16x32xbf16>,
    %c528_350 = arith.constant 528 : index
    %c0_351 = arith.constant 0 : index
    %205 = vector.load %arg9[%c528_350, %c0_351] : memref<1024x32xbf16, #tpu.memory_space<vmem>>, vector<16x32xbf16>
    %c96_352 = arith.constant 96 : index
    %c32_353 = arith.constant 32 : index
    %206 = vector.load %arg10[%c96_352, %c32_353] : memref<144x512xbf16, #tpu.memory_space<vmem>>, vector<16x32xbf16>
    tpu.vector_store %arg10[%c96_352, %c32_353], %205 {strides = array<i32>} : memref<144x512xbf16, #tpu.memory_space<vmem>>, vector<16x32xbf16>,
    %c544_354 = arith.constant 544 : index
    %c0_355 = arith.constant 0 : index
    %207 = vector.load %arg9[%c544_354, %c0_355] : memref<1024x32xbf16, #tpu.memory_space<vmem>>, vector<16x32xbf16>
    %c96_356 = arith.constant 96 : index
    %c64_357 = arith.constant 64 : index
    %208 = vector.load %arg10[%c96_356, %c64_357] : memref<144x512xbf16, #tpu.memory_space<vmem>>, vector<16x32xbf16>
    tpu.vector_store %arg10[%c96_356, %c64_357], %207 {strides = array<i32>} : memref<144x512xbf16, #tpu.memory_space<vmem>>, vector<16x32xbf16>,
    %c560_358 = arith.constant 560 : index
    %c0_359 = arith.constant 0 : index
    %209 = vector.load %arg9[%c560_358, %c0_359] : memref<1024x32xbf16, #tpu.memory_space<vmem>>, vector<16x32xbf16>
    %c96_360 = arith.constant 96 : index
    %c96_361 = arith.constant 96 : index
    %210 = vector.load %arg10[%c96_360, %c96_361] : memref<144x512xbf16, #tpu.memory_space<vmem>>, vector<16x32xbf16>
    tpu.vector_store %arg10[%c96_360, %c96_361], %209 {strides = array<i32>} : memref<144x512xbf16, #tpu.memory_space<vmem>>, vector<16x32xbf16>,
    %c640_362 = arith.constant 640 : index
    %c0_363 = arith.constant 0 : index
    %211 = vector.load %arg9[%c640_362, %c0_363] : memref<1024x32xbf16, #tpu.memory_space<vmem>>, vector<16x32xbf16>
    %c96_364 = arith.constant 96 : index
    %c128_365 = arith.constant 128 : index
    %212 = vector.load %arg10[%c96_364, %c128_365] : memref<144x512xbf16, #tpu.memory_space<vmem>>, vector<16x32xbf16>
    tpu.vector_store %arg10[%c96_364, %c128_365], %211 {strides = array<i32>} : memref<144x512xbf16, #tpu.memory_space<vmem>>, vector<16x32xbf16>,
    %c656_366 = arith.constant 656 : index
    %c0_367 = arith.constant 0 : index
    %213 = vector.load %arg9[%c656_366, %c0_367] : memref<1024x32xbf16, #tpu.memory_space<vmem>>, vector<16x32xbf16>
    %c96_368 = arith.constant 96 : index
    %c160_369 = arith.constant 160 : index
    %214 = vector.load %arg10[%c96_368, %c160_369] : memref<144x512xbf16, #tpu.memory_space<vmem>>, vector<16x32xbf16>
    tpu.vector_store %arg10[%c96_368, %c160_369], %213 {strides = array<i32>} : memref<144x512xbf16, #tpu.memory_space<vmem>>, vector<16x32xbf16>,
    %c672_370 = arith.constant 672 : index
    %c0_371 = arith.constant 0 : index
    %215 = vector.load %arg9[%c672_370, %c0_371] : memref<1024x32xbf16, #tpu.memory_space<vmem>>, vector<16x32xbf16>
    %c96_372 = arith.constant 96 : index
    %c192_373 = arith.constant 192 : index
    %216 = vector.load %arg10[%c96_372, %c192_373] : memref<144x512xbf16, #tpu.memory_space<vmem>>, vector<16x32xbf16>
    tpu.vector_store %arg10[%c96_372, %c192_373], %215 {strides = array<i32>} : memref<144x512xbf16, #tpu.memory_space<vmem>>, vector<16x32xbf16>,
    %c688_374 = arith.constant 688 : index
    %c0_375 = arith.constant 0 : index
    %217 = vector.load %arg9[%c688_374, %c0_375] : memref<1024x32xbf16, #tpu.memory_space<vmem>>, vector<16x32xbf16>
    %c96_376 = arith.constant 96 : index
    %c224_377 = arith.constant 224 : index
    %218 = vector.load %arg10[%c96_376, %c224_377] : memref<144x512xbf16, #tpu.memory_space<vmem>>, vector<16x32xbf16>
    tpu.vector_store %arg10[%c96_376, %c224_377], %217 {strides = array<i32>} : memref<144x512xbf16, #tpu.memory_space<vmem>>, vector<16x32xbf16>,
    %c768 = arith.constant 768 : index
    %c0_378 = arith.constant 0 : index
    %219 = vector.load %arg9[%c768, %c0_378] : memref<1024x32xbf16, #tpu.memory_space<vmem>>, vector<16x32xbf16>
    %c96_379 = arith.constant 96 : index
    %c256_380 = arith.constant 256 : index
    %220 = vector.load %arg10[%c96_379, %c256_380] : memref<144x512xbf16, #tpu.memory_space<vmem>>, vector<16x32xbf16>
    tpu.vector_store %arg10[%c96_379, %c256_380], %219 {strides = array<i32>} : memref<144x512xbf16, #tpu.memory_space<vmem>>, vector<16x32xbf16>,
    %c784 = arith.constant 784 : index
    %c0_381 = arith.constant 0 : index
    %221 = vector.load %arg9[%c784, %c0_381] : memref<1024x32xbf16, #tpu.memory_space<vmem>>, vector<16x32xbf16>
    %c96_382 = arith.constant 96 : index
    %c288_383 = arith.constant 288 : index
    %222 = vector.load %arg10[%c96_382, %c288_383] : memref<144x512xbf16, #tpu.memory_space<vmem>>, vector<16x32xbf16>
    tpu.vector_store %arg10[%c96_382, %c288_383], %221 {strides = array<i32>} : memref<144x512xbf16, #tpu.memory_space<vmem>>, vector<16x32xbf16>,
    %c800 = arith.constant 800 : index
    %c0_384 = arith.constant 0 : index
    %223 = vector.load %arg9[%c800, %c0_384] : memref<1024x32xbf16, #tpu.memory_space<vmem>>, vector<16x32xbf16>
    %c96_385 = arith.constant 96 : index
    %c320_386 = arith.constant 320 : index
    %224 = vector.load %arg10[%c96_385, %c320_386] : memref<144x512xbf16, #tpu.memory_space<vmem>>, vector<16x32xbf16>
    tpu.vector_store %arg10[%c96_385, %c320_386], %223 {strides = array<i32>} : memref<144x512xbf16, #tpu.memory_space<vmem>>, vector<16x32xbf16>,
    %c816 = arith.constant 816 : index
    %c0_387 = arith.constant 0 : index
    %225 = vector.load %arg9[%c816, %c0_387] : memref<1024x32xbf16, #tpu.memory_space<vmem>>, vector<16x32xbf16>
    %c96_388 = arith.constant 96 : index
    %c352_389 = arith.constant 352 : index
    %226 = vector.load %arg10[%c96_388, %c352_389] : memref<144x512xbf16, #tpu.memory_space<vmem>>, vector<16x32xbf16>
    tpu.vector_store %arg10[%c96_388, %c352_389], %225 {strides = array<i32>} : memref<144x512xbf16, #tpu.memory_space<vmem>>, vector<16x32xbf16>,
    %c896 = arith.constant 896 : index
    %c0_390 = arith.constant 0 : index
    %227 = vector.load %arg9[%c896, %c0_390] : memref<1024x32xbf16, #tpu.memory_space<vmem>>, vector<16x32xbf16>
    %c96_391 = arith.constant 96 : index
    %c384_392 = arith.constant 384 : index
    %228 = vector.load %arg10[%c96_391, %c384_392] : memref<144x512xbf16, #tpu.memory_space<vmem>>, vector<16x32xbf16>
    tpu.vector_store %arg10[%c96_391, %c384_392], %227 {strides = array<i32>} : memref<144x512xbf16, #tpu.memory_space<vmem>>, vector<16x32xbf16>,
    %c912 = arith.constant 912 : index
    %c0_393 = arith.constant 0 : index
    %229 = vector.load %arg9[%c912, %c0_393] : memref<1024x32xbf16, #tpu.memory_space<vmem>>, vector<16x32xbf16>
    %c96_394 = arith.constant 96 : index
    %c416_395 = arith.constant 416 : index
    %230 = vector.load %arg10[%c96_394, %c416_395] : memref<144x512xbf16, #tpu.memory_space<vmem>>, vector<16x32xbf16>
    tpu.vector_store %arg10[%c96_394, %c416_395], %229 {strides = array<i32>} : memref<144x512xbf16, #tpu.memory_space<vmem>>, vector<16x32xbf16>,
    %c928 = arith.constant 928 : index
    %c0_396 = arith.constant 0 : index
    %231 = vector.load %arg9[%c928, %c0_396] : memref<1024x32xbf16, #tpu.memory_space<vmem>>, vector<16x32xbf16>
    %c96_397 = arith.constant 96 : index
    %c448_398 = arith.constant 448 : index
    %232 = vector.load %arg10[%c96_397, %c448_398] : memref<144x512xbf16, #tpu.memory_space<vmem>>, vector<16x32xbf16>
    tpu.vector_store %arg10[%c96_397, %c448_398], %231 {strides = array<i32>} : memref<144x512xbf16, #tpu.memory_space<vmem>>, vector<16x32xbf16>,
    %c944 = arith.constant 944 : index
    %c0_399 = arith.constant 0 : index
    %233 = vector.load %arg9[%c944, %c0_399] : memref<1024x32xbf16, #tpu.memory_space<vmem>>, vector<16x32xbf16>
    %c96_400 = arith.constant 96 : index
    %c480_401 = arith.constant 480 : index
    %234 = vector.load %arg10[%c96_400, %c480_401] : memref<144x512xbf16, #tpu.memory_space<vmem>>, vector<16x32xbf16>
    tpu.vector_store %arg10[%c96_400, %c480_401], %233 {strides = array<i32>} : memref<144x512xbf16, #tpu.memory_space<vmem>>, vector<16x32xbf16>,
    %c544_402 = arith.constant 544 : index
    %c0_403 = arith.constant 0 : index
    %235 = vector.load %arg9[%c544_402, %c0_403] : memref<1024x32xbf16, #tpu.memory_space<vmem>>, vector<16x32xbf16>
    %c112_404 = arith.constant 112 : index
    %c0_405 = arith.constant 0 : index
    %236 = vector.load %arg10[%c112_404, %c0_405] : memref<144x512xbf16, #tpu.memory_space<vmem>>, vector<16x32xbf16>
    tpu.vector_store %arg10[%c112_404, %c0_405], %235 {strides = array<i32>} : memref<144x512xbf16, #tpu.memory_space<vmem>>, vector<16x32xbf16>,
    %c560_406 = arith.constant 560 : index
    %c0_407 = arith.constant 0 : index
    %237 = vector.load %arg9[%c560_406, %c0_407] : memref<1024x32xbf16, #tpu.memory_space<vmem>>, vector<16x32xbf16>
    %c112_408 = arith.constant 112 : index
    %c32_409 = arith.constant 32 : index
    %238 = vector.load %arg10[%c112_408, %c32_409] : memref<144x512xbf16, #tpu.memory_space<vmem>>, vector<16x32xbf16>
    tpu.vector_store %arg10[%c112_408, %c32_409], %237 {strides = array<i32>} : memref<144x512xbf16, #tpu.memory_space<vmem>>, vector<16x32xbf16>,
    %c576_410 = arith.constant 576 : index
    %c0_411 = arith.constant 0 : index
    %239 = vector.load %arg9[%c576_410, %c0_411] : memref<1024x32xbf16, #tpu.memory_space<vmem>>, vector<16x32xbf16>
    %c112_412 = arith.constant 112 : index
    %c64_413 = arith.constant 64 : index
    %240 = vector.load %arg10[%c112_412, %c64_413] : memref<144x512xbf16, #tpu.memory_space<vmem>>, vector<16x32xbf16>
    tpu.vector_store %arg10[%c112_412, %c64_413], %239 {strides = array<i32>} : memref<144x512xbf16, #tpu.memory_space<vmem>>, vector<16x32xbf16>,
    %c592_414 = arith.constant 592 : index
    %c0_415 = arith.constant 0 : index
    %241 = vector.load %arg9[%c592_414, %c0_415] : memref<1024x32xbf16, #tpu.memory_space<vmem>>, vector<16x32xbf16>
    %c112_416 = arith.constant 112 : index
    %c96_417 = arith.constant 96 : index
    %242 = vector.load %arg10[%c112_416, %c96_417] : memref<144x512xbf16, #tpu.memory_space<vmem>>, vector<16x32xbf16>
    tpu.vector_store %arg10[%c112_416, %c96_417], %241 {strides = array<i32>} : memref<144x512xbf16, #tpu.memory_space<vmem>>, vector<16x32xbf16>,
    %c672_418 = arith.constant 672 : index
    %c0_419 = arith.constant 0 : index
    %243 = vector.load %arg9[%c672_418, %c0_419] : memref<1024x32xbf16, #tpu.memory_space<vmem>>, vector<16x32xbf16>
    %c112_420 = arith.constant 112 : index
    %c128_421 = arith.constant 128 : index
    %244 = vector.load %arg10[%c112_420, %c128_421] : memref<144x512xbf16, #tpu.memory_space<vmem>>, vector<16x32xbf16>
    tpu.vector_store %arg10[%c112_420, %c128_421], %243 {strides = array<i32>} : memref<144x512xbf16, #tpu.memory_space<vmem>>, vector<16x32xbf16>,
    %c688_422 = arith.constant 688 : index
    %c0_423 = arith.constant 0 : index
    %245 = vector.load %arg9[%c688_422, %c0_423] : memref<1024x32xbf16, #tpu.memory_space<vmem>>, vector<16x32xbf16>
    %c112_424 = arith.constant 112 : index
    %c160_425 = arith.constant 160 : index
    %246 = vector.load %arg10[%c112_424, %c160_425] : memref<144x512xbf16, #tpu.memory_space<vmem>>, vector<16x32xbf16>
    tpu.vector_store %arg10[%c112_424, %c160_425], %245 {strides = array<i32>} : memref<144x512xbf16, #tpu.memory_space<vmem>>, vector<16x32xbf16>,
    %c704_426 = arith.constant 704 : index
    %c0_427 = arith.constant 0 : index
    %247 = vector.load %arg9[%c704_426, %c0_427] : memref<1024x32xbf16, #tpu.memory_space<vmem>>, vector<16x32xbf16>
    %c112_428 = arith.constant 112 : index
    %c192_429 = arith.constant 192 : index
    %248 = vector.load %arg10[%c112_428, %c192_429] : memref<144x512xbf16, #tpu.memory_space<vmem>>, vector<16x32xbf16>
    tpu.vector_store %arg10[%c112_428, %c192_429], %247 {strides = array<i32>} : memref<144x512xbf16, #tpu.memory_space<vmem>>, vector<16x32xbf16>,
    %c720_430 = arith.constant 720 : index
    %c0_431 = arith.constant 0 : index
    %249 = vector.load %arg9[%c720_430, %c0_431] : memref<1024x32xbf16, #tpu.memory_space<vmem>>, vector<16x32xbf16>
    %c112_432 = arith.constant 112 : index
    %c224_433 = arith.constant 224 : index
    %250 = vector.load %arg10[%c112_432, %c224_433] : memref<144x512xbf16, #tpu.memory_space<vmem>>, vector<16x32xbf16>
    tpu.vector_store %arg10[%c112_432, %c224_433], %249 {strides = array<i32>} : memref<144x512xbf16, #tpu.memory_space<vmem>>, vector<16x32xbf16>,
    %c800_434 = arith.constant 800 : index
    %c0_435 = arith.constant 0 : index
    %251 = vector.load %arg9[%c800_434, %c0_435] : memref<1024x32xbf16, #tpu.memory_space<vmem>>, vector<16x32xbf16>
    %c112_436 = arith.constant 112 : index
    %c256_437 = arith.constant 256 : index
    %252 = vector.load %arg10[%c112_436, %c256_437] : memref<144x512xbf16, #tpu.memory_space<vmem>>, vector<16x32xbf16>
    tpu.vector_store %arg10[%c112_436, %c256_437], %251 {strides = array<i32>} : memref<144x512xbf16, #tpu.memory_space<vmem>>, vector<16x32xbf16>,
    %c816_438 = arith.constant 816 : index
    %c0_439 = arith.constant 0 : index
    %253 = vector.load %arg9[%c816_438, %c0_439] : memref<1024x32xbf16, #tpu.memory_space<vmem>>, vector<16x32xbf16>
    %c112_440 = arith.constant 112 : index
    %c288_441 = arith.constant 288 : index
    %254 = vector.load %arg10[%c112_440, %c288_441] : memref<144x512xbf16, #tpu.memory_space<vmem>>, vector<16x32xbf16>
    tpu.vector_store %arg10[%c112_440, %c288_441], %253 {strides = array<i32>} : memref<144x512xbf16, #tpu.memory_space<vmem>>, vector<16x32xbf16>,
    %c832 = arith.constant 832 : index
    %c0_442 = arith.constant 0 : index
    %255 = vector.load %arg9[%c832, %c0_442] : memref<1024x32xbf16, #tpu.memory_space<vmem>>, vector<16x32xbf16>
    %c112_443 = arith.constant 112 : index
    %c320_444 = arith.constant 320 : index
    %256 = vector.load %arg10[%c112_443, %c320_444] : memref<144x512xbf16, #tpu.memory_space<vmem>>, vector<16x32xbf16>
    tpu.vector_store %arg10[%c112_443, %c320_444], %255 {strides = array<i32>} : memref<144x512xbf16, #tpu.memory_space<vmem>>, vector<16x32xbf16>,
    %c848 = arith.constant 848 : index
    %c0_445 = arith.constant 0 : index
    %257 = vector.load %arg9[%c848, %c0_445] : memref<1024x32xbf16, #tpu.memory_space<vmem>>, vector<16x32xbf16>
    %c112_446 = arith.constant 112 : index
    %c352_447 = arith.constant 352 : index
    %258 = vector.load %arg10[%c112_446, %c352_447] : memref<144x512xbf16, #tpu.memory_space<vmem>>, vector<16x32xbf16>
    tpu.vector_store %arg10[%c112_446, %c352_447], %257 {strides = array<i32>} : memref<144x512xbf16, #tpu.memory_space<vmem>>, vector<16x32xbf16>,
    %c928_448 = arith.constant 928 : index
    %c0_449 = arith.constant 0 : index
    %259 = vector.load %arg9[%c928_448, %c0_449] : memref<1024x32xbf16, #tpu.memory_space<vmem>>, vector<16x32xbf16>
    %c112_450 = arith.constant 112 : index
    %c384_451 = arith.constant 384 : index
    %260 = vector.load %arg10[%c112_450, %c384_451] : memref<144x512xbf16, #tpu.memory_space<vmem>>, vector<16x32xbf16>
    tpu.vector_store %arg10[%c112_450, %c384_451], %259 {strides = array<i32>} : memref<144x512xbf16, #tpu.memory_space<vmem>>, vector<16x32xbf16>,
    %c944_452 = arith.constant 944 : index
    %c0_453 = arith.constant 0 : index
    %261 = vector.load %arg9[%c944_452, %c0_453] : memref<1024x32xbf16, #tpu.memory_space<vmem>>, vector<16x32xbf16>
    %c112_454 = arith.constant 112 : index
    %c416_455 = arith.constant 416 : index
    %262 = vector.load %arg10[%c112_454, %c416_455] : memref<144x512xbf16, #tpu.memory_space<vmem>>, vector<16x32xbf16>
    tpu.vector_store %arg10[%c112_454, %c416_455], %261 {strides = array<i32>} : memref<144x512xbf16, #tpu.memory_space<vmem>>, vector<16x32xbf16>,
    %c960 = arith.constant 960 : index
    %c0_456 = arith.constant 0 : index
    %263 = vector.load %arg9[%c960, %c0_456] : memref<1024x32xbf16, #tpu.memory_space<vmem>>, vector<16x32xbf16>
    %c112_457 = arith.constant 112 : index
    %c448_458 = arith.constant 448 : index
    %264 = vector.load %arg10[%c112_457, %c448_458] : memref<144x512xbf16, #tpu.memory_space<vmem>>, vector<16x32xbf16>
    tpu.vector_store %arg10[%c112_457, %c448_458], %263 {strides = array<i32>} : memref<144x512xbf16, #tpu.memory_space<vmem>>, vector<16x32xbf16>,
    %c976 = arith.constant 976 : index
    %c0_459 = arith.constant 0 : index
    %265 = vector.load %arg9[%c976, %c0_459] : memref<1024x32xbf16, #tpu.memory_space<vmem>>, vector<16x32xbf16>
    %c112_460 = arith.constant 112 : index
    %c480_461 = arith.constant 480 : index
    %266 = vector.load %arg10[%c112_460, %c480_461] : memref<144x512xbf16, #tpu.memory_space<vmem>>, vector<16x32xbf16>
    tpu.vector_store %arg10[%c112_460, %c480_461], %265 {strides = array<i32>} : memref<144x512xbf16, #tpu.memory_space<vmem>>, vector<16x32xbf16>,
    %c576_462 = arith.constant 576 : index
    %c0_463 = arith.constant 0 : index
    %267 = vector.load %arg9[%c576_462, %c0_463] : memref<1024x32xbf16, #tpu.memory_space<vmem>>, vector<16x32xbf16>
    %c128_464 = arith.constant 128 : index
    %c0_465 = arith.constant 0 : index
    %268 = vector.load %arg10[%c128_464, %c0_465] : memref<144x512xbf16, #tpu.memory_space<vmem>>, vector<16x32xbf16>
    tpu.vector_store %arg10[%c128_464, %c0_465], %267 {strides = array<i32>} : memref<144x512xbf16, #tpu.memory_space<vmem>>, vector<16x32xbf16>,
    %c592_466 = arith.constant 592 : index
    %c0_467 = arith.constant 0 : index
    %269 = vector.load %arg9[%c592_466, %c0_467] : memref<1024x32xbf16, #tpu.memory_space<vmem>>, vector<16x32xbf16>
    %c128_468 = arith.constant 128 : index
    %c32_469 = arith.constant 32 : index
    %270 = vector.load %arg10[%c128_468, %c32_469] : memref<144x512xbf16, #tpu.memory_space<vmem>>, vector<16x32xbf16>
    tpu.vector_store %arg10[%c128_468, %c32_469], %269 {strides = array<i32>} : memref<144x512xbf16, #tpu.memory_space<vmem>>, vector<16x32xbf16>,
    %c608_470 = arith.constant 608 : index
    %c0_471 = arith.constant 0 : index
    %271 = vector.load %arg9[%c608_470, %c0_471] : memref<1024x32xbf16, #tpu.memory_space<vmem>>, vector<16x32xbf16>
    %c128_472 = arith.constant 128 : index
    %c64_473 = arith.constant 64 : index
    %272 = vector.load %arg10[%c128_472, %c64_473] : memref<144x512xbf16, #tpu.memory_space<vmem>>, vector<16x32xbf16>
    tpu.vector_store %arg10[%c128_472, %c64_473], %271 {strides = array<i32>} : memref<144x512xbf16, #tpu.memory_space<vmem>>, vector<16x32xbf16>,
    %c624_474 = arith.constant 624 : index
    %c0_475 = arith.constant 0 : index
    %273 = vector.load %arg9[%c624_474, %c0_475] : memref<1024x32xbf16, #tpu.memory_space<vmem>>, vector<16x32xbf16>
    %c128_476 = arith.constant 128 : index
    %c96_477 = arith.constant 96 : index
    %274 = vector.load %arg10[%c128_476, %c96_477] : memref<144x512xbf16, #tpu.memory_space<vmem>>, vector<16x32xbf16>
    tpu.vector_store %arg10[%c128_476, %c96_477], %273 {strides = array<i32>} : memref<144x512xbf16, #tpu.memory_space<vmem>>, vector<16x32xbf16>,
    %c704_478 = arith.constant 704 : index
    %c0_479 = arith.constant 0 : index
    %275 = vector.load %arg9[%c704_478, %c0_479] : memref<1024x32xbf16, #tpu.memory_space<vmem>>, vector<16x32xbf16>
    %c128_480 = arith.constant 128 : index
    %c128_481 = arith.constant 128 : index
    %276 = vector.load %arg10[%c128_480, %c128_481] : memref<144x512xbf16, #tpu.memory_space<vmem>>, vector<16x32xbf16>
    tpu.vector_store %arg10[%c128_480, %c128_481], %275 {strides = array<i32>} : memref<144x512xbf16, #tpu.memory_space<vmem>>, vector<16x32xbf16>,
    %c720_482 = arith.constant 720 : index
    %c0_483 = arith.constant 0 : index
    %277 = vector.load %arg9[%c720_482, %c0_483] : memref<1024x32xbf16, #tpu.memory_space<vmem>>, vector<16x32xbf16>
    %c128_484 = arith.constant 128 : index
    %c160_485 = arith.constant 160 : index
    %278 = vector.load %arg10[%c128_484, %c160_485] : memref<144x512xbf16, #tpu.memory_space<vmem>>, vector<16x32xbf16>
    tpu.vector_store %arg10[%c128_484, %c160_485], %277 {strides = array<i32>} : memref<144x512xbf16, #tpu.memory_space<vmem>>, vector<16x32xbf16>,
    %c736_486 = arith.constant 736 : index
    %c0_487 = arith.constant 0 : index
    %279 = vector.load %arg9[%c736_486, %c0_487] : memref<1024x32xbf16, #tpu.memory_space<vmem>>, vector<16x32xbf16>
    %c128_488 = arith.constant 128 : index
    %c192_489 = arith.constant 192 : index
    %280 = vector.load %arg10[%c128_488, %c192_489] : memref<144x512xbf16, #tpu.memory_space<vmem>>, vector<16x32xbf16>
    tpu.vector_store %arg10[%c128_488, %c192_489], %279 {strides = array<i32>} : memref<144x512xbf16, #tpu.memory_space<vmem>>, vector<16x32xbf16>,
    %c752_490 = arith.constant 752 : index
    %c0_491 = arith.constant 0 : index
    %281 = vector.load %arg9[%c752_490, %c0_491] : memref<1024x32xbf16, #tpu.memory_space<vmem>>, vector<16x32xbf16>
    %c128_492 = arith.constant 128 : index
    %c224_493 = arith.constant 224 : index
    %282 = vector.load %arg10[%c128_492, %c224_493] : memref<144x512xbf16, #tpu.memory_space<vmem>>, vector<16x32xbf16>
    tpu.vector_store %arg10[%c128_492, %c224_493], %281 {strides = array<i32>} : memref<144x512xbf16, #tpu.memory_space<vmem>>, vector<16x32xbf16>,
    %c832_494 = arith.constant 832 : index
    %c0_495 = arith.constant 0 : index
    %283 = vector.load %arg9[%c832_494, %c0_495] : memref<1024x32xbf16, #tpu.memory_space<vmem>>, vector<16x32xbf16>
    %c128_496 = arith.constant 128 : index
    %c256_497 = arith.constant 256 : index
    %284 = vector.load %arg10[%c128_496, %c256_497] : memref<144x512xbf16, #tpu.memory_space<vmem>>, vector<16x32xbf16>
    tpu.vector_store %arg10[%c128_496, %c256_497], %283 {strides = array<i32>} : memref<144x512xbf16, #tpu.memory_space<vmem>>, vector<16x32xbf16>,
    %c848_498 = arith.constant 848 : index
    %c0_499 = arith.constant 0 : index
    %285 = vector.load %arg9[%c848_498, %c0_499] : memref<1024x32xbf16, #tpu.memory_space<vmem>>, vector<16x32xbf16>
    %c128_500 = arith.constant 128 : index
    %c288_501 = arith.constant 288 : index
    %286 = vector.load %arg10[%c128_500, %c288_501] : memref<144x512xbf16, #tpu.memory_space<vmem>>, vector<16x32xbf16>
    tpu.vector_store %arg10[%c128_500, %c288_501], %285 {strides = array<i32>} : memref<144x512xbf16, #tpu.memory_space<vmem>>, vector<16x32xbf16>,
    %c864 = arith.constant 864 : index
    %c0_502 = arith.constant 0 : index
    %287 = vector.load %arg9[%c864, %c0_502] : memref<1024x32xbf16, #tpu.memory_space<vmem>>, vector<16x32xbf16>
    %c128_503 = arith.constant 128 : index
    %c320_504 = arith.constant 320 : index
    %288 = vector.load %arg10[%c128_503, %c320_504] : memref<144x512xbf16, #tpu.memory_space<vmem>>, vector<16x32xbf16>
    tpu.vector_store %arg10[%c128_503, %c320_504], %287 {strides = array<i32>} : memref<144x512xbf16, #tpu.memory_space<vmem>>, vector<16x32xbf16>,
    %c880 = arith.constant 880 : index
    %c0_505 = arith.constant 0 : index
    %289 = vector.load %arg9[%c880, %c0_505] : memref<1024x32xbf16, #tpu.memory_space<vmem>>, vector<16x32xbf16>
    %c128_506 = arith.constant 128 : index
    %c352_507 = arith.constant 352 : index
    %290 = vector.load %arg10[%c128_506, %c352_507] : memref<144x512xbf16, #tpu.memory_space<vmem>>, vector<16x32xbf16>
    tpu.vector_store %arg10[%c128_506, %c352_507], %289 {strides = array<i32>} : memref<144x512xbf16, #tpu.memory_space<vmem>>, vector<16x32xbf16>,
    %c960_508 = arith.constant 960 : index
    %c0_509 = arith.constant 0 : index
    %291 = vector.load %arg9[%c960_508, %c0_509] : memref<1024x32xbf16, #tpu.memory_space<vmem>>, vector<16x32xbf16>
    %c128_510 = arith.constant 128 : index
    %c384_511 = arith.constant 384 : index
    %292 = vector.load %arg10[%c128_510, %c384_511] : memref<144x512xbf16, #tpu.memory_space<vmem>>, vector<16x32xbf16>
    tpu.vector_store %arg10[%c128_510, %c384_511], %291 {strides = array<i32>} : memref<144x512xbf16, #tpu.memory_space<vmem>>, vector<16x32xbf16>,
    %c976_512 = arith.constant 976 : index
    %c0_513 = arith.constant 0 : index
    %293 = vector.load %arg9[%c976_512, %c0_513] : memref<1024x32xbf16, #tpu.memory_space<vmem>>, vector<16x32xbf16>
    %c128_514 = arith.constant 128 : index
    %c416_515 = arith.constant 416 : index
    %294 = vector.load %arg10[%c128_514, %c416_515] : memref<144x512xbf16, #tpu.memory_space<vmem>>, vector<16x32xbf16>
    tpu.vector_store %arg10[%c128_514, %c416_515], %293 {strides = array<i32>} : memref<144x512xbf16, #tpu.memory_space<vmem>>, vector<16x32xbf16>,
    %c992 = arith.constant 992 : index
    %c0_516 = arith.constant 0 : index
    %295 = vector.load %arg9[%c992, %c0_516] : memref<1024x32xbf16, #tpu.memory_space<vmem>>, vector<16x32xbf16>
    %c128_517 = arith.constant 128 : index
    %c448_518 = arith.constant 448 : index
    %296 = vector.load %arg10[%c128_517, %c448_518] : memref<144x512xbf16, #tpu.memory_space<vmem>>, vector<16x32xbf16>
    tpu.vector_store %arg10[%c128_517, %c448_518], %295 {strides = array<i32>} : memref<144x512xbf16, #tpu.memory_space<vmem>>, vector<16x32xbf16>,
    %c1008 = arith.constant 1008 : index
    %c0_519 = arith.constant 0 : index
    %297 = vector.load %arg9[%c1008, %c0_519] : memref<1024x32xbf16, #tpu.memory_space<vmem>>, vector<16x32xbf16>
    %c128_520 = arith.constant 128 : index
    %c480_521 = arith.constant 480 : index
    %298 = vector.load %arg10[%c128_520, %c480_521] : memref<144x512xbf16, #tpu.memory_space<vmem>>, vector<16x32xbf16>
    tpu.vector_store %arg10[%c128_520, %c480_521], %297 {strides = array<i32>} : memref<144x512xbf16, #tpu.memory_space<vmem>>, vector<16x32xbf16>,
    %c0_522 = arith.constant 0 : index
    %c0_523 = arith.constant 0 : index
    %299 = vector.load %arg10[%c0_522, %c0_523] : memref<144x512xbf16, #tpu.memory_space<vmem>>, vector<144x512xbf16>
    %c0_524 = arith.constant 0 : index
    %c0_525 = arith.constant 0 : index
    %300 = vector.load %arg4[%c0_524, %c0_525] : memref<512x64xbf16, #tpu.memory_space<vmem>>, vector<512x64xbf16>
    %cst_526 = arith.constant dense<0.000000e+00> : vector<144x64xf32>
    %301 = tpu.matmul %299, %300, %cst_526 {dimension_numbers = #tpu.dot_dimension_numbers<[1], [0], [0], [1], [0, 0, 1, 1], [], []>} : vector<144x512xbf16>, vector<512x64xbf16>, vector<144x64xf32> -> vector<144x64xf32>
    %c0_527 = arith.constant 0 : index
    %c0_528 = arith.constant 0 : index
    %302 = vector.load %arg5[%c0_527, %c0_528] : memref<1x64xf32, #tpu.memory_space<vmem>>, vector<1x64xf32>
    %303 = vector.broadcast %302 : vector<1x64xf32> to vector<144x64xf32>
    %304 = arith.addf %301, %303 : vector<144x64xf32>
    %cst_529 = arith.constant 0.000000e+00 : f32
    %305 = vector.broadcast %cst_529 : f32 to vector<144x64xf32>
    %306 = arith.maximumf %304, %305 : vector<144x64xf32>
    %307 = arith.truncf %306 : vector<144x64xf32> to vector<144x64xbf16>
    %c0_530 = arith.constant 0 : index
    %c0_531 = arith.constant 0 : index
    %308 = vector.load %arg11[%c0_530, %c0_531] : memref<144x64xbf16, #tpu.memory_space<vmem>>, vector<144x64xbf16>
    tpu.vector_store %arg11[%c0_530, %c0_531], %307 {strides = array<i32>} : memref<144x64xbf16, #tpu.memory_space<vmem>>, vector<144x64xbf16>,
    %c0_532 = arith.constant 0 : index
    %c0_533 = arith.constant 0 : index
    %309 = vector.load %arg11[%c0_532, %c0_533] : memref<144x64xbf16, #tpu.memory_space<vmem>>, vector<16x64xbf16>
    %c0_534 = arith.constant 0 : index
    %c0_535 = arith.constant 0 : index
    %310 = vector.load %arg12[%c0_534, %c0_535] : memref<16x576xbf16, #tpu.memory_space<vmem>>, vector<16x64xbf16>
    tpu.vector_store %arg12[%c0_534, %c0_535], %309 {strides = array<i32>} : memref<16x576xbf16, #tpu.memory_space<vmem>>, vector<16x64xbf16>,
    %c16_536 = arith.constant 16 : index
    %c0_537 = arith.constant 0 : index
    %311 = vector.load %arg11[%c16_536, %c0_537] : memref<144x64xbf16, #tpu.memory_space<vmem>>, vector<16x64xbf16>
    %c0_538 = arith.constant 0 : index
    %c64_539 = arith.constant 64 : index
    %312 = vector.load %arg12[%c0_538, %c64_539] : memref<16x576xbf16, #tpu.memory_space<vmem>>, vector<16x64xbf16>
    tpu.vector_store %arg12[%c0_538, %c64_539], %311 {strides = array<i32>} : memref<16x576xbf16, #tpu.memory_space<vmem>>, vector<16x64xbf16>,
    %c32_540 = arith.constant 32 : index
    %c0_541 = arith.constant 0 : index
    %313 = vector.load %arg11[%c32_540, %c0_541] : memref<144x64xbf16, #tpu.memory_space<vmem>>, vector<16x64xbf16>
    %c0_542 = arith.constant 0 : index
    %c128_543 = arith.constant 128 : index
    %314 = vector.load %arg12[%c0_542, %c128_543] : memref<16x576xbf16, #tpu.memory_space<vmem>>, vector<16x64xbf16>
    tpu.vector_store %arg12[%c0_542, %c128_543], %313 {strides = array<i32>} : memref<16x576xbf16, #tpu.memory_space<vmem>>, vector<16x64xbf16>,
    %c48_544 = arith.constant 48 : index
    %c0_545 = arith.constant 0 : index
    %315 = vector.load %arg11[%c48_544, %c0_545] : memref<144x64xbf16, #tpu.memory_space<vmem>>, vector<16x64xbf16>
    %c0_546 = arith.constant 0 : index
    %c192_547 = arith.constant 192 : index
    %316 = vector.load %arg12[%c0_546, %c192_547] : memref<16x576xbf16, #tpu.memory_space<vmem>>, vector<16x64xbf16>
    tpu.vector_store %arg12[%c0_546, %c192_547], %315 {strides = array<i32>} : memref<16x576xbf16, #tpu.memory_space<vmem>>, vector<16x64xbf16>,
    %c64_548 = arith.constant 64 : index
    %c0_549 = arith.constant 0 : index
    %317 = vector.load %arg11[%c64_548, %c0_549] : memref<144x64xbf16, #tpu.memory_space<vmem>>, vector<16x64xbf16>
    %c0_550 = arith.constant 0 : index
    %c256_551 = arith.constant 256 : index
    %318 = vector.load %arg12[%c0_550, %c256_551] : memref<16x576xbf16, #tpu.memory_space<vmem>>, vector<16x64xbf16>
    tpu.vector_store %arg12[%c0_550, %c256_551], %317 {strides = array<i32>} : memref<16x576xbf16, #tpu.memory_space<vmem>>, vector<16x64xbf16>,
    %c80_552 = arith.constant 80 : index
    %c0_553 = arith.constant 0 : index
    %319 = vector.load %arg11[%c80_552, %c0_553] : memref<144x64xbf16, #tpu.memory_space<vmem>>, vector<16x64xbf16>
    %c0_554 = arith.constant 0 : index
    %c320_555 = arith.constant 320 : index
    %320 = vector.load %arg12[%c0_554, %c320_555] : memref<16x576xbf16, #tpu.memory_space<vmem>>, vector<16x64xbf16>
    tpu.vector_store %arg12[%c0_554, %c320_555], %319 {strides = array<i32>} : memref<16x576xbf16, #tpu.memory_space<vmem>>, vector<16x64xbf16>,
    %c96_556 = arith.constant 96 : index
    %c0_557 = arith.constant 0 : index
    %321 = vector.load %arg11[%c96_556, %c0_557] : memref<144x64xbf16, #tpu.memory_space<vmem>>, vector<16x64xbf16>
    %c0_558 = arith.constant 0 : index
    %c384_559 = arith.constant 384 : index
    %322 = vector.load %arg12[%c0_558, %c384_559] : memref<16x576xbf16, #tpu.memory_space<vmem>>, vector<16x64xbf16>
    tpu.vector_store %arg12[%c0_558, %c384_559], %321 {strides = array<i32>} : memref<16x576xbf16, #tpu.memory_space<vmem>>, vector<16x64xbf16>,
    %c112_560 = arith.constant 112 : index
    %c0_561 = arith.constant 0 : index
    %323 = vector.load %arg11[%c112_560, %c0_561] : memref<144x64xbf16, #tpu.memory_space<vmem>>, vector<16x64xbf16>
    %c0_562 = arith.constant 0 : index
    %c448_563 = arith.constant 448 : index
    %324 = vector.load %arg12[%c0_562, %c448_563] : memref<16x576xbf16, #tpu.memory_space<vmem>>, vector<16x64xbf16>
    tpu.vector_store %arg12[%c0_562, %c448_563], %323 {strides = array<i32>} : memref<16x576xbf16, #tpu.memory_space<vmem>>, vector<16x64xbf16>,
    %c128_564 = arith.constant 128 : index
    %c0_565 = arith.constant 0 : index
    %325 = vector.load %arg11[%c128_564, %c0_565] : memref<144x64xbf16, #tpu.memory_space<vmem>>, vector<16x64xbf16>
    %c0_566 = arith.constant 0 : index
    %c512_567 = arith.constant 512 : index
    %326 = vector.load %arg12[%c0_566, %c512_567] : memref<16x576xbf16, #tpu.memory_space<vmem>>, vector<16x64xbf16>
    tpu.vector_store %arg12[%c0_566, %c512_567], %325 {strides = array<i32>} : memref<16x576xbf16, #tpu.memory_space<vmem>>, vector<16x64xbf16>,
    %c0_568 = arith.constant 0 : index
    %c0_569 = arith.constant 0 : index
    %327 = vector.load %arg12[%c0_568, %c0_569] : memref<16x576xbf16, #tpu.memory_space<vmem>>, vector<16x576xbf16>
    %c0_570 = arith.constant 0 : index
    %c0_571 = arith.constant 0 : index
    %328 = vector.load %arg6[%c0_570, %c0_571] : memref<576x64xbf16, #tpu.memory_space<vmem>>, vector<576x64xbf16>
    %cst_572 = arith.constant dense<0.000000e+00> : vector<16x64xf32>
    %329 = tpu.matmul %327, %328, %cst_572 {dimension_numbers = #tpu.dot_dimension_numbers<[1], [0], [0], [1], [0, 0, 1, 1], [], []>} : vector<16x576xbf16>, vector<576x64xbf16>, vector<16x64xf32> -> vector<16x64xf32>
    %c0_573 = arith.constant 0 : index
    %c0_574 = arith.constant 0 : index
    %330 = vector.load %arg7[%c0_573, %c0_574] : memref<1x64xf32, #tpu.memory_space<vmem>>, vector<1x64xf32>
    %331 = vector.broadcast %330 : vector<1x64xf32> to vector<16x64xf32>
    %332 = arith.addf %329, %331 : vector<16x64xf32>
    %cst_575 = arith.constant 0.000000e+00 : f32
    %333 = vector.broadcast %cst_575 : f32 to vector<16x64xf32>
    %334 = arith.maximumf %332, %333 : vector<16x64xf32>
    %c0_576 = arith.constant 0 : index
    %c0_577 = arith.constant 0 : index
    %c0_578 = arith.constant 0 : index
    %335 = vector.load %arg8[%c0_576, %c0_577, %c0_578] : memref<1x16x64xf32, #tpu.memory_space<vmem>>, vector<1x16x64xf32>
    %336 = vector.shape_cast %335 : vector<1x16x64xf32> to vector<16x64xf32>
    %337 = vector.shape_cast %334 : vector<16x64xf32> to vector<1x16x64xf32>
    tpu.vector_store %arg8[%c0_576, %c0_577, %c0_578], %337 {strides = array<i32>} : memref<1x16x64xf32, #tpu.memory_space<vmem>>, vector<1x16x64xf32>,
    return
  }
  func.func @transform_0(%arg0: i32) -> (i32, i32, i32) {
    %c0_i32 = arith.constant 0 : i32
    %c0_i32_0 = arith.constant 0 : i32
    %c0_i32_1 = arith.constant 0 : i32
    return %arg0, %c0_i32, %c0_i32_0 : i32, i32, i32
  }
  func.func @transform_1(%arg0: i32) -> (i32, i32) {
    %c0_i32 = arith.constant 0 : i32
    %c0_i32_0 = arith.constant 0 : i32
    %c0_i32_1 = arith.constant 0 : i32
    return %c0_i32, %c0_i32_0 : i32, i32
  }
  func.func @transform_2(%arg0: i32) -> (i32, i32) {
    %c0_i32 = arith.constant 0 : i32
    %c0_i32_0 = arith.constant 0 : i32
    %c0_i32_1 = arith.constant 0 : i32
    return %c0_i32, %c0_i32_0 : i32, i32
  }
  func.func @transform_3(%arg0: i32) -> (i32, i32) {
    %c0_i32 = arith.constant 0 : i32
    %c0_i32_0 = arith.constant 0 : i32
    %c0_i32_1 = arith.constant 0 : i32
    return %c0_i32, %c0_i32_0 : i32, i32
  }
  func.func @transform_4(%arg0: i32) -> (i32, i32) {
    %c0_i32 = arith.constant 0 : i32
    %c0_i32_0 = arith.constant 0 : i32
    %c0_i32_1 = arith.constant 0 : i32
    return %c0_i32, %c0_i32_0 : i32, i32
  }
  func.func @transform_5(%arg0: i32) -> (i32, i32) {
    %c0_i32 = arith.constant 0 : i32
    %c0_i32_0 = arith.constant 0 : i32
    %c0_i32_1 = arith.constant 0 : i32
    return %c0_i32, %c0_i32_0 : i32, i32
  }
  func.func @transform_6(%arg0: i32) -> (i32, i32) {
    %c0_i32 = arith.constant 0 : i32
    %c0_i32_0 = arith.constant 0 : i32
    %c0_i32_1 = arith.constant 0 : i32
    return %c0_i32, %c0_i32_0 : i32, i32
  }
  func.func @transform_7(%arg0: i32) -> (i32, i32, i32) {
    %c0_i32 = arith.constant 0 : i32
    %c0_i32_0 = arith.constant 0 : i32
    %c0_i32_1 = arith.constant 0 : i32
    return %arg0, %c0_i32, %c0_i32_0 : i32, i32, i32
  }
}

</mosaic_0001>

<bundles_post_ra>
// kernel: encoder_forward.1
= control target key start
LH: loop header
LB: loop body
LE: loop exit
PB: predicated region body
PF: predicated region fallthrough
CT: control target
= control target key end

     0   :  { %v4203_v0 = vmov 0   ;;  %vm1667_vm0 = vcmask 261120   ;;  %s4205_s30 = smov 32   ;;  %s4206_s16 = smov 64   ;;  %vm1739_vm1 = vcmask 523520   ;;  %vm1746_vm2 = vcmask 785920   ;;  %s5593_s1 = inlined_call_operand.vmem [shape: bf16[256,32], index: 1, kind: input, shape index: {}]   ;;  %s5594_s0 = inlined_call_operand.vmem [shape: bf16[1,1024,256], index: 0, kind: input, shape index: {}]   ;;  %s5595_s2 = inlined_call_operand.vmem [shape: f32[1,32], index: 2, kind: input, shape index: {}]   ;;  %s5596_s3 = inlined_call_operand.vmem [shape: bf16[512,64], index: 3, kind: input, shape index: {}]   ;;  %s5597_s5 = inlined_call_operand.vmem [shape: bf16[576,64], index: 5, kind: input, shape index: {}]   ;;  %s5598_s4 = inlined_call_operand.vmem [shape: f32[1,64], index: 4, kind: input, shape index: {}]   ;;  %s5599_s6 = inlined_call_operand.vmem [shape: f32[1,64], index: 6, kind: input, shape index: {}]   ;;  %s5600_s7 = inlined_call_operand.vmem [shape: f32[1,16,64], index: 7, kind: output, shape index: {}]  }
   0x1   :  { %930 = vmatprep.subr.bf16.mxu0 %v4203_v0  ;;  %3887 = vmatprep.subr.bf16.mxu1 %v4203_v0  ;;  %v3925_v1 = vld [vmem:[%s5593_s1] sm:$0xff]   ;;  %v3926_v2 = vld [vmem:[%s5593_s1 + $0x8] sm:$0xff]   ;;  %v3927_v3 = vld [vmem:[%s5593_s1 + $0x10] sm:$0xff]   ;;  %vm1753_vm3 = vcmask 1048320   ;;  %vm2991_vm4 = vcmask 523264   ;;  %vm3008_vm5 = vcmask 1048064  }
   0x2   :  { %931 = vmatpush1.bf16.msra.mxu0 %v3925_v1  ;;  %3903 = vmatpush1.bf16.msra.mxu1 %v3925_v1  ;;  %v3928_v4 = vld [vmem:[%s5593_s1 + $0x18] sm:$0xff]   ;;  %v3929_v5 = vld [vmem:[%s5593_s1 + $0x20] sm:$0xff]   ;;  %v3930_v7 = vld [vmem:[%s5593_s1 + $0x28] sm:$0xff]   ;;  %vm4208_vm6 = vmmov 0  }
   0x3   :  { %932 = vmatprep.subr.bf16.mxu0 %v4203_v0  ;;  %3888 = vmatprep.subr.bf16.mxu1 %v4203_v0  ;;  %v3943_v6 = vld [vmem:[%s5594_s0 + $0x4] ss:$8 sps:$4 sm:$0xff]   ;;  %v3946_v8 = vld [vmem:[%s5594_s0 + $0x2d4] ss:$8 sps:$4 sm:$0xff]   ;;  %v3941_v19 = vld [vmem:[%s5594_s0] ss:$8 sps:$4 sm:$0xff]  }
   0x4   :  { %962 = vmatprep.mubr.bf16.mxu0 %v3943_v6  ;;  %1322 = vmatprep.mubr.bf16.mxu1 %v3946_v8  ;;  %v3931_v9 = vld [vmem:[%s5593_s1 + $0x30] sm:$0xff]   ;;  %v3932_v10 = vld [vmem:[%s5593_s1 + $0x38] sm:$0xff]   ;;  %v3933_v11 = vld [vmem:[%s5593_s1 + $0x40] sm:$0xff]  }
   0x5   :  { %v3934_v12 = vld [vmem:[%s5593_s1 + $0x48] sm:$0xff]   ;;  %v3935_v13 = vld [vmem:[%s5593_s1 + $0x50] sm:$0xff]   ;;  %v3936_v14 = vld [vmem:[%s5593_s1 + $0x58] sm:$0xff]  }
   0x6   :  { %933 = vmatpush1.bf16.msra.mxu0 %v3926_v2  ;;  %3904 = vmatpush1.bf16.msra.mxu1 %v3926_v2  ;;  %v3937_v15 = vld [vmem:[%s5593_s1 + $0x60] sm:$0xff]   ;;  %v3938_v16 = vld [vmem:[%s5593_s1 + $0x68] sm:$0xff]   ;;  %v3939_v17 = vld [vmem:[%s5593_s1 + $0x70] sm:$0xff]  }
   0x7   :  { %934 = vmatprep.subr.bf16.mxu0 %v4203_v0  ;;  %3889 = vmatprep.subr.bf16.mxu1 %v4203_v0  ;;  %v3940_v18 = vld [vmem:[%s5593_s1 + $0x78] sm:$0xff]   ;;  %v3968_v22 = vld [vmem:[%s5594_s0 + $0x2e4] ss:$8 sps:$4 sm:$0xff]   ;;  %v3970_v24 = vld [vmem:[%s5594_s0 + $0x2e0] ss:$8 sps:$4 sm:$0xff]   ;;  %s4204_s1 = smov 96  }
   0x8   :  { %v3944_v20 = vld [vmem:[%s5594_s0 + $0x2d0] ss:$8 sps:$4 sm:$0xff]   ;;  %v3947_v21 = vld [vmem:[%s5594_s0 + $0x14] ss:$8 sps:$4 sm:$0xff]   ;;  %v3950_v25 = vld [vmem:[%s5594_s0 + $0x24] ss:$8 sps:$4 sm:$0xff]  }
   0x9   :  { %v3949_v23 = vld [vmem:[%s5594_s0 + $0x10] ss:$8 sps:$4 sm:$0xff]   ;;  %v3974_v26 = vld [vmem:[%s5594_s0 + $0x2f4] ss:$8 sps:$4 sm:$0xff]   ;;  %v3952_v27 = vld [vmem:[%s5594_s0 + $0x20] ss:$8 sps:$4 sm:$0xff]  }
   0xa   :  { %935 = vmatpush1.bf16.msra.mxu0 %v3927_v3  ;;  %3905 = vmatpush1.bf16.msra.mxu1 %v3927_v3  ;;  %v3976_v28 = vld [vmem:[%s5594_s0 + $0x2f0] ss:$8 sps:$4 sm:$0xff]   ;;  %v3953_v29 = vld [vmem:[%s5594_s0 + $0x34] ss:$8 sps:$4 sm:$0xff]   ;;  %v3956_v31 = vld [vmem:[%s5594_s0 + $0x44] ss:$8 sps:$4 sm:$0xff]  }
   0xb   :  { %936 = vmatprep.subr.bf16.mxu0 %v4203_v0  ;;  %3890 = vmatprep.subr.bf16.mxu1 %v4203_v0  ;;  %v3955_v30 = vld [vmem:[%s5594_s0 + $0x30] ss:$8 sps:$4 sm:$0xff]   ;;  %v3958_v32 = vld [vmem:[%s5594_s0 + $0x40] ss:$8 sps:$4 sm:$0xff]   ;;  %v3959_v33 = vld [vmem:[%s5594_s0 + $0x54] ss:$8 sps:$4 sm:$0xff]  }
   0xc   :  { %v3961_v34 = vld [vmem:[%s5594_s0 + $0x50] ss:$8 sps:$4 sm:$0xff]   ;;  %v3962_v35 = vld [vmem:[%s5594_s0 + $0x64] ss:$8 sps:$4 sm:$0xff]   ;;  %v3964_v36 = vld [vmem:[%s5594_s0 + $0x60] ss:$8 sps:$4 sm:$0xff]  }
   0xd   :  { %v3965_v37 = vld [vmem:[%s5594_s0 + $0x74] ss:$8 sps:$4 sm:$0xff]   ;;  %v3967_v38 = vld [vmem:[%s5594_s0 + $0x70] ss:$8 sps:$4 sm:$0xff]   ;;  %v3971_v39 = vld [vmem:[%s5594_s0 + $0x84] ss:$8 sps:$4 sm:$0xff]  }
   0xe   :  { %937 = vmatpush1.bf16.msra.mxu0 %v3928_v4  ;;  %3906 = vmatpush1.bf16.msra.mxu1 %v3928_v4  ;;  %v3973_v40 = vld [vmem:[%s5594_s0 + $0x80] ss:$8 sps:$4 sm:$0xff]   ;;  %v3977_v41 = vld [vmem:[%s5594_s0 + $0x94] ss:$8 sps:$4 sm:$0xff]   ;;  %v3979_v42 = vld [vmem:[%s5594_s0 + $0x90] ss:$8 sps:$4 sm:$0xff]  }
   0xf   :  { %938 = vmatprep.subr.bf16.mxu0 %v4203_v0  ;;  %3891 = vmatprep.subr.bf16.mxu1 %v4203_v0  ;;  %v3980_v43 = vld [vmem:[%s5594_s0 + $0xa4] ss:$8 sps:$4 sm:$0xff]   ;;  %v3982_v44 = vld [vmem:[%s5594_s0 + $0xa0] ss:$8 sps:$4 sm:$0xff]   ;;  %v3983_v45 = vld [vmem:[%s5594_s0 + $0xb4] ss:$8 sps:$4 sm:$0xff]  }
  0x10   :  { %v3985_v46 = vld [vmem:[%s5594_s0 + $0xb0] ss:$8 sps:$4 sm:$0xff]   ;;  %v3986_v47 = vld [vmem:[%s5594_s0 + $0xc4] ss:$8 sps:$4 sm:$0xff]   ;;  %v3988_v48 = vld [vmem:[%s5594_s0 + $0xc0] ss:$8 sps:$4 sm:$0xff]  }
  0x11   :  { %v3989_v49 = vld [vmem:[%s5594_s0 + $0xd4] ss:$8 sps:$4 sm:$0xff]   ;;  %v3991_v50 = vld [vmem:[%s5594_s0 + $0xd0] ss:$8 sps:$4 sm:$0xff]   ;;  %v3992_v51 = vld [vmem:[%s5594_s0 + $0xe4] ss:$8 sps:$4 sm:$0xff]  }
  0x12   :  { %939 = vmatpush1.bf16.msra.mxu0 %v3929_v5  ;;  %3907 = vmatpush1.bf16.msra.mxu1 %v3929_v5  ;;  %v3994_v52 = vld [vmem:[%s5594_s0 + $0xe0] ss:$8 sps:$4 sm:$0xff]   ;;  %v3995_v53 = vld [vmem:[%s5594_s0 + $0xf4] ss:$8 sps:$4 sm:$0xff]   ;;  %v3997_v54 = vld [vmem:[%s5594_s0 + $0xf0] ss:$8 sps:$4 sm:$0xff]  }
  0x13   :  { %940 = vmatprep.subr.bf16.mxu0 %v4203_v0  ;;  %3892 = vmatprep.subr.bf16.mxu1 %v4203_v0  ;;  %v3998_v55 = vld [vmem:[%s5594_s0 + $0x104] ss:$8 sps:$4 sm:$0xff]   ;;  %v4000_v56 = vld [vmem:[%s5594_s0 + $0x100] ss:$8 sps:$4 sm:$0xff]   ;;  %v4001_v57 = vld [vmem:[%s5594_s0 + $0x114] ss:$8 sps:$4 sm:$0xff]  }
  0x14   :  { %v4003_v58 = vld [vmem:[%s5594_s0 + $0x110] ss:$8 sps:$4 sm:$0xff]   ;;  %v4004_v59 = vld [vmem:[%s5594_s0 + $0x124] ss:$8 sps:$4 sm:$0xff]   ;;  %v4006_v60 = vld [vmem:[%s5594_s0 + $0x120] ss:$8 sps:$4 sm:$0xff]  }
  0x15   :  { %v4007_v61 = vld [vmem:[%s5594_s0 + $0x134] ss:$8 sps:$4 sm:$0xff]   ;;  %v4009_v62 = vld [vmem:[%s5594_s0 + $0x130] ss:$8 sps:$4 sm:$0xff]   ;;  %v4010_v63 = vld [vmem:[%s5594_s0 + $0x144] ss:$8 sps:$4 sm:$0xff]  }
  0x16   :  { %941 = vmatpush1.bf16.msra.mxu0 %v3930_v7  ;;  %3908 = vmatpush1.bf16.msra.mxu1 %v3930_v7  ;;  %v4013_v1 = vld [vmem:[%s5594_s0 + $0x154] ss:$8 sps:$4 sm:$0xff]   ;;  %v4015_v2 = vld [vmem:[%s5594_s0 + $0x150] ss:$8 sps:$4 sm:$0xff]   ;;  %v4016_v3 = vld [vmem:[%s5594_s0 + $0x164] ss:$8 sps:$4 sm:$0xff]  }
  0x17   :  { %942 = vmatprep.subr.bf16.mxu0 %v4203_v0  ;;  %3893 = vmatprep.subr.bf16.mxu1 %v4203_v0  ;;  %v4018_v4 = vld [vmem:[%s5594_s0 + $0x160] ss:$8 sps:$4 sm:$0xff]   ;;  %v4019_v5 = vld [vmem:[%s5594_s0 + $0x174] ss:$8 sps:$4 sm:$0xff]   ;;  %v4021_v6 = vld [vmem:[%s5594_s0 + $0x170] ss:$8 sps:$4 sm:$0xff]  }
  0x18   :  { %v4022_v7 = vld [vmem:[%s5594_s0 + $0x184] ss:$8 sps:$4 sm:$0xff]  }
  0x19   :  { %v4069_v8 = vld [vmem:[%s5594_s0 + $0x304] ss:$8 sps:$4 sm:$0xff]  }
  0x1a   :  { %943 = vmatpush1.bf16.msra.mxu0 %v3931_v9  ;;  %3909 = vmatpush1.bf16.msra.mxu1 %v3931_v9  ;;  %v4072_v9 = vld [vmem:[%s5594_s0 + $0x300] ss:$8 sps:$4 sm:$0xff]  }
  0x1b   :  { %944 = vmatprep.subr.bf16.mxu0 %v4203_v0  ;;  %3894 = vmatprep.subr.bf16.mxu1 %v4203_v0 }
  0x1e   :  { %945 = vmatpush1.bf16.msra.mxu0 %v3932_v10  ;;  %3910 = vmatpush1.bf16.msra.mxu1 %v3932_v10  ;;  %v4024_v10 = vld [vmem:[%s5594_s0 + $0x180] ss:$8 sps:$4 sm:$0xff]  }
  0x1f   :  { %946 = vmatprep.subr.bf16.mxu0 %v4203_v0  ;;  %3895 = vmatprep.subr.bf16.mxu1 %v4203_v0 }
  0x22   :  { %947 = vmatpush1.bf16.msra.mxu0 %v3933_v11  ;;  %3911 = vmatpush1.bf16.msra.mxu1 %v3933_v11  ;;  %v4025_v11 = vld [vmem:[%s5594_s0 + $0x194] ss:$8 sps:$4 sm:$0xff]  }
  0x23   :  { %948 = vmatprep.subr.bf16.mxu0 %v4203_v0  ;;  %3896 = vmatprep.subr.bf16.mxu1 %v4203_v0 }
  0x26   :  { %949 = vmatpush1.bf16.msra.mxu0 %v3934_v12  ;;  %3912 = vmatpush1.bf16.msra.mxu1 %v3934_v12  ;;  %v4075_v12 = vld [vmem:[%s5594_s0 + $0x314] ss:$8 sps:$4 sm:$0xff]  }
  0x27   :  { %950 = vmatprep.subr.bf16.mxu0 %v4203_v0  ;;  %3897 = vmatprep.subr.bf16.mxu1 %v4203_v0 }
  0x2a   :  { %951 = vmatpush1.bf16.msra.mxu0 %v3935_v13  ;;  %3913 = vmatpush1.bf16.msra.mxu1 %v3935_v13  ;;  %v4078_v13 = vld [vmem:[%s5594_s0 + $0x310] ss:$8 sps:$4 sm:$0xff]  }
  0x2b   :  { %952 = vmatprep.subr.bf16.mxu0 %v4203_v0  ;;  %3898 = vmatprep.subr.bf16.mxu1 %v4203_v0 }
  0x2e   :  { %953 = vmatpush1.bf16.msra.mxu0 %v3936_v14  ;;  %3914 = vmatpush1.bf16.msra.mxu1 %v3936_v14  ;;  %v4027_v14 = vld [vmem:[%s5594_s0 + $0x190] ss:$8 sps:$4 sm:$0xff]  }
  0x2f   :  { %954 = vmatprep.subr.bf16.mxu0 %v4203_v0  ;;  %3899 = vmatprep.subr.bf16.mxu1 %v4203_v0 }
  0x32   :  { %955 = vmatpush1.bf16.msra.mxu0 %v3937_v15  ;;  %3915 = vmatpush1.bf16.msra.mxu1 %v3937_v15  ;;  %v4028_v15 = vld [vmem:[%s5594_s0 + $0x1a4] ss:$8 sps:$4 sm:$0xff]  }
  0x33   :  { %956 = vmatprep.subr.bf16.mxu0 %v4203_v0  ;;  %3900 = vmatprep.subr.bf16.mxu1 %v4203_v0 }
  0x36   :  { %957 = vmatpush1.bf16.msra.mxu0 %v3938_v16  ;;  %3916 = vmatpush1.bf16.msra.mxu1 %v3938_v16  ;;  %v4081_v16 = vld [vmem:[%s5594_s0 + $0x324] ss:$8 sps:$4 sm:$0xff]  }
  0x37   :  { %958 = vmatprep.subr.bf16.mxu0 %v4203_v0  ;;  %3901 = vmatprep.subr.bf16.mxu1 %v4203_v0 }
  0x3a   :  { %959 = vmatpush1.bf16.msra.mxu0 %v3939_v17  ;;  %3917 = vmatpush1.bf16.msra.mxu1 %v3939_v17  ;;  %v4084_v17 = vld [vmem:[%s5594_s0 + $0x320] ss:$8 sps:$4 sm:$0xff]  }
  0x3b   :  { %960 = vmatprep.subr.bf16.mxu0 %v4203_v0  ;;  %3902 = vmatprep.subr.bf16.mxu1 %v4203_v0  ;;  %v4012_v0 = vld [vmem:[%s5594_s0 + $0x140] ss:$8 sps:$4 sm:$0xff]  }
  0x3e   :  { %961 = vmatpush1.bf16.msra.mxu0 %v3940_v18  ;;  %3918 = vmatpush1.bf16.msra.mxu1 %v3940_v18  ;;  %v4030_v18 = vld [vmem:[%s5594_s0 + $0x1a0] ss:$8 sps:$4 sm:$0xff]  }
  0x41   :  { %963 = vmatmul.mubr.bf16.vlgmr.msra.gmra.mrb[0].mxu0 %v3941_v19  ;;  %1323 = vmatmul.mubr.bf16.vlgmr.msra.gmra.mrb[0].mxu1 %v3944_v20  ;;  %v4031_v19 = vld [vmem:[%s5594_s0 + $0x1b4] ss:$8 sps:$4 sm:$0xff]  }
  0x42   :  { %970 = vmatprep.mubr.bf16.mxu0 %v3947_v21  ;;  %1330 = vmatprep.mubr.bf16.mxu1 %v3968_v22  ;;  %v4087_v20 = vld [vmem:[%s5594_s0 + $0x334] ss:$8 sps:$4 sm:$0xff]   ;;  %v4090_v21 = vld [vmem:[%s5594_s0 + $0x330] ss:$8 sps:$4 sm:$0xff]   ;;  %v4539_v22 = vld [vmem:[%s5595_s2] ss:$0 sm:$0xff] }
  0x49   :  { %971 = vmatmul.mubr.bf16.gmra.mrb[4].mxu0 %v3949_v23  ;;  %1331 = vmatmul.mubr.bf16.gmra.mrb[4].mxu1 %v3970_v24 }
  0x4a   :  { %978 = vmatprep.mubr.bf16.mxu0 %v3950_v25  ;;  %1338 = vmatprep.mubr.bf16.mxu1 %v3974_v26 }
  0x51   :  { %979 = vmatmul.mubr.bf16.gmra.mrb[8].mxu0 %v3952_v27  ;;  %1339 = vmatmul.mubr.bf16.gmra.mrb[8].mxu1 %v3976_v28 }
  0x52   :  { %986 = vmatprep.mubr.bf16.mxu0 %v3953_v29  ;;  %1346 = vmatprep.mubr.bf16.mxu1 %v4069_v8  ;;  %v4033_v29 = vld [vmem:[%s5594_s0 + $0x1b0] ss:$8 sps:$4 sm:$0xff]  }
  0x59   :  { %987 = vmatmul.mubr.bf16.gmra.mrb[12].mxu0 %v3955_v30  ;;  %1347 = vmatmul.mubr.bf16.gmra.mrb[12].mxu1 %v4072_v9  ;;  %v4039_v9 = vld [vmem:[%s5594_s0 + $0x1d0] ss:$8 sps:$4 sm:$0xff]  }
  0x5a   :  { %994 = vmatprep.mubr.bf16.mxu0 %v3956_v31  ;;  %1354 = vmatprep.mubr.bf16.mxu1 %v4075_v12 }
  0x61   :  { %995 = vmatmul.mubr.bf16.gmra.mrb[16].mxu0 %v3958_v32  ;;  %1355 = vmatmul.mubr.bf16.gmra.mrb[16].mxu1 %v4078_v13  ;;  %v4034_v32 = vld [vmem:[%s5594_s0 + $0x1c4] ss:$8 sps:$4 sm:$0xff]  }
  0x62   :  { %1002 = vmatprep.mubr.bf16.mxu0 %v3959_v33  ;;  %1362 = vmatprep.mubr.bf16.mxu1 %v4081_v16  ;;  %v4093_v33 = vld [vmem:[%s5594_s0 + $0x344] ss:$8 sps:$4 sm:$0xff]  }
  0x63   :  { %v4040_v13 = vld [vmem:[%s5594_s0 + $0x1e4] ss:$8 sps:$4 sm:$0xff]  }
  0x69   :  { %1003 = vmatmul.mubr.bf16.gmra.mrb[20].mxu0 %v3961_v34  ;;  %1363 = vmatmul.mubr.bf16.gmra.mrb[20].mxu1 %v4084_v17 }
  0x6a   :  { %1010 = vmatprep.mubr.bf16.mxu0 %v3962_v35  ;;  %1370 = vmatprep.mubr.bf16.mxu1 %v4087_v20  ;;  %v4105_v20 = vld [vmem:[%s5594_s0 + $0x360] ss:$8 sps:$4 sm:$0xff]  }
  0x71   :  { %1011 = vmatmul.mubr.bf16.gmra.mrb[24].mxu0 %v3964_v36  ;;  %1371 = vmatmul.mubr.bf16.gmra.mrb[24].mxu1 %v4090_v21 }
  0x72   :  { %1018 = vmatprep.mubr.bf16.mxu0 %v3965_v37  ;;  %1378 = vmatprep.mubr.bf16.mxu1 %v4093_v33 }
  0x79   :  { %1019 = vmatmul.mubr.bf16.gmra.mrb[28].mxu0 %v3967_v38 }
  0x7a   :  { %1026 = vmatprep.mubr.bf16.mxu0 %v3971_v39  ;;  %v4096_v39 = vld [vmem:[%s5594_s0 + $0x340] ss:$8 sps:$4 sm:$0xff]  }
  0x7b   :  { %1379 = vmatmul.mubr.bf16.gmra.mrb[28].mxu1 %v4096_v39  ;;  %v4108_v39 = vld [vmem:[%s5594_s0 + $0x370] ss:$8 sps:$4 sm:$0xff]  }
  0x81   :  { %1027 = vmatmul.mubr.bf16.gmra.mrb[32].mxu0 %v3973_v40 }
  0x82   :  { %1034 = vmatprep.mubr.bf16.mxu0 %v3977_v41 }
  0x89   :  { %1035 = vmatmul.mubr.bf16.gmra.mrb[36].mxu0 %v3979_v42 }
  0x8a   :  { %1042 = vmatprep.mubr.bf16.mxu0 %v3980_v43 }
  0x91   :  { %1043 = vmatmul.mubr.bf16.gmra.mrb[40].mxu0 %v3982_v44 }
  0x92   :  { %1050 = vmatprep.mubr.bf16.mxu0 %v3983_v45 }
  0x99   :  { %1051 = vmatmul.mubr.bf16.gmra.mrb[44].mxu0 %v3985_v46 }
  0x9a   :  { %1058 = vmatprep.mubr.bf16.mxu0 %v3986_v47 }
  0xa1   :  { %1059 = vmatmul.mubr.bf16.gmra.mrb[48].mxu0 %v3988_v48 }
  0xa2   :  { %1066 = vmatprep.mubr.bf16.mxu0 %v3989_v49  ;;  %v4036_v49 = vld [vmem:[%s5594_s0 + $0x1c0] ss:$8 sps:$4 sm:$0xff]  }
  0xa9   :  { %1067 = vmatmul.mubr.bf16.gmra.mrb[52].mxu0 %v3991_v50 }
  0xaa   :  { %1074 = vmatprep.mubr.bf16.mxu0 %v3992_v51 }
  0xb1   :  { %1075 = vmatmul.mubr.bf16.gmra.mrb[56].mxu0 %v3994_v52 }
  0xb2   :  { %1082 = vmatprep.mubr.bf16.mxu0 %v3995_v53  ;;  %v4037_v53 = vld [vmem:[%s5594_s0 + $0x1d4] ss:$8 sps:$4 sm:$0xff]  }
  0xb9   :  { %1083 = vmatmul.mubr.bf16.gmra.mrb[60].mxu0 %v3997_v54 }
  0xba   :  { %1090 = vmatprep.mubr.bf16.mxu0 %v3998_v55  ;;  %v4099_v55 = vld [vmem:[%s5594_s0 + $0x354] ss:$8 sps:$4 sm:$0xff]  }
  0xbb   :  { %1386 = vmatprep.mubr.bf16.mxu1 %v4099_v55 }
  0xc1   :  { %1091 = vmatmul.mubr.bf16.gmra.mrb[64].mxu0 %v4000_v56 }
  0xc2   :  { %1098 = vmatprep.mubr.bf16.mxu0 %v4001_v57 }
  0xc9   :  { %1099 = vmatmul.mubr.bf16.gmra.mrb[68].mxu0 %v4003_v58 }
  0xca   :  { %1106 = vmatprep.mubr.bf16.mxu0 %v4004_v59 }
  0xd1   :  { %1107 = vmatmul.mubr.bf16.gmra.mrb[72].mxu0 %v4006_v60 }
  0xd2   :  { %1114 = vmatprep.mubr.bf16.mxu0 %v4007_v61  ;;  %v4102_v61 = vld [vmem:[%s5594_s0 + $0x350] ss:$8 sps:$4 sm:$0xff]  }
  0xd3   :  { %1387 = vmatmul.mubr.bf16.gmra.mrb[32].mxu1 %v4102_v61 }
  0xd9   :  { %1115 = vmatmul.mubr.bf16.gmra.mrb[76].mxu0 %v4009_v62 }
  0xda   :  { %1122 = vmatprep.mubr.bf16.mxu0 %v4010_v63 }
  0xe1   :  { %1123 = vmatmul.mubr.bf16.gmra.mrb[80].mxu0 %v4012_v0 }
  0xe2   :  { %1130 = vmatprep.mubr.bf16.mxu0 %v4013_v1 }
  0xe9   :  { %1131 = vmatmul.mubr.bf16.gmra.mrb[84].mxu0 %v4015_v2 }
  0xea   :  { %1138 = vmatprep.mubr.bf16.mxu0 %v4016_v3 }
  0xf1   :  { %1139 = vmatmul.mubr.bf16.gmra.mrb[88].mxu0 %v4018_v4 }
  0xf2   :  { %1146 = vmatprep.mubr.bf16.mxu0 %v4019_v5 }
  0xf9   :  { %1147 = vmatmul.mubr.bf16.gmra.mrb[92].mxu0 %v4021_v6 }
  0xfa   :  { %1154 = vmatprep.mubr.bf16.mxu0 %v4022_v7 }
 0x101   :  { %1155 = vmatmul.mubr.bf16.gmra.mrb[96].mxu0 %v4024_v10 }
 0x102   :  { %1162 = vmatprep.mubr.bf16.mxu0 %v4025_v11 }
 0x109   :  { %1163 = vmatmul.mubr.bf16.gmra.mrb[100].mxu0 %v4027_v14 }
 0x10a   :  { %1170 = vmatprep.mubr.bf16.mxu0 %v4028_v15  ;;  %v4103_v15 = vld [vmem:[%s5594_s0 + $0x364] ss:$8 sps:$4 sm:$0xff]  }
 0x10b   :  { %1394 = vmatprep.mubr.bf16.mxu1 %v4103_v15  ;;  %v4115_v15 = vld [vmem:[%s5594_s0 + $0x3a4] ss:$8 sps:$4 sm:$0xff]  }
 0x10c   :  { %1395 = vmatmul.mubr.bf16.gmra.mrb[36].mxu1 %v4105_v20 }
 0x111   :  { %1171 = vmatmul.mubr.bf16.gmra.mrb[104].mxu0 %v4030_v18 }
 0x112   :  { %1178 = vmatprep.mubr.bf16.mxu0 %v4031_v19 }
 0x114   :  { %v964_v23 = vpop.f32.mrb[0].mxu0  ;;  %v1324_v24 = vpop.f32.mrb[0].mxu1 }
 0x115   :  { %v965_v25 = vadd.f32 %v4539_v22, %v964_v23  ;;  %v1325_v26 = vadd.f32 %v4539_v22, %v1324_v24  ;;  %v966_v27 = vpop.f32.mrb[1].mxu0  ;;  %v1326_v28 = vpop.f32.mrb[1].mxu1 }
 0x116   :  { %v967_v30 = vpop.f32.mrb[2].mxu0  ;;  %v1327_v31 = vpop.f32.mrb[2].mxu1 }
 0x117   :  { %v1565_v34 = vmax.f32 %v1325_v26, 0.0  ;;  %v968_v35 = vadd.f32 %v4539_v22, %v967_v30  ;;  %v1328_v36 = vadd.f32 %v4539_v22, %v1327_v31  ;;  %v969_v37 = vpop.f32.mrb[3].mxu0  ;;  %v1329_v38 = vpop.f32.mrb[3].mxu1  ;;  %v1475_v40 = vmax.f32 %v965_v25, 0.0 }
 0x119   :  { %v1476_v41 = vmax.f32 %v968_v35, 0.0  ;;  %v1566_v42 = vmax.f32 %v1328_v36, 0.0  ;;  %1179 = vmatmul.mubr.bf16.gmra.mrb[108].mxu0 %v4033_v29  ;;  %v4106_v36 = vld [vmem:[%s5594_s0 + $0x374] ss:$8 sps:$4 sm:$0xff]  }
 0x11a   :  { %1186 = vmatprep.mubr.bf16.mxu0 %v4034_v32  ;;  %v4042_v32 = vld [vmem:[%s5594_s0 + $0x1e0] ss:$8 sps:$4 sm:$0xff]   ;;  %1402 = vmatprep.mubr.bf16.mxu1 %v4106_v36 }
 0x11b   :  { %v1603_v43 = vpack.c.bf16 %v1476_v41, %v1475_v40  ;;  %v1648_v44 = vpack.c.bf16 %v1566_v42, %v1565_v34  ;;  %v4043_v34 = vld [vmem:[%s5594_s0 + $0x1f4] ss:$8 sps:$4 sm:$0xff]   ;;  %1403 = vmatmul.mubr.bf16.gmra.mrb[40].mxu1 %v4108_v39 }
 0x11c   :  { %v972_v45 = vpop.f32.mrb[4].mxu0  ;;  %v1332_v46 = vpop.f32.mrb[4].mxu1 }
 0x11d   :  { %1668 = vst.msk [vmem:[#allocation2] sm:$0xff] %vm1667_vm0, %v1603_v43  ;;  %1713 = vst.msk [vmem:[#allocation2 + $0x168] sm:$0xff] %vm1667_vm0, %v1648_v44  ;;  %v973_v47 = vadd.f32 %v4539_v22, %v972_v45  ;;  %v974_v48 = vpop.f32.mrb[5].mxu0  ;;  %v1333_v50 = vadd.f32 %v4539_v22, %v1332_v46  ;;  %v1334_v51 = vpop.f32.mrb[5].mxu1 }
 0x11e   :  { %v975_v52 = vpop.f32.mrb[6].mxu0  ;;  %v1335_v54 = vpop.f32.mrb[6].mxu1  ;;  %v4045_v48 = vld [vmem:[%s5594_s0 + $0x1f0] ss:$8 sps:$4 sm:$0xff]   ;;  %v4109_v51 = vld [vmem:[%s5594_s0 + $0x384] ss:$8 sps:$4 sm:$0xff]  }
 0x11f   :  { %v976_v56 = vadd.f32 %v4539_v22, %v975_v52  ;;  %v977_v57 = vpop.f32.mrb[7].mxu0  ;;  %v1567_v58 = vmax.f32 %v1333_v50, 0.0  ;;  %v1336_v59 = vadd.f32 %v4539_v22, %v1335_v54  ;;  %v1337_v60 = vpop.f32.mrb[7].mxu1  ;;  %v1477_v62 = vmax.f32 %v973_v47, 0.0  ;;  %v4046_v50 = vld [vmem:[%s5594_s0 + $0x204] ss:$8 sps:$4 sm:$0xff]   ;;  %1410 = vmatprep.mubr.bf16.mxu1 %v4109_v51 }
 0x120   :  { %v4111_v54 = vld [vmem:[%s5594_s0 + $0x380] ss:$8 sps:$4 sm:$0xff]  }
 0x121   :  { %v1478_v63 = vmax.f32 %v976_v56, 0.0  ;;  %1187 = vmatmul.mubr.bf16.gmra.mrb[112].mxu0 %v4036_v49  ;;  %v1568_v0 = vmax.f32 %v1336_v59, 0.0  ;;  %v4125_v51 = vld [vmem:[%s5596_s3] sm:$0xff]  }
 0x122   :  { %1194 = vmatprep.mubr.bf16.mxu0 %v4037_v53 }
 0x123   :  { %v1604_v1 = vpack.c.bf16 %v1478_v63, %v1477_v62  ;;  %v1649_v2 = vpack.c.bf16 %v1568_v0, %v1567_v58  ;;  %1411 = vmatmul.mubr.bf16.gmra.mrb[44].mxu1 %v4111_v54  ;;  %v4048_v62 = vld [vmem:[%s5594_s0 + $0x200] ss:$8 sps:$4 sm:$0xff]   ;;  %v4049_v0 = vld [vmem:[%s5594_s0 + $0x214] ss:$8 sps:$4 sm:$0xff]  }
 0x124   :  { %v980_v3 = vpop.f32.mrb[8].mxu0  ;;  %v2329_v4 = vld [vmem:[#allocation2 + $0x168] sm:$0xff]  ;;  %v1340_v5 = vpop.f32.mrb[8].mxu1  ;;  %v1732_v6 = vld [vmem:[#allocation2] sm:$0xff] }
 0x125   :  { %1669 = vst.msk [vmem:[#allocation2 + $0x8] sm:$0xff] %vm1667_vm0, %v1604_v1  ;;  %v981_v7 = vadd.f32 %v4539_v22, %v980_v3  ;;  %2331 = vrot.lane.b32.xlu0 %v2329_v4, %s4204_s1  ;;  %v982_v8 = vpop.f32.mrb[9].mxu0  ;;  %1714 = vst.msk [vmem:[#allocation2 + $0x170] sm:$0xff] %vm1667_vm0, %v1649_v2  ;;  %v1341_v10 = vadd.f32 %v4539_v22, %v1340_v5  ;;  %v1342_v11 = vpop.f32.mrb[9].mxu1  ;;  %v4112_v1 = vld [vmem:[%s5594_s0 + $0x394] ss:$8 sps:$4 sm:$0xff]  }
 0x126   :  { %1733 = vst.msk [vmem:[#allocation3] sm:$0xff] %vm1667_vm0, %v1732_v6  ;;  %v983_v12 = vpop.f32.mrb[10].mxu0  ;;  %v1343_v14 = vpop.f32.mrb[10].mxu1  ;;  %1418 = vmatprep.mubr.bf16.mxu1 %v4112_v1  ;;  %v4126_v54 = vld [vmem:[%s5596_s3 + $0x48] sm:$0xff]   ;;  %v4130_v1 = vld [vmem:[%s5594_s0 + $0x3d0] ss:$8 sps:$4 sm:$0xff]  }
 0x127   :  { %v984_v16 = vadd.f32 %v4539_v22, %v983_v12  ;;  %v985_v17 = vpop.f32.mrb[11].mxu0  ;;  %v1569_v18 = vmax.f32 %v1341_v10, 0.0  ;;  %v1344_v19 = vadd.f32 %v4539_v22, %v1343_v14  ;;  %v1345_v21 = vpop.f32.mrb[11].mxu1  ;;  %v1479_v23 = vmax.f32 %v981_v7, 0.0  ;;  %v4051_v12 = vld [vmem:[%s5594_s0 + $0x210] ss:$8 sps:$4 sm:$0xff]  }
 0x128   :  { %v4052_v14 = vld [vmem:[%s5594_s0 + $0x224] ss:$8 sps:$4 sm:$0xff]  }
 0x129   :  { %v1480_v24 = vmax.f32 %v984_v16, 0.0  ;;  %2399 = vrot.lane.b32.xlu0 %v2329_v4, %s4205_s30  ;;  %1195 = vmatmul.mubr.bf16.gmra.mrb[116].mxu0 %v4039_v9  ;;  %v1570_v25 = vmax.f32 %v1344_v19, 0.0  ;;  %v4114_v4 = vld [vmem:[%s5594_s0 + $0x390] ss:$8 sps:$4 sm:$0xff]  }
 0x12a   :  { %1202 = vmatprep.mubr.bf16.mxu0 %v4040_v13 }
 0x12b   :  { %v1605_v26 = vpack.c.bf16 %v1480_v24, %v1479_v23  ;;  %v1650_v27 = vpack.c.bf16 %v1570_v25, %v1569_v18  ;;  %1419 = vmatmul.mubr.bf16.gmra.mrb[48].mxu1 %v4114_v4  ;;  %v4117_v18 = vld [vmem:[%s5594_s0 + $0x3a0] ss:$8 sps:$4 sm:$0xff]  }
 0x12c   :  { %v988_v28 = vpop.f32.mrb[12].mxu0  ;;  %v1734_v29 = vld [vmem:[#allocation2 + $0x8] sm:$0xff]  ;;  %v2403_v35 = vld [vmem:[#allocation2 + $0x170] sm:$0xff]  ;;  %1426 = vmatprep.mubr.bf16.mxu1 %v4115_v15 }
 0x12d   :  { %1670 = vst.msk [vmem:[#allocation2 + $0x10] sm:$0xff] %vm1667_vm0, %v1605_v26  ;;  %v989_v30 = vadd.f32 %v4539_v22, %v988_v28  ;;  %v990_v31 = vpop.f32.mrb[13].mxu0  ;;  %1736 = vrot.lane.b32.xlu0 %v1734_v29, %s4205_s30  ;;  %1715 = vst.msk [vmem:[#allocation2 + $0x178] sm:$0xff] %vm1667_vm0, %v1650_v27  ;;  %v4054_v27 = vld [vmem:[%s5594_s0 + $0x220] ss:$8 sps:$4 sm:$0xff]  }
 0x12e   :  { %v991_v33 = vpop.f32.mrb[14].mxu0  ;;  %v4055_v29 = vld [vmem:[%s5594_s0 + $0x234] ss:$8 sps:$4 sm:$0xff]  }
 0x12f   :  { %v992_v37 = vadd.f32 %v4539_v22, %v991_v33  ;;  %v993_v38 = vpop.f32.mrb[15].mxu0  ;;  %v1481_v40 = vmax.f32 %v989_v30, 0.0  ;;  %v4118_v30 = vld [vmem:[%s5594_s0 + $0x3b4] ss:$8 sps:$4 sm:$0xff]   ;;  %v4120_v33 = vld [vmem:[%s5594_s0 + $0x3b0] ss:$8 sps:$4 sm:$0xff]  }
 0x131   :  { %v1482_v41 = vmax.f32 %v992_v37, 0.0  ;;  %1203 = vmatmul.mubr.bf16.gmra.mrb[120].mxu0 %v4042_v32  ;;  %2405 = vrot.lane.b32.xlu0 %v2403_v35, %s4206_s16 }
 0x132   :  { %1210 = vmatprep.mubr.bf16.mxu0 %v4043_v34 }
 0x133   :  { %v1606_v42 = vpack.c.bf16 %v1482_v41, %v1481_v40  ;;  %1427 = vmatmul.mubr.bf16.gmra.mrb[52].mxu1 %v4117_v18  ;;  %v4057_v41 = vld [vmem:[%s5594_s0 + $0x230] ss:$8 sps:$4 sm:$0xff]  }
 0x134   :  { %v996_v43 = vpop.f32.mrb[16].mxu0  ;;  %v1741_v44 = vld [vmem:[#allocation2 + $0x10] sm:$0xff]  ;;  %v2409_v45 = vld [vmem:[#allocation2 + $0x178] sm:$0xff]  ;;  %1434 = vmatprep.mubr.bf16.mxu1 %v4118_v30 }
 0x135   :  { %1671 = vst.msk [vmem:[#allocation2 + $0x18] sm:$0xff] %vm1667_vm0, %v1606_v42  ;;  %v997_v46 = vadd.f32 %v4539_v22, %v996_v43  ;;  %v998_v47 = vpop.f32.mrb[17].mxu0  ;;  %1743 = vrot.lane.b32.xlu1 %v1741_v44, %s4206_s16  ;;  %2411 = vrot.lane.b32.xlu0 %v2409_v45, %s4204_s1  ;;  %1816 = vst.msk [vmem:[#allocation3 + $0x20] sm:$0xff] %vm1667_vm0, %v1741_v44  ;;  %v4058_v43 = vld [vmem:[%s5594_s0 + $0x244] ss:$8 sps:$4 sm:$0xff]  }
 0x136   :  { %v999_v49 = vpop.f32.mrb[18].mxu0  ;;  %v4121_v44 = vld [vmem:[%s5594_s0 + $0x3c4] ss:$8 sps:$4 sm:$0xff]   ;;  %v4123_v47 = vld [vmem:[%s5594_s0 + $0x3c0] ss:$8 sps:$4 sm:$0xff]  }
 0x137   :  { %v1000_v52 = vadd.f32 %v4539_v22, %v999_v49  ;;  %v1001_v53 = vpop.f32.mrb[19].mxu0  ;;  %v1483_v55 = vmax.f32 %v997_v46, 0.0  ;;  %v4124_v49 = vld [vmem:[%s5596_s3 + $0x40] sm:$0xff]   ;;  %v4067_v30 = vld [vmem:[%s5594_s0 + $0x274] ss:$8 sps:$4 sm:$0xff]  }
 0x138   :  { %v4060_v53 = vld [vmem:[%s5594_s0 + $0x240] ss:$8 sps:$4 sm:$0xff]   ;;  %3686 = vmatprep.subr.bf16.mxu1 %v4124_v49  ;;  %v4148_v49 = vld [vmem:[%s5596_s3 + $0x38] sm:$0xff]  }
 0x139   :  { %v1484_v56 = vmax.f32 %v1000_v52, 0.0  ;;  %1211 = vmatmul.mubr.bf16.gmra.mrb[124].mxu0 %v4045_v48  ;;  %3687 = vmatpush3.bf16.msra.mxu1 %v4125_v51 }
 0x13a   :  { %1218 = vmatprep.mubr.bf16.mxu0 %v4046_v50  ;;  %3688 = vmatprep.subr.bf16.mxu1 %v4126_v54 }
 0x13b   :  { %v1607_v57 = vpack.c.bf16 %v1484_v56, %v1483_v55  ;;  %1435 = vmatmul.mubr.bf16.gmra.mrb[56].mxu1 %v4120_v33 }
 0x13c   :  { %v1004_v58 = vpop.f32.mrb[20].mxu0  ;;  %v1748_v59 = vld [vmem:[#allocation2 + $0x18] sm:$0xff]  ;;  %1442 = vmatprep.mubr.bf16.mxu1 %v4121_v44 }
 0x13d   :  { %1672 = vst.msk [vmem:[#allocation2 + $0x20] sm:$0xff] %vm1667_vm0, %v1607_v57  ;;  %v1005_v60 = vadd.f32 %v4539_v22, %v1004_v58  ;;  %v1006_v61 = vpop.f32.mrb[21].mxu0  ;;  %1750 = vrot.lane.b32.xlu1 %v1748_v59, %s4204_s1  ;;  %v4061_v57 = vld [vmem:[%s5594_s0 + $0x254] ss:$8 sps:$4 sm:$0xff]   ;;  %v4127_v58 = vld [vmem:[%s5596_s3 + $0x8] sm:$0xff]  }
 0x13e   :  { %v1007_v63 = vpop.f32.mrb[22].mxu0  ;;  %3689 = vmatpush3.bf16.msra.mxu1 %v4127_v58  ;;  %v4071_v44 = vld [vmem:[%s5594_s0 + $0x270] ss:$8 sps:$4 sm:$0xff]  }
 0x13f   :  { %v1008_v2 = vadd.f32 %v4539_v22, %v1007_v63  ;;  %v1009_v3 = vpop.f32.mrb[23].mxu0  ;;  %v1485_v5 = vmax.f32 %v1005_v60, 0.0 }
 0x140   :  { %v4132_v3 = vld [vmem:[%s5596_s3 + $0x10] sm:$0xff]  }
 0x141   :  { %v1486_v6 = vmax.f32 %v1008_v2, 0.0  ;;  %1219 = vmatmul.mubr.bf16.gmra.mrb[128].mxu0 %v4048_v62  ;;  %1819 = vrot.lane.b32.xlu1 %v1748_v59, %s4205_s30  ;;  %v4128_v62 = vld [vmem:[%s5594_s0 + $0x3d4] ss:$8 sps:$4 sm:$0xff]  }
 0x142   :  { %1226 = vmatprep.mubr.bf16.mxu0 %v4049_v0  ;;  %v4131_v2 = vld [vmem:[%s5596_s3 + $0x50] sm:$0xff]  }
 0x143   :  { %v1608_v7 = vpack.c.bf16 %v1486_v6, %v1485_v5  ;;  %1443 = vmatmul.mubr.bf16.gmra.mrb[60].mxu1 %v4123_v47  ;;  %3690 = vmatprep.subr.bf16.mxu1 %v4131_v2 }
 0x144   :  { %v1012_v8 = vpop.f32.mrb[24].mxu0  ;;  %v1823_v9 = vld [vmem:[#allocation2 + $0x20] sm:$0xff]  ;;  %1450 = vmatprep.mubr.bf16.mxu1 %v4128_v62  ;;  %3691 = vmatpush3.bf16.msra.mxu1 %v4132_v3 }
 0x145   :  { %1673 = vst.msk [vmem:[#allocation2 + $0x28] sm:$0xff] %vm1667_vm0, %v1608_v7  ;;  %v1013_v10 = vadd.f32 %v4539_v22, %v1012_v8  ;;  %v1014_v11 = vpop.f32.mrb[25].mxu0  ;;  %1825 = vrot.lane.b32.xlu1 %v1823_v9, %s4206_s16  ;;  %1896 = vst.msk [vmem:[#allocation3 + $0x40] sm:$0xff] %vm1667_vm0, %v1823_v9  ;;  %v4063_v7 = vld [vmem:[%s5594_s0 + $0x250] ss:$8 sps:$4 sm:$0xff]  }
 0x146   :  { %v1015_v13 = vpop.f32.mrb[26].mxu0  ;;  %v4133_v8 = vld [vmem:[%s5596_s3 + $0x58] sm:$0xff]   ;;  %v4077_v62 = vld [vmem:[%s5594_s0 + $0x280] ss:$8 sps:$4 sm:$0xff]  }
 0x147   :  { %v1016_v16 = vadd.f32 %v4539_v22, %v1015_v13  ;;  %v1017_v17 = vpop.f32.mrb[27].mxu0  ;;  %v1487_v19 = vmax.f32 %v1013_v10, 0.0  ;;  %v4064_v10 = vld [vmem:[%s5594_s0 + $0x264] ss:$8 sps:$4 sm:$0xff]   ;;  %3692 = vmatprep.subr.bf16.mxu1 %v4133_v8 }
 0x149   :  { %v1488_v20 = vmax.f32 %v1016_v16, 0.0  ;;  %1227 = vmatmul.mubr.bf16.gmra.mrb[132].mxu0 %v4051_v12  ;;  %v4134_v12 = vld [vmem:[%s5596_s3 + $0x18] sm:$0xff]   ;;  %v4135_v16 = vld [vmem:[%s5594_s0 + $0x3e4] ss:$8 sps:$4 sm:$0xff]  }
 0x14a   :  { %1234 = vmatprep.mubr.bf16.mxu0 %v4052_v14  ;;  %3693 = vmatpush3.bf16.msra.mxu1 %v4134_v12  ;;  %v4085_v12 = vld [vmem:[%s5594_s0 + $0x2a4] ss:$8 sps:$4 sm:$0xff]  }
 0x14b   :  { %v1609_v21 = vpack.c.bf16 %v1488_v20, %v1487_v19  ;;  %1451 = vmatmul.mubr.bf16.gmra.mrb[64].mxu1 %v4130_v1  ;;  %v4137_v19 = vld [vmem:[%s5594_s0 + $0x3e0] ss:$8 sps:$4 sm:$0xff]  }
 0x14c   :  { %v1020_v23 = vpop.f32.mrb[28].mxu0  ;;  %v1829_v24 = vld [vmem:[#allocation2 + $0x28] sm:$0xff]  ;;  %v4138_v20 = vld [vmem:[%s5596_s3 + $0x60] sm:$0xff]   ;;  %1458 = vmatprep.mubr.bf16.mxu1 %v4135_v16 }
 0x14d   :  { %1674 = vst.msk [vmem:[#allocation2 + $0x30] sm:$0xff] %vm1667_vm0, %v1609_v21  ;;  %v1021_v25 = vadd.f32 %v4539_v22, %v1020_v23  ;;  %v1022_v26 = vpop.f32.mrb[29].mxu0  ;;  %1831 = vrot.lane.b32.xlu1 %v1829_v24, %s4204_s1  ;;  %v4139_v21 = vld [vmem:[%s5596_s3 + $0x20] sm:$0xff]   ;;  %3694 = vmatprep.subr.bf16.mxu1 %v4138_v20 }
 0x14e   :  { %v1023_v28 = vpop.f32.mrb[30].mxu0  ;;  %v4066_v26 = vld [vmem:[%s5594_s0 + $0x260] ss:$8 sps:$4 sm:$0xff]   ;;  %3695 = vmatpush3.bf16.msra.mxu1 %v4139_v21 }
 0x14f   :  { %v1024_v31 = vadd.f32 %v4539_v22, %v1023_v28  ;;  %v1025_v32 = vpop.f32.mrb[31].mxu0  ;;  %v1489_v34 = vmax.f32 %v1021_v25, 0.0 }
 0x151   :  { %v1490_v35 = vmax.f32 %v1024_v31, 0.0  ;;  %1235 = vmatmul.mubr.bf16.gmra.mrb[136].mxu0 %v4054_v27  ;;  %1899 = vrot.lane.b32.xlu1 %v1829_v24, %s4205_s30  ;;  %v4140_v27 = vld [vmem:[%s5596_s3 + $0x68] sm:$0xff]  }
 0x152   :  { %1242 = vmatprep.mubr.bf16.mxu0 %v4055_v29  ;;  %v4141_v31 = vld [vmem:[%s5596_s3 + $0x28] sm:$0xff]   ;;  %3696 = vmatprep.subr.bf16.mxu1 %v4140_v27 }
 0x153   :  { %v1610_v36 = vpack.c.bf16 %v1490_v35, %v1489_v34  ;;  %1459 = vmatmul.mubr.bf16.gmra.mrb[68].mxu1 %v4137_v19  ;;  %v4142_v35 = vld [vmem:[%s5594_s0 + $0x3f4] ss:$8 sps:$4 sm:$0xff]  }
 0x154   :  { %v1028_v37 = vpop.f32.mrb[32].mxu0  ;;  %v1903_v38 = vld [vmem:[#allocation2 + $0x30] sm:$0xff]  ;;  %3697 = vmatpush3.bf16.msra.mxu1 %v4141_v31  ;;  %1466 = vmatprep.mubr.bf16.mxu1 %v4142_v35 }
 0x155   :  { %1675 = vst.msk [vmem:[#allocation2 + $0x38] sm:$0xff] %vm1667_vm0, %v1610_v36  ;;  %v1029_v39 = vadd.f32 %v4539_v22, %v1028_v37  ;;  %v1030_v40 = vpop.f32.mrb[33].mxu0  ;;  %1905 = vrot.lane.b32.xlu1 %v1903_v38, %s4206_s16  ;;  %v4144_v38 = vld [vmem:[%s5594_s0 + $0x3f0] ss:$8 sps:$4 sm:$0xff]  }
 0x156   :  { %v1031_v42 = vpop.f32.mrb[34].mxu0  ;;  %v4146_v40 = vld [vmem:[%s5596_s3 + $0x30] sm:$0xff]  }
 0x157   :  { %v1032_v45 = vadd.f32 %v4539_v22, %v1031_v42  ;;  %v1033_v46 = vpop.f32.mrb[35].mxu0  ;;  %v1491_v48 = vmax.f32 %v1029_v39, 0.0  ;;  %v4145_v39 = vld [vmem:[%s5596_s3 + $0x70] sm:$0xff]  }
 0x158   :  { %3698 = vmatprep.subr.bf16.mxu1 %v4145_v39  ;;  %v4095_v35 = vld [vmem:[%s5594_s0 + $0x2b0] ss:$8 sps:$4 sm:$0xff]  }
 0x159   :  { %v1492_v50 = vmax.f32 %v1032_v45, 0.0  ;;  %1243 = vmatmul.mubr.bf16.gmra.mrb[140].mxu0 %v4057_v41  ;;  %v4147_v45 = vld [vmem:[%s5596_s3 + $0x78] sm:$0xff]   ;;  %3699 = vmatpush3.bf16.msra.mxu1 %v4146_v40 }
 0x15a   :  { %1250 = vmatprep.mubr.bf16.mxu0 %v4058_v43  ;;  %3700 = vmatprep.subr.bf16.mxu1 %v4147_v45 }
 0x15b   :  { %v1611_v52 = vpack.c.bf16 %v1492_v50, %v1491_v48  ;;  %1467 = vmatmul.mubr.bf16.gmra.mrb[72].mxu1 %v4144_v38  ;;  %v4073_v48 = vld [vmem:[%s5594_s0 + $0x284] ss:$8 sps:$4 sm:$0xff]  }
 0x15c   :  { %v1036_v55 = vpop.f32.mrb[36].mxu0  ;;  %v1909_v56 = vld [vmem:[#allocation2 + $0x38] sm:$0xff] }
 0x15d   :  { %1676 = vst.msk [vmem:[#allocation2 + $0x40] sm:$0xff] %vm1667_vm0, %v1611_v52  ;;  %v1037_v59 = vadd.f32 %v4539_v22, %v1036_v55  ;;  %v1038_v60 = vpop.f32.mrb[37].mxu0  ;;  %1911 = vrot.lane.b32.xlu1 %v1909_v56, %s4204_s1  ;;  %3701 = vmatpush3.bf16.msra.mxu1 %v4148_v49  ;;  %v4101_v49 = vld [vmem:[%s5594_s0 + $0x2c0] ss:$8 sps:$4 sm:$0xff]  }
 0x15e   :  { %v1039_v61 = vpop.f32.mrb[38].mxu0 }
 0x15f   :  { %v1040_v63 = vadd.f32 %v4539_v22, %v1039_v61  ;;  %v1041_v0 = vpop.f32.mrb[39].mxu0  ;;  %v1493_v4 = vmax.f32 %v1037_v59, 0.0 }
 0x160   :  { %v4079_v0 = vld [vmem:[%s5594_s0 + $0x294] ss:$8 sps:$4 sm:$0xff]  }
 0x161   :  { %v1494_v5 = vmax.f32 %v1040_v63, 0.0  ;;  %1251 = vmatmul.mubr.bf16.gmra.mrb[144].mxu0 %v4060_v53 }
 0x162   :  { %1258 = vmatprep.mubr.bf16.mxu0 %v4061_v57 }
 0x163   :  { %v1612_v6 = vpack.c.bf16 %v1494_v5, %v1493_v4 }
 0x164   :  { %v1044_v9 = vpop.f32.mrb[40].mxu0  ;;  %v1755_v11 = vld [vmem:[#allocation2 + $0x40] sm:$0xff] }
 0x165   :  { %1677 = vst.msk [vmem:[#allocation2 + $0x48] sm:$0xff] %vm1667_vm0, %v1612_v6  ;;  %v1045_v13 = vadd.f32 %v4539_v22, %v1044_v9  ;;  %v1046_v14 = vpop.f32.mrb[41].mxu0  ;;  %1756 = vst.msk [vmem:[#allocation3 + $0x8] sm:$0xff] %vm1667_vm0, %v1755_v11 }
 0x166   :  { %v1047_v15 = vpop.f32.mrb[42].mxu0 }
 0x167   :  { %v1048_v17 = vadd.f32 %v4539_v22, %v1047_v15  ;;  %v1049_v18 = vpop.f32.mrb[43].mxu0  ;;  %v1495_v23 = vmax.f32 %v1045_v13, 0.0 }
 0x169   :  { %v1496_v24 = vmax.f32 %v1048_v17, 0.0  ;;  %1259 = vmatmul.mubr.bf16.gmra.mrb[148].mxu0 %v4063_v7 }
 0x16a   :  { %1266 = vmatprep.mubr.bf16.mxu0 %v4064_v10  ;;  %v4083_v10 = vld [vmem:[%s5594_s0 + $0x290] ss:$8 sps:$4 sm:$0xff]  }
 0x16b   :  { %v1613_v25 = vpack.c.bf16 %v1496_v24, %v1495_v23  ;;  %v4089_v23 = vld [vmem:[%s5594_s0 + $0x2a0] ss:$8 sps:$4 sm:$0xff]  }
 0x16c   :  { %v1052_v28 = vpop.f32.mrb[44].mxu0  ;;  %v1757_v29 = vld [vmem:[#allocation2 + $0x48] sm:$0xff] }
 0x16d   :  { %1678 = vst.msk [vmem:[#allocation2 + $0x50] sm:$0xff] %vm1667_vm0, %v1613_v25  ;;  %v1053_v32 = vadd.f32 %v4539_v22, %v1052_v28  ;;  %v1054_v33 = vpop.f32.mrb[45].mxu0  ;;  %1759 = vrot.lane.b32.xlu0 %v1757_v29, %s4205_s30  ;;  %v4091_v25 = vld [vmem:[%s5594_s0 + $0x2b4] ss:$8 sps:$4 sm:$0xff]  }
 0x16e   :  { %v1055_v34 = vpop.f32.mrb[46].mxu0 }
 0x16f   :  { %v1056_v36 = vadd.f32 %v4539_v22, %v1055_v34  ;;  %v1057_v37 = vpop.f32.mrb[47].mxu0  ;;  %v1497_v41 = vmax.f32 %v1053_v32, 0.0 }
 0x170   :  { %v4097_v37 = vld [vmem:[%s5594_s0 + $0x2c4] ss:$8 sps:$4 sm:$0xff]  }
 0x171   :  { %v1498_v42 = vmax.f32 %v1056_v36, 0.0  ;;  %1267 = vmatmul.mubr.bf16.gmra.mrb[152].mxu0 %v4066_v26 }
 0x172   :  { %1274 = vmatprep.mubr.bf16.mxu0 %v4067_v30 }
 0x173   :  { %v1614_v43 = vpack.c.bf16 %v1498_v42, %v1497_v41 }
 0x174   :  { %v1060_v46 = vpop.f32.mrb[48].mxu0  ;;  %v1763_v47 = vld [vmem:[#allocation2 + $0x50] sm:$0xff] }
 0x175   :  { %1679 = vst.msk [vmem:[#allocation2 + $0x58] sm:$0xff] %vm1667_vm0, %v1614_v43  ;;  %v1061_v50 = vadd.f32 %v4539_v22, %v1060_v46  ;;  %v1062_v51 = vpop.f32.mrb[49].mxu0  ;;  %1765 = vrot.lane.b32.xlu1 %v1763_v47, %s4206_s16  ;;  %1836 = vst.msk [vmem:[#allocation3 + $0x28] sm:$0xff] %vm1667_vm0, %v1763_v47 }
 0x176   :  { %v1063_v52 = vpop.f32.mrb[50].mxu0 }
 0x177   :  { %v1064_v53 = vadd.f32 %v4539_v22, %v1063_v52  ;;  %v1065_v54 = vpop.f32.mrb[51].mxu0  ;;  %v1499_v55 = vmax.f32 %v1061_v50, 0.0 }
 0x179   :  { %v1500_v56 = vmax.f32 %v1064_v53, 0.0  ;;  %1275 = vmatmul.mubr.bf16.gmra.mrb[156].mxu0 %v4071_v44 }
 0x17a   :  { %1282 = vmatprep.mubr.bf16.mxu0 %v4073_v48 }
 0x17b   :  { %v1615_v57 = vpack.c.bf16 %v1500_v56, %v1499_v55 }
 0x17c   :  { %v1068_v58 = vpop.f32.mrb[52].mxu0  ;;  %v1769_v59 = vld [vmem:[#allocation2 + $0x58] sm:$0xff] }
 0x17d   :  { %1680 = vst.msk [vmem:[#allocation2 + $0x60] sm:$0xff] %vm1667_vm0, %v1615_v57  ;;  %v1069_v60 = vadd.f32 %v4539_v22, %v1068_v58  ;;  %v1070_v61 = vpop.f32.mrb[53].mxu0  ;;  %1771 = vrot.lane.b32.xlu0 %v1769_v59, %s4204_s1 }
 0x17e   :  { %v1071_v63 = vpop.f32.mrb[54].mxu0 }
 0x17f   :  { %v1072_v1 = vadd.f32 %v4539_v22, %v1071_v63  ;;  %v1073_v2 = vpop.f32.mrb[55].mxu0  ;;  %v1501_v3 = vmax.f32 %v1069_v60, 0.0 }
 0x181   :  { %v1502_v4 = vmax.f32 %v1072_v1, 0.0  ;;  %1283 = vmatmul.mubr.bf16.gmra.mrb[160].mxu0 %v4077_v62  ;;  %1839 = vrot.lane.b32.xlu0 %v1769_v59, %s4205_s30 }
 0x182   :  { %1290 = vmatprep.mubr.bf16.mxu0 %v4079_v0 }
 0x183   :  { %v1616_v5 = vpack.c.bf16 %v1502_v4, %v1501_v3 }
 0x184   :  { %v1076_v6 = vpop.f32.mrb[56].mxu0  ;;  %v1843_v7 = vld [vmem:[#allocation2 + $0x60] sm:$0xff] }
 0x185   :  { %1681 = vst.msk [vmem:[#allocation2 + $0x68] sm:$0xff] %vm1667_vm0, %v1616_v5  ;;  %v1077_v8 = vadd.f32 %v4539_v22, %v1076_v6  ;;  %v1078_v9 = vpop.f32.mrb[57].mxu0  ;;  %1845 = vrot.lane.b32.xlu0 %v1843_v7, %s4206_s16  ;;  %1916 = vst.msk [vmem:[#allocation3 + $0x48] sm:$0xff] %vm1667_vm0, %v1843_v7 }
 0x186   :  { %v1079_v11 = vpop.f32.mrb[58].mxu0 }
 0x187   :  { %v1080_v13 = vadd.f32 %v4539_v22, %v1079_v11  ;;  %v1081_v14 = vpop.f32.mrb[59].mxu0  ;;  %v1503_v15 = vmax.f32 %v1077_v8, 0.0 }
 0x189   :  { %v1504_v16 = vmax.f32 %v1080_v13, 0.0  ;;  %1291 = vmatmul.mubr.bf16.gmra.mrb[164].mxu0 %v4083_v10 }
 0x18a   :  { %1298 = vmatprep.mubr.bf16.mxu0 %v4085_v12 }
 0x18b   :  { %v1617_v17 = vpack.c.bf16 %v1504_v16, %v1503_v15 }
 0x18c   :  { %v1084_v18 = vpop.f32.mrb[60].mxu0  ;;  %v1849_v19 = vld [vmem:[#allocation2 + $0x68] sm:$0xff] }
 0x18d   :  { %1682 = vst.msk [vmem:[#allocation2 + $0x70] sm:$0xff] %vm1667_vm0, %v1617_v17  ;;  %v1085_v20 = vadd.f32 %v4539_v22, %v1084_v18  ;;  %v1086_v21 = vpop.f32.mrb[61].mxu0  ;;  %1851 = vrot.lane.b32.xlu0 %v1849_v19, %s4204_s1 }
 0x18e   :  { %v1087_v24 = vpop.f32.mrb[62].mxu0 }
 0x18f   :  { %v1088_v26 = vadd.f32 %v4539_v22, %v1087_v24  ;;  %v1089_v27 = vpop.f32.mrb[63].mxu0  ;;  %v1505_v28 = vmax.f32 %v1085_v20, 0.0 }
 0x191   :  { %v1506_v29 = vmax.f32 %v1088_v26, 0.0  ;;  %1299 = vmatmul.mubr.bf16.gmra.mrb[168].mxu0 %v4089_v23  ;;  %1919 = vrot.lane.b32.xlu0 %v1849_v19, %s4205_s30 }
 0x192   :  { %1306 = vmatprep.mubr.bf16.mxu0 %v4091_v25 }
 0x193   :  { %v1618_v30 = vpack.c.bf16 %v1506_v29, %v1505_v28 }
 0x194   :  { %v1092_v31 = vpop.f32.mrb[64].mxu0  ;;  %v1923_v32 = vld [vmem:[#allocation2 + $0x70] sm:$0xff] }
 0x195   :  { %1683 = vst.msk [vmem:[#allocation2 + $0x78] sm:$0xff] %vm1667_vm0, %v1618_v30  ;;  %v1093_v33 = vadd.f32 %v4539_v22, %v1092_v31  ;;  %v1094_v34 = vpop.f32.mrb[65].mxu0  ;;  %1925 = vrot.lane.b32.xlu0 %v1923_v32, %s4206_s16 }
 0x196   :  { %v1095_v36 = vpop.f32.mrb[66].mxu0 }
 0x197   :  { %v1096_v38 = vadd.f32 %v4539_v22, %v1095_v36  ;;  %v4849_v39 = vpop.permute.xlu0 %2331  ;;  %v1097_v40 = vpop.f32.mrb[67].mxu0  ;;  %v1507_v41 = vmax.f32 %v1093_v33, 0.0 }
 0x199   :  { %v1508_v42 = vmax.f32 %v1096_v38, 0.0  ;;  %1307 = vmatmul.mubr.bf16.gmra.mrb[172].mxu0 %v4095_v35 }
 0x19a   :  { %1314 = vmatprep.mubr.bf16.mxu0 %v4097_v37 }
 0x19b   :  { %v1619_v43 = vpack.c.bf16 %v1508_v42, %v1507_v41  ;;  %v4851_v44 = vpop.permute.xlu0 %2399 }
 0x19c   :  { %v1100_v45 = vpop.f32.mrb[68].mxu0  ;;  %v1929_v46 = vld [vmem:[#allocation2 + $0x78] sm:$0xff] }
 0x19d   :  { %1684 = vst.msk [vmem:[#allocation2 + $0x80] sm:$0xff] %vm1667_vm0, %v1619_v43  ;;  %v1101_v47 = vadd.f32 %v4539_v22, %v1100_v45  ;;  %v1102_v48 = vpop.f32.mrb[69].mxu0  ;;  %1931 = vrot.lane.b32.xlu0 %v1929_v46, %s4204_s1 }
 0x19e   :  { %v1103_v50 = vpop.f32.mrb[70].mxu0 }
 0x19f   :  { %v1104_v51 = vadd.f32 %v4539_v22, %v1103_v50  ;;  %v1105_v52 = vpop.f32.mrb[71].mxu0  ;;  %v1737_v53 = vpop.permute.xlu0 %1736  ;;  %v1509_v54 = vmax.f32 %v1101_v47, 0.0 }
 0x1a0   :  { %1740 = vst.msk [vmem:[#allocation3] sm:$0xff] %vm1739_vm1, %v1737_v53 }
 0x1a1   :  { %v1510_v55 = vmax.f32 %v1104_v51, 0.0  ;;  %1315 = vmatmul.mubr.bf16.gmra.mrb[176].mxu0 %v4101_v49 }
 0x1a3   :  { %v1620_v56 = vpack.c.bf16 %v1510_v55, %v1509_v54 }
 0x1a4   :  { %v1108_v57 = vpop.f32.mrb[72].mxu0  ;;  %v1975_v58 = vld [vmem:[#allocation2 + $0x80] sm:$0xff] }
 0x1a5   :  { %1685 = vst.msk [vmem:[#allocation2 + $0x88] sm:$0xff] %vm1667_vm0, %v1620_v56  ;;  %v1109_v59 = vadd.f32 %v4539_v22, %v1108_v57  ;;  %v1110_v60 = vpop.f32.mrb[73].mxu0  ;;  %1976 = vst.msk [vmem:[#allocation3 + $0x60] sm:$0xff] %vm1667_vm0, %v1975_v58 }
 0x1a6   :  { %1776 = vst.msk [vmem:[#allocation3 + $0x10] sm:$0xff] %vm1667_vm0, %v1975_v58  ;;  %v1111_v61 = vpop.f32.mrb[74].mxu0 }
 0x1a7   :  { %v1112_v62 = vadd.f32 %v4539_v22, %v1111_v61  ;;  %v1113_v63 = vpop.f32.mrb[75].mxu0  ;;  %v1744_v0 = vpop.permute.xlu1 %1743  ;;  %v1511_v1 = vmax.f32 %v1109_v59, 0.0 }
 0x1a8   :  { %1747 = vst.msk [vmem:[#allocation3] sm:$0xff] %vm1746_vm2, %v1744_v0  ;;  %v4908_v0 = vpop.permute.xlu0 %2405 }
 0x1a9   :  { %v1512_v2 = vmax.f32 %v1112_v62, 0.0 }
 0x1ab   :  { %v1621_v3 = vpack.c.bf16 %v1512_v2, %v1511_v1 }
 0x1ac   :  { %v1116_v4 = vpop.f32.mrb[76].mxu0  ;;  %v1977_v5 = vld [vmem:[#allocation2 + $0x88] sm:$0xff] }
 0x1ad   :  { %1686 = vst.msk [vmem:[#allocation2 + $0x90] sm:$0xff] %vm1667_vm0, %v1621_v3  ;;  %v1117_v6 = vadd.f32 %v4539_v22, %v1116_v4  ;;  %v1118_v7 = vpop.f32.mrb[77].mxu0  ;;  %1979 = vrot.lane.b32.xlu1 %v1977_v5, %s4205_s30 }
 0x1ae   :  { %v1119_v8 = vpop.f32.mrb[78].mxu0 }
 0x1af   :  { %v1120_v9 = vadd.f32 %v4539_v22, %v1119_v8  ;;  %v1121_v10 = vpop.f32.mrb[79].mxu0  ;;  %v1751_v11 = vpop.permute.xlu1 %1750  ;;  %v1513_v12 = vmax.f32 %v1117_v6, 0.0  ;;  %v4878_v22 = vld [vmem:[%s5595_s2] ss:$0 sm:$0xff] }
 0x1b0   :  { %1754 = vst.msk [vmem:[#allocation3] sm:$0xff] %vm1753_vm3, %v1751_v11 }
 0x1b1   :  { %v1514_v13 = vmax.f32 %v1120_v9, 0.0  ;;  %1779 = vrot.lane.b32.xlu1 %v1977_v5, %s4205_s30  ;;  %v1348_v5 = vpop.f32.mrb[12].mxu1 }
 0x1b2   :  { %v1350_v7 = vpop.f32.mrb[13].mxu1  ;;  %v1349_v10 = vadd.f32 %v4878_v22, %v1348_v5 }
 0x1b3   :  { %v1622_v14 = vpack.c.bf16 %v1514_v13, %v1513_v12  ;;  %v1820_v15 = vpop.permute.xlu1 %1819  ;;  %v1351_v11 = vpop.f32.mrb[14].mxu1 }
 0x1b4   :  { %1822 = vst.msk [vmem:[#allocation3 + $0x20] sm:$0xff] %vm1739_vm1, %v1820_v15  ;;  %v1124_v16 = vpop.f32.mrb[80].mxu0  ;;  %v1983_v17 = vld [vmem:[#allocation2 + $0x90] sm:$0xff]  ;;  %v1353_v12 = vpop.f32.mrb[15].mxu1 }
 0x1b5   :  { %1687 = vst.msk [vmem:[#allocation2 + $0x98] sm:$0xff] %vm1667_vm0, %v1622_v14  ;;  %v1125_v18 = vadd.f32 %v4878_v22, %v1124_v16  ;;  %v1126_v19 = vpop.f32.mrb[81].mxu0  ;;  %1985 = vrot.lane.b32.xlu1 %v1983_v17, %s4206_s16  ;;  %2056 = vst.msk [vmem:[#allocation3 + $0x80] sm:$0xff] %vm1667_vm0, %v1983_v17  ;;  %v4920_v15 = vpop.permute.xlu0 %2411  ;;  %v1571_v16 = vmax.f32 %v1349_v10, 0.0 }
 0x1b6   :  { %1856 = vst.msk [vmem:[#allocation3 + $0x30] sm:$0xff] %vm1667_vm0, %v1983_v17  ;;  %v1127_v20 = vpop.f32.mrb[82].mxu0 }
 0x1b7   :  { %v1128_v21 = vadd.f32 %v4878_v22, %v1127_v20  ;;  %v1129_v23 = vpop.f32.mrb[83].mxu0  ;;  %v1826_v24 = vpop.permute.xlu1 %1825  ;;  %v1515_v25 = vmax.f32 %v1125_v18, 0.0 }
 0x1b8   :  { %1828 = vst.msk [vmem:[#allocation3 + $0x20] sm:$0xff] %vm1746_vm2, %v1826_v24 }
 0x1b9   :  { %v1516_v26 = vmax.f32 %v1128_v21, 0.0  ;;  %1785 = vrot.lane.b32.xlu1 %v1983_v17, %s4206_s16  ;;  %v1352_v17 = vadd.f32 %v4878_v22, %v1351_v11 }
 0x1bb   :  { %v1623_v27 = vpack.c.bf16 %v1516_v26, %v1515_v25  ;;  %v1572_v19 = vmax.f32 %v1352_v17, 0.0  ;;  %v1356_v26 = vpop.f32.mrb[16].mxu1 }
 0x1bc   :  { %v1132_v28 = vpop.f32.mrb[84].mxu0  ;;  %v1989_v29 = vld [vmem:[#allocation2 + $0x98] sm:$0xff] }
 0x1bd   :  { %1688 = vst.msk [vmem:[#allocation2 + $0xa0] sm:$0xff] %vm1667_vm0, %v1623_v27  ;;  %v1133_v30 = vadd.f32 %v4878_v22, %v1132_v28  ;;  %v1134_v31 = vpop.f32.mrb[85].mxu0  ;;  %1991 = vrot.lane.b32.xlu1 %v1989_v29, %s4204_s1  ;;  %v1651_v25 = vpack.c.bf16 %v1572_v19, %v1571_v16  ;;  %v1358_v28 = vpop.f32.mrb[17].mxu1 }
 0x1be   :  { %v1135_v32 = vpop.f32.mrb[86].mxu0 }
 0x1bf   :  { %v1136_v33 = vadd.f32 %v4878_v22, %v1135_v32  ;;  %v1137_v34 = vpop.f32.mrb[87].mxu0  ;;  %v1832_v35 = vpop.permute.xlu1 %1831  ;;  %v1517_v36 = vmax.f32 %v1133_v30, 0.0  ;;  %1716 = vst.msk [vmem:[#allocation2 + $0x180] sm:$0xff] %vm1667_vm0, %v1651_v25  ;;  %v1357_v32 = vadd.f32 %v4878_v22, %v1356_v26 }
 0x1c0   :  { %1834 = vst.msk [vmem:[#allocation3 + $0x20] sm:$0xff] %vm1753_vm3, %v1832_v35  ;;  %v1359_v34 = vpop.f32.mrb[18].mxu1 }
 0x1c1   :  { %v1518_v37 = vmax.f32 %v1136_v33, 0.0  ;;  %2059 = vrot.lane.b32.xlu1 %v1989_v29, %s4205_s30 }
 0x1c3   :  { %v1624_v38 = vpack.c.bf16 %v1518_v37, %v1517_v36  ;;  %v1900_v40 = vpop.permute.xlu1 %1899  ;;  %v1573_v37 = vmax.f32 %v1357_v32, 0.0 }
 0x1c4   :  { %1902 = vst.msk [vmem:[#allocation3 + $0x40] sm:$0xff] %vm1739_vm1, %v1900_v40  ;;  %v1140_v41 = vpop.f32.mrb[88].mxu0  ;;  %v2063_v42 = vld [vmem:[#allocation2 + $0xa0] sm:$0xff]  ;;  %v1361_v40 = vpop.f32.mrb[19].mxu1 }
 0x1c5   :  { %v1935_v43 = vld [vmem:[#allocation2 + $0xa0] sm:$0xff]  ;;  %1689 = vst.msk [vmem:[#allocation2 + $0xa8] sm:$0xff] %vm1667_vm0, %v1624_v38  ;;  %v1141_v45 = vadd.f32 %v4878_v22, %v1140_v41  ;;  %v1142_v46 = vpop.f32.mrb[89].mxu0  ;;  %1791 = vrot.lane.b32.xlu1 %v1989_v29, %s4204_s1  ;;  %2136 = vst.msk [vmem:[#allocation3 + $0xa0] sm:$0xff] %vm1667_vm0, %v2063_v42  ;;  %v1360_v38 = vadd.f32 %v4878_v22, %v1359_v34 }
 0x1c6   :  { %1936 = vst.msk [vmem:[#allocation3 + $0x50] sm:$0xff] %vm1667_vm0, %v1935_v43  ;;  %v1143_v47 = vpop.f32.mrb[90].mxu0 }
 0x1c7   :  { %v1144_v48 = vadd.f32 %v4878_v22, %v1143_v47  ;;  %v1145_v49 = vpop.f32.mrb[91].mxu0  ;;  %v1906_v50 = vpop.permute.xlu1 %1905  ;;  %v1519_v51 = vmax.f32 %v1141_v45, 0.0 }
 0x1c8   :  { %1908 = vst.msk [vmem:[#allocation3 + $0x40] sm:$0xff] %vm1746_vm2, %v1906_v50  ;;  %v1364_v49 = vpop.f32.mrb[20].mxu1 }
 0x1c9   :  { %v1520_v52 = vmax.f32 %v1144_v48, 0.0  ;;  %1859 = vrot.lane.b32.xlu1 %v1989_v29, %s4205_s30 }
 0x1cb   :  { %v1625_v53 = vpack.c.bf16 %v1520_v52, %v1519_v51  ;;  %v1366_v51 = vpop.f32.mrb[21].mxu1 }
 0x1cc   :  { %v1148_v54 = vpop.f32.mrb[92].mxu0  ;;  %v4910_v2 = vld [vmem:[#allocation2 + $0xa8] sm:$0xff] }
 0x1cd   :  { %1690 = vst.msk [vmem:[#allocation2 + $0xb0] sm:$0xff] %vm1667_vm0, %v1625_v53  ;;  %v1149_v55 = vadd.f32 %v4878_v22, %v1148_v54  ;;  %v1150_v56 = vpop.f32.mrb[93].mxu0  ;;  %2065 = vrot.lane.b32.xlu1 %v2063_v42, %s4206_s16 }
 0x1ce   :  { %v1151_v57 = vpop.f32.mrb[94].mxu0  ;;  %v2255_v56 = vld [vmem:[#allocation2 + $0x180] sm:$0xff] }
 0x1cf   :  { %v1152_v58 = vadd.f32 %v4878_v22, %v1151_v57  ;;  %v1153_v59 = vpop.f32.mrb[95].mxu0  ;;  %v1912_v60 = vpop.permute.xlu1 %1911  ;;  %v1521_v61 = vmax.f32 %v1149_v55, 0.0  ;;  %v1365_v55 = vadd.f32 %v4878_v22, %v1364_v49  ;;  %2256 = vst.msk [vmem:[#allocation3 + $0xd0] sm:$0xff] %vm1667_vm0, %v2255_v56 }
 0x1d0   :  { %1914 = vst.msk [vmem:[#allocation3 + $0x40] sm:$0xff] %vm1753_vm3, %v1912_v60  ;;  %v1367_v57 = vpop.f32.mrb[22].mxu1 }
 0x1d1   :  { %v1522_v62 = vmax.f32 %v1152_v58, 0.0  ;;  %1865 = vrot.lane.b32.xlu1 %v2063_v42, %s4206_s16  ;;  %v1574_v42 = vmax.f32 %v1360_v38, 0.0  ;;  %v1575_v60 = vmax.f32 %v1365_v55, 0.0 }
 0x1d3   :  { %v1626_v63 = vpack.c.bf16 %v1522_v62, %v1521_v61  ;;  %v1652_v48 = vpack.c.bf16 %v1574_v42, %v1573_v37  ;;  %v1368_v61 = vadd.f32 %v4878_v22, %v1367_v57  ;;  %v1369_v62 = vpop.f32.mrb[23].mxu1 }
 0x1d4   :  { %v1156_v1 = vpop.f32.mrb[96].mxu0  ;;  %v4923_v21 = vld [vmem:[#allocation2 + $0xb0] sm:$0xff] }
 0x1d5   :  { %1691 = vst.msk [vmem:[#allocation2 + $0xb8] sm:$0xff] %vm1667_vm0, %v1626_v63  ;;  %v1157_v3 = vadd.f32 %v4878_v22, %v1156_v1  ;;  %v1158_v4 = vpop.f32.mrb[97].mxu0  ;;  %2071 = vrot.lane.b32.xlu1 %v4910_v2, %s4204_s1  ;;  %1717 = vst.msk [vmem:[#allocation2 + $0x188] sm:$0xff] %vm1667_vm0, %v1652_v48  ;;  %v1576_v1 = vmax.f32 %v1368_v61, 0.0 }
 0x1d6   :  { %v1159_v6 = vpop.f32.mrb[98].mxu0 }
 0x1d7   :  { %v1160_v8 = vadd.f32 %v4878_v22, %v1159_v6  ;;  %v1161_v9 = vpop.f32.mrb[99].mxu0  ;;  %v1523_v13 = vmax.f32 %v1157_v3, 0.0  ;;  %v1653_v7 = vpack.c.bf16 %v1576_v1, %v1575_v60 }
 0x1d9   :  { %v1524_v14 = vmax.f32 %v1160_v8, 0.0  ;;  %2139 = vrot.lane.b32.xlu1 %v4910_v2, %s4205_s30  ;;  %v1372_v8 = vpop.f32.mrb[24].mxu1  ;;  %1718 = vst.msk [vmem:[#allocation2 + $0x190] sm:$0xff] %vm1667_vm0, %v1653_v7 }
 0x1da   :  { %v1374_v10 = vpop.f32.mrb[25].mxu1 }
 0x1db   :  { %v1627_v18 = vpack.c.bf16 %v1524_v14, %v1523_v13  ;;  %v1373_v14 = vadd.f32 %v4878_v22, %v1372_v8  ;;  %v1375_v16 = vpop.f32.mrb[26].mxu1 }
 0x1dc   :  { %v1164_v20 = vpop.f32.mrb[100].mxu0  ;;  %v4933_v33 = vld [vmem:[#allocation2 + $0xb8] sm:$0xff] }
 0x1dd   :  { %1692 = vst.msk [vmem:[#allocation2 + $0xc0] sm:$0xff] %vm1667_vm0, %v1627_v18  ;;  %v1165_v23 = vadd.f32 %v4878_v22, %v1164_v20  ;;  %v1166_v24 = vpop.f32.mrb[101].mxu0  ;;  %2145 = vrot.lane.b32.xlu1 %v4923_v21, %s4206_s16  ;;  %v1577_v19 = vmax.f32 %v1373_v14, 0.0  ;;  %v1376_v20 = vadd.f32 %v4878_v22, %v1375_v16 }
 0x1de   :  { %v1167_v27 = vpop.f32.mrb[102].mxu0 }
 0x1df   :  { %v1168_v29 = vadd.f32 %v4878_v22, %v1167_v27  ;;  %v1169_v30 = vpop.f32.mrb[103].mxu0  ;;  %v1760_v31 = vpop.permute.xlu0 %1759  ;;  %v1525_v35 = vmax.f32 %v1165_v23, 0.0  ;;  %v1578_v26 = vmax.f32 %v1376_v20, 0.0 }
 0x1e0   :  { %1762 = vst.msk [vmem:[#allocation3 + $0x8] sm:$0xff] %vm1739_vm1, %v1760_v31  ;;  %v1377_v23 = vpop.f32.mrb[27].mxu1  ;;  %v4966_v42 = vld [vmem:[#allocation2 + $0x190] sm:$0xff] }
 0x1e1   :  { %v1526_v36 = vmax.f32 %v1168_v29, 0.0  ;;  %2151 = vrot.lane.b32.xlu1 %v4933_v33, %s4204_s1  ;;  %v1654_v31 = vpack.c.bf16 %v1578_v26, %v1577_v19  ;;  %v1380_v32 = vpop.f32.mrb[28].mxu1  ;;  %2336 = vst.msk [vmem:[#allocation3 + $0xf0] sm:$0xff] %vm1667_vm0, %v4966_v42 }
 0x1e3   :  { %v1628_v41 = vpack.c.bf16 %v1526_v36, %v1525_v35  ;;  %v1382_v35 = vpop.f32.mrb[29].mxu1  ;;  %1719 = vst.msk [vmem:[#allocation2 + $0x198] sm:$0xff] %vm1667_vm0, %v1654_v31 }
 0x1e4   :  { %v1172_v43 = vpop.f32.mrb[104].mxu0  ;;  %v1995_v45 = vld [vmem:[#allocation2 + $0xc0] sm:$0xff] }
 0x1e5   :  { %1693 = vst.msk [vmem:[#allocation2 + $0xc8] sm:$0xff] %vm1667_vm0, %v1628_v41  ;;  %v1173_v46 = vadd.f32 %v4878_v22, %v1172_v43  ;;  %v1174_v47 = vpop.f32.mrb[105].mxu0  ;;  %1996 = vst.msk [vmem:[#allocation3 + $0x68] sm:$0xff] %vm1667_vm0, %v1995_v45  ;;  %v1381_v41 = vadd.f32 %v4878_v22, %v1380_v32  ;;  %v2455_v43 = vld [vmem:[#allocation3] sm:$0xff] }
 0x1e6   :  { %1796 = vst.msk [vmem:[#allocation3 + $0x18] sm:$0xff] %vm1667_vm0, %v1995_v45  ;;  %v1175_v50 = vpop.f32.mrb[106].mxu0  ;;  %v1383_v45 = vpop.f32.mrb[30].mxu1 }
 0x1e7   :  { %v1176_v52 = vadd.f32 %v4878_v22, %v1175_v50  ;;  %v1177_v53 = vpop.f32.mrb[107].mxu0  ;;  %v1766_v54 = vpop.permute.xlu1 %1765  ;;  %v1527_v58 = vmax.f32 %v1173_v46, 0.0  ;;  %v1579_v48 = vmax.f32 %v1381_v41, 0.0  ;;  %v1384_v49 = vadd.f32 %v4878_v22, %v1383_v45 }
 0x1e8   :  { %1768 = vst.msk [vmem:[#allocation3 + $0x8] sm:$0xff] %vm1746_vm2, %v1766_v54  ;;  %v1385_v50 = vpop.f32.mrb[31].mxu1 }
 0x1e9   :  { %v1528_v59 = vmax.f32 %v1176_v52, 0.0  ;;  %v1580_v52 = vmax.f32 %v1384_v49, 0.0 }
 0x1eb   :  { %v1629_v63 = vpack.c.bf16 %v1528_v59, %v1527_v58  ;;  %v1655_v57 = vpack.c.bf16 %v1580_v52, %v1579_v48  ;;  %v1388_v58 = vpop.f32.mrb[32].mxu1 }
 0x1ec   :  { %v1180_v3 = vpop.f32.mrb[108].mxu0  ;;  %v1997_v4 = vld [vmem:[#allocation2 + $0xc8] sm:$0xff]  ;;  %v1390_v60 = vpop.f32.mrb[33].mxu1 }
 0x1ed   :  { %1694 = vst.msk [vmem:[#allocation2 + $0xd0] sm:$0xff] %vm1667_vm0, %v1629_v63  ;;  %v1181_v5 = vadd.f32 %v4878_v22, %v1180_v3  ;;  %v1182_v6 = vpop.f32.mrb[109].mxu0  ;;  %1999 = vrot.lane.b32.xlu0 %v1997_v4, %s4205_s30  ;;  %1720 = vst.msk [vmem:[#allocation2 + $0x1a0] sm:$0xff] %vm1667_vm0, %v1655_v57  ;;  %v1391_v1 = vpop.f32.mrb[34].mxu1 }
 0x1ee   :  { %v1183_v9 = vpop.f32.mrb[110].mxu0  ;;  %v1392_v6 = vadd.f32 %v4878_v22, %v1391_v1  ;;  %v1393_v7 = vpop.f32.mrb[35].mxu1 }
 0x1ef   :  { %v1184_v11 = vadd.f32 %v4878_v22, %v1183_v9  ;;  %v1185_v12 = vpop.f32.mrb[111].mxu0  ;;  %v1772_v13 = vpop.permute.xlu0 %1771  ;;  %v1529_v17 = vmax.f32 %v1181_v5, 0.0  ;;  %v1389_v5 = vadd.f32 %v4878_v22, %v1388_v58 }
 0x1f0   :  { %1774 = vst.msk [vmem:[#allocation3 + $0x8] sm:$0xff] %vm1753_vm3, %v1772_v13  ;;  %v1396_v19 = vpop.f32.mrb[36].mxu1 }
 0x1f1   :  { %v1530_v18 = vmax.f32 %v1184_v11, 0.0  ;;  %1799 = vrot.lane.b32.xlu0 %v1997_v4, %s4205_s30  ;;  %v1581_v10 = vmax.f32 %v1389_v5, 0.0  ;;  %v1582_v11 = vmax.f32 %v1392_v6, 0.0  ;;  %v1398_v23 = vpop.f32.mrb[37].mxu1 }
 0x1f2   :  { %v1399_v31 = vpop.f32.mrb[38].mxu1 }
 0x1f3   :  { %v1630_v24 = vpack.c.bf16 %v1530_v18, %v1529_v17  ;;  %v1840_v25 = vpop.permute.xlu0 %1839  ;;  %v1656_v18 = vpack.c.bf16 %v1582_v11, %v1581_v10  ;;  %v1400_v35 = vadd.f32 %v4878_v22, %v1399_v31 }
 0x1f4   :  { %1842 = vst.msk [vmem:[#allocation3 + $0x28] sm:$0xff] %vm1739_vm1, %v1840_v25  ;;  %v1188_v27 = vpop.f32.mrb[112].mxu0  ;;  %v2003_v28 = vld [vmem:[#allocation2 + $0xd0] sm:$0xff] }
 0x1f5   :  { %1695 = vst.msk [vmem:[#allocation2 + $0xd8] sm:$0xff] %vm1667_vm0, %v1630_v24  ;;  %v1189_v29 = vadd.f32 %v4878_v22, %v1188_v27  ;;  %v1190_v30 = vpop.f32.mrb[113].mxu0  ;;  %2005 = vrot.lane.b32.xlu0 %v2003_v28, %s4206_s16  ;;  %2076 = vst.msk [vmem:[#allocation3 + $0x88] sm:$0xff] %vm1667_vm0, %v2003_v28 }
 0x1f6   :  { %1876 = vst.msk [vmem:[#allocation3 + $0x38] sm:$0xff] %vm1667_vm0, %v2003_v28  ;;  %v1191_v34 = vpop.f32.mrb[114].mxu0  ;;  %1721 = vst.msk [vmem:[#allocation2 + $0x1a8] sm:$0xff] %vm1667_vm0, %v1656_v18  ;;  %v1397_v30 = vadd.f32 %v4878_v22, %v1396_v19 }
 0x1f7   :  { %v1192_v36 = vadd.f32 %v4878_v22, %v1191_v34  ;;  %v1193_v37 = vpop.f32.mrb[115].mxu0  ;;  %v1846_v38 = vpop.permute.xlu0 %1845  ;;  %v2456_v40 = vld [vmem:[#allocation3 + $0x8] sm:$0xff]  ;;  %v1531_v46 = vmax.f32 %v1189_v29, 0.0  ;;  %v2459_v29 = vld [vmem:[#allocation3 + $0x20] sm:$0xff] }
 0x1f8   :  { %1848 = vst.msk [vmem:[#allocation3 + $0x28] sm:$0xff] %vm1746_vm2, %v1846_v38  ;;  %2786 = vmatprep.mubr.bf16.mxu1 %v2456_v40  ;;  %v1583_v37 = vmax.f32 %v1397_v30, 0.0  ;;  %v1584_v40 = vmax.f32 %v1400_v35, 0.0 }
 0x1f9   :  { %v1532_v47 = vmax.f32 %v1192_v36, 0.0  ;;  %1805 = vrot.lane.b32.xlu0 %v2003_v28, %s4206_s16  ;;  %2787 = vmatmul.mubr.bf16.vlgmr.msra.gmra.mrb[76].mxu1 %v2455_v43  ;;  %v4990_v28 = vld [vmem:[#allocation2 + $0x1a0] sm:$0xff]  ;;  %v1401_v36 = vpop.f32.mrb[39].mxu1 }
 0x1fa   :  { %2416 = vst.msk [vmem:[#allocation3 + $0x110] sm:$0xff] %vm1667_vm0, %v4990_v28  ;;  %v1404_v43 = vpop.f32.mrb[40].mxu1 }
 0x1fb   :  { %v1631_v51 = vpack.c.bf16 %v1532_v47, %v1531_v46  ;;  %v1657_v47 = vpack.c.bf16 %v1584_v40, %v1583_v37  ;;  %v1405_v48 = vadd.f32 %v4878_v22, %v1404_v43  ;;  %v1406_v49 = vpop.f32.mrb[41].mxu1 }
 0x1fc   :  { %v1196_v53 = vpop.f32.mrb[116].mxu0  ;;  %v2009_v54 = vld [vmem:[#allocation2 + $0xd8] sm:$0xff] }
 0x1fd   :  { %1696 = vst.msk [vmem:[#allocation2 + $0xe0] sm:$0xff] %vm1667_vm0, %v1631_v51  ;;  %v1197_v55 = vadd.f32 %v4878_v22, %v1196_v53  ;;  %v1198_v56 = vpop.f32.mrb[117].mxu0  ;;  %2011 = vrot.lane.b32.xlu0 %v2009_v54, %s4204_s1  ;;  %v1407_v51 = vpop.f32.mrb[42].mxu1  ;;  %1722 = vst.msk [vmem:[#allocation2 + $0x1b0] sm:$0xff] %vm1667_vm0, %v1657_v47 }
 0x1fe   :  { %v1199_v59 = vpop.f32.mrb[118].mxu0  ;;  %v1408_v56 = vadd.f32 %v4878_v22, %v1407_v51  ;;  %v1409_v57 = vpop.f32.mrb[43].mxu1 }
 0x1ff   :  { %v1200_v61 = vadd.f32 %v4878_v22, %v1199_v59  ;;  %v1201_v62 = vpop.f32.mrb[119].mxu0  ;;  %v1852_v63 = vpop.permute.xlu0 %1851  ;;  %v1533_v3 = vmax.f32 %v1197_v55, 0.0  ;;  %v1585_v55 = vmax.f32 %v1405_v48, 0.0 }
 0x200   :  { %1854 = vst.msk [vmem:[#allocation3 + $0x28] sm:$0xff] %vm1753_vm3, %v1852_v63  ;;  %v1586_v60 = vmax.f32 %v1408_v56, 0.0 }
 0x201   :  { %v1534_v4 = vmax.f32 %v1200_v61, 0.0  ;;  %2079 = vrot.lane.b32.xlu0 %v2009_v54, %s4205_s30 }
 0x202   :  { %v1658_v62 = vpack.c.bf16 %v1586_v60, %v1585_v55 }
 0x203   :  { %v1632_v8 = vpack.c.bf16 %v1534_v4, %v1533_v3  ;;  %v1920_v9 = vpop.permute.xlu0 %1919  ;;  %v1412_v3 = vpop.f32.mrb[44].mxu1 }
 0x204   :  { %1922 = vst.msk [vmem:[#allocation3 + $0x48] sm:$0xff] %vm1739_vm1, %v1920_v9  ;;  %v1204_v12 = vpop.f32.mrb[120].mxu0  ;;  %v2083_v13 = vld [vmem:[#allocation2 + $0xe0] sm:$0xff]  ;;  %v1413_v6 = vadd.f32 %v4878_v22, %v1412_v3  ;;  %v1414_v7 = vpop.f32.mrb[45].mxu1 }
 0x205   :  { %v1955_v14 = vld [vmem:[#allocation2 + $0xe0] sm:$0xff]  ;;  %1697 = vst.msk [vmem:[#allocation2 + $0xe8] sm:$0xff] %vm1667_vm0, %v1632_v8  ;;  %v1205_v16 = vadd.f32 %v4878_v22, %v1204_v12  ;;  %v1206_v17 = vpop.f32.mrb[121].mxu0  ;;  %1811 = vrot.lane.b32.xlu0 %v2009_v54, %s4204_s1  ;;  %2156 = vst.msk [vmem:[#allocation3 + $0xa8] sm:$0xff] %vm1667_vm0, %v2083_v13  ;;  %v1415_v9 = vpop.f32.mrb[46].mxu1 }
 0x206   :  { %1956 = vst.msk [vmem:[#allocation3 + $0x58] sm:$0xff] %vm1667_vm0, %v1955_v14  ;;  %v1207_v20 = vpop.f32.mrb[122].mxu0  ;;  %1723 = vst.msk [vmem:[#allocation2 + $0x1b8] sm:$0xff] %vm1667_vm0, %v1658_v62  ;;  %v1416_v14 = vadd.f32 %v4878_v22, %v1415_v9  ;;  %v2463_v17 = vld [vmem:[#allocation3 + $0x40] sm:$0xff] }
 0x207   :  { %v1208_v24 = vadd.f32 %v4878_v22, %v1207_v20  ;;  %v1209_v25 = vpop.f32.mrb[123].mxu0  ;;  %v1926_v26 = vpop.permute.xlu0 %1925  ;;  %v2460_v27 = vld [vmem:[#allocation3 + $0x28] sm:$0xff]  ;;  %v1535_v32 = vmax.f32 %v1205_v16, 0.0 }
 0x208   :  { %1928 = vst.msk [vmem:[#allocation3 + $0x48] sm:$0xff] %vm1746_vm2, %v1926_v26  ;;  %2794 = vmatprep.mubr.bf16.mxu1 %v2460_v27  ;;  %v1417_v16 = vpop.f32.mrb[47].mxu1  ;;  %v1588_v20 = vmax.f32 %v1416_v14, 0.0 }
 0x209   :  { %v1536_v34 = vmax.f32 %v1208_v24, 0.0  ;;  %1879 = vrot.lane.b32.xlu0 %v2009_v54, %s4205_s30  ;;  %2795 = vmatmul.mubr.bf16.gmra.mrb[80].mxu1 %v2459_v29  ;;  %v1420_v27 = vpop.f32.mrb[48].mxu1 }
 0x20a   :  { %v1421_v31 = vadd.f32 %v4878_v22, %v1420_v27 }
 0x20b   :  { %v1633_v38 = vpack.c.bf16 %v1536_v34, %v1535_v32  ;;  %v1422_v32 = vpop.f32.mrb[49].mxu1 }
 0x20c   :  { %v1212_v41 = vpop.f32.mrb[124].mxu0  ;;  %v5007_v1 = vld [vmem:[#allocation2 + $0xe8] sm:$0xff]  ;;  %v1423_v35 = vpop.f32.mrb[50].mxu1  ;;  %v1589_v40 = vmax.f32 %v1421_v31, 0.0 }
 0x20d   :  { %1698 = vst.msk [vmem:[#allocation2 + $0xf0] sm:$0xff] %vm1667_vm0, %v1633_v38  ;;  %v1213_v45 = vadd.f32 %v4878_v22, %v1212_v41  ;;  %v1214_v46 = vpop.f32.mrb[125].mxu0  ;;  %2085 = vrot.lane.b32.xlu0 %v2083_v13, %s4206_s16  ;;  %v1424_v41 = vadd.f32 %v4878_v22, %v1423_v35 }
 0x20e   :  { %v1215_v50 = vpop.f32.mrb[126].mxu0 }
 0x20f   :  { %v1216_v52 = vadd.f32 %v4878_v22, %v1215_v50  ;;  %v1217_v53 = vpop.f32.mrb[127].mxu0  ;;  %v1932_v54 = vpop.permute.xlu0 %1931  ;;  %v1537_v58 = vmax.f32 %v1213_v45, 0.0  ;;  %v1590_v48 = vmax.f32 %v1424_v41, 0.0 }
 0x210   :  { %1934 = vst.msk [vmem:[#allocation3 + $0x48] sm:$0xff] %vm1753_vm3, %v1932_v54  ;;  %v1425_v45 = vpop.f32.mrb[51].mxu1 }
 0x211   :  { %v1538_v59 = vmax.f32 %v1216_v52, 0.0  ;;  %1885 = vrot.lane.b32.xlu0 %v2083_v13, %s4206_s16  ;;  %v1587_v13 = vmax.f32 %v1413_v6, 0.0  ;;  %v1428_v49 = vpop.f32.mrb[52].mxu1  ;;  %v1660_v54 = vpack.c.bf16 %v1590_v48, %v1589_v40 }
 0x212   :  { %v1429_v50 = vadd.f32 %v4878_v22, %v1428_v49  ;;  %v1430_v51 = vpop.f32.mrb[53].mxu1 }
 0x213   :  { %v1634_v61 = vpack.c.bf16 %v1538_v59, %v1537_v58  ;;  %v1659_v24 = vpack.c.bf16 %v1588_v20, %v1587_v13  ;;  %1725 = vst.msk [vmem:[#allocation2 + $0x1c8] sm:$0xff] %vm1667_vm0, %v1660_v54  ;;  %v1431_v59 = vpop.f32.mrb[54].mxu1 }
 0x214   :  { %v1220_v63 = vpop.f32.mrb[128].mxu0  ;;  %v5019_v26 = vld [vmem:[#allocation2 + $0xf0] sm:$0xff]  ;;  %v1432_v62 = vadd.f32 %v4878_v22, %v1431_v59 }
 0x215   :  { %1699 = vst.msk [vmem:[#allocation2 + $0xf8] sm:$0xff] %vm1667_vm0, %v1634_v61  ;;  %v1221_v4 = vadd.f32 %v4878_v22, %v1220_v63  ;;  %v1222_v5 = vpop.f32.mrb[129].mxu0  ;;  %2091 = vrot.lane.b32.xlu0 %v5007_v1, %s4204_s1  ;;  %1724 = vst.msk [vmem:[#allocation2 + $0x1c0] sm:$0xff] %vm1667_vm0, %v1659_v24  ;;  %v1591_v61 = vmax.f32 %v1429_v50, 0.0  ;;  %v1433_v63 = vpop.f32.mrb[55].mxu1 }
 0x216   :  { %v1223_v8 = vpop.f32.mrb[130].mxu0  ;;  %v1592_v7 = vmax.f32 %v1432_v62, 0.0 }
 0x217   :  { %v1224_v10 = vadd.f32 %v4878_v22, %v1223_v8  ;;  %v1225_v11 = vpop.f32.mrb[131].mxu0  ;;  %v2464_v12 = vld [vmem:[#allocation3 + $0x48] sm:$0xff]  ;;  %v1539_v18 = vmax.f32 %v1221_v4, 0.0 }
 0x218   :  { %2802 = vmatprep.mubr.bf16.mxu1 %v2464_v12  ;;  %v1661_v11 = vpack.c.bf16 %v1592_v7, %v1591_v61 }
 0x219   :  { %v1540_v19 = vmax.f32 %v1224_v10, 0.0  ;;  %2159 = vrot.lane.b32.xlu0 %v5007_v1, %s4205_s30  ;;  %2803 = vmatmul.mubr.bf16.gmra.mrb[84].mxu1 %v2463_v17  ;;  %v1436_v10 = vpop.f32.mrb[56].mxu1 }
 0x21a   :  { %v1437_v12 = vadd.f32 %v4878_v22, %v1436_v10  ;;  %v1438_v13 = vpop.f32.mrb[57].mxu1  ;;  %1726 = vst.msk [vmem:[#allocation2 + $0x1d0] sm:$0xff] %vm1667_vm0, %v1661_v11 }
 0x21b   :  { %v1635_v23 = vpack.c.bf16 %v1540_v19, %v1539_v18 }
 0x21c   :  { %v1228_v25 = vpop.f32.mrb[132].mxu0  ;;  %v5030_v43 = vld [vmem:[#allocation2 + $0xf8] sm:$0xff]  ;;  %v2275_v6 = vld [vmem:[#allocation2 + $0x1c0] sm:$0xff] }
 0x21d   :  { %1700 = vst.msk [vmem:[#allocation2 + $0x100] sm:$0xff] %vm1667_vm0, %v1635_v23  ;;  %v1229_v29 = vadd.f32 %v4878_v22, %v1228_v25  ;;  %v1230_v30 = vpop.f32.mrb[133].mxu0  ;;  %2165 = vrot.lane.b32.xlu0 %v5019_v26, %s4206_s16  ;;  %2276 = vst.msk [vmem:[#allocation3 + $0xd8] sm:$0xff] %vm1667_vm0, %v2275_v6  ;;  %v1439_v23 = vpop.f32.mrb[58].mxu1  ;;  %v1593_v25 = vmax.f32 %v1437_v12, 0.0 }
 0x21e   :  { %v1231_v34 = vpop.f32.mrb[134].mxu0  ;;  %v1440_v27 = vadd.f32 %v4878_v22, %v1439_v23 }
 0x21f   :  { %v1232_v36 = vadd.f32 %v4878_v22, %v1231_v34  ;;  %v1233_v37 = vpop.f32.mrb[135].mxu0  ;;  %v1980_v38 = vpop.permute.xlu1 %1979  ;;  %v1541_v46 = vmax.f32 %v1229_v29, 0.0 }
 0x220   :  { %1982 = vst.msk [vmem:[#allocation3 + $0x60] sm:$0xff] %vm1739_vm1, %v1980_v38  ;;  %v1441_v29 = vpop.f32.mrb[59].mxu1  ;;  %v1594_v34 = vmax.f32 %v1440_v27, 0.0 }
 0x221   :  { %v1542_v47 = vmax.f32 %v1232_v36, 0.0  ;;  %2171 = vrot.lane.b32.xlu0 %v5030_v43, %s4204_s1  ;;  %v5071_v59 = vld [vmem:[#allocation2 + $0x1d0] sm:$0xff] }
 0x222   :  { %v1662_v37 = vpack.c.bf16 %v1594_v34, %v1593_v25  ;;  %2356 = vst.msk [vmem:[#allocation3 + $0xf8] sm:$0xff] %vm1667_vm0, %v5071_v59 }
 0x223   :  { %v1636_v52 = vpack.c.bf16 %v1542_v47, %v1541_v46  ;;  %v1780_v53 = vpop.permute.xlu1 %1779  ;;  %v1444_v46 = vpop.f32.mrb[60].mxu1 }
 0x224   :  { %1782 = vst.msk [vmem:[#allocation3 + $0x10] sm:$0xff] %vm1739_vm1, %v1780_v53  ;;  %v1236_v55 = vpop.f32.mrb[136].mxu0  ;;  %v2215_v56 = vld [vmem:[#allocation2 + $0x100] sm:$0xff]  ;;  %v1445_v50 = vadd.f32 %v4878_v22, %v1444_v46  ;;  %v1446_v51 = vpop.f32.mrb[61].mxu1 }
 0x225   :  { %1701 = vst.msk [vmem:[#allocation2 + $0x108] sm:$0xff] %vm1667_vm0, %v1636_v52  ;;  %v1237_v57 = vadd.f32 %v4878_v22, %v1236_v55  ;;  %v1238_v58 = vpop.f32.mrb[137].mxu0  ;;  %2216 = vst.msk [vmem:[#allocation3 + $0xc0] sm:$0xff] %vm1667_vm0, %v2215_v56  ;;  %v1447_v53 = vpop.f32.mrb[62].mxu1 }
 0x226   :  { %2016 = vst.msk [vmem:[#allocation3 + $0x70] sm:$0xff] %vm1667_vm0, %v2215_v56  ;;  %v1239_v60 = vpop.f32.mrb[138].mxu0  ;;  %1727 = vst.msk [vmem:[#allocation2 + $0x1d8] sm:$0xff] %vm1667_vm0, %v1662_v37  ;;  %v1448_v58 = vadd.f32 %v4878_v22, %v1447_v53 }
 0x227   :  { %v1240_v3 = vadd.f32 %v4878_v22, %v1239_v60  ;;  %v1241_v4 = vpop.f32.mrb[139].mxu0  ;;  %v1986_v5 = vpop.permute.xlu1 %1985  ;;  %v1543_v8 = vmax.f32 %v1237_v57, 0.0  ;;  %v1595_v57 = vmax.f32 %v1445_v50, 0.0 }
 0x228   :  { %1988 = vst.msk [vmem:[#allocation3 + $0x60] sm:$0xff] %vm1746_vm2, %v1986_v5  ;;  %v1449_v60 = vpop.f32.mrb[63].mxu1  ;;  %v1596_v63 = vmax.f32 %v1448_v58, 0.0 }
 0x229   :  { %v1544_v9 = vmax.f32 %v1240_v3, 0.0  ;;  %v1452_v3 = vpop.f32.mrb[64].mxu1 }
 0x22a   :  { %v1453_v4 = vadd.f32 %v4878_v22, %v1452_v3  ;;  %v1454_v5 = vpop.f32.mrb[65].mxu1 }
 0x22b   :  { %v1637_v14 = vpack.c.bf16 %v1544_v9, %v1543_v8  ;;  %v1786_v16 = vpop.permute.xlu1 %1785  ;;  %v1663_v8 = vpack.c.bf16 %v1596_v63, %v1595_v57  ;;  %v1455_v13 = vpop.f32.mrb[66].mxu1 }
 0x22c   :  { %1788 = vst.msk [vmem:[#allocation3 + $0x10] sm:$0xff] %vm1746_vm2, %v1786_v16  ;;  %v1244_v17 = vpop.f32.mrb[140].mxu0  ;;  %v5047_v18 = vld [vmem:[#allocation2 + $0x108] sm:$0xff]  ;;  %v1597_v16 = vmax.f32 %v1453_v4, 0.0 }
 0x22d   :  { %1702 = vst.msk [vmem:[#allocation2 + $0x110] sm:$0xff] %vm1667_vm0, %v1637_v14  ;;  %v1245_v19 = vadd.f32 %v4878_v22, %v1244_v17  ;;  %v1246_v20 = vpop.f32.mrb[141].mxu0  ;;  %2219 = vrot.lane.b32.xlu1 %v5047_v18, %s4205_s30  ;;  %1728 = vst.msk [vmem:[#allocation2 + $0x1e0] sm:$0xff] %vm1667_vm0, %v1663_v8  ;;  %v1456_v17 = vadd.f32 %v4878_v22, %v1455_v13 }
 0x22e   :  { %v1247_v24 = vpop.f32.mrb[142].mxu0 }
 0x22f   :  { %v1248_v30 = vadd.f32 %v4878_v22, %v1247_v24  ;;  %v1249_v31 = vpop.f32.mrb[143].mxu0  ;;  %v1992_v32 = vpop.permute.xlu1 %1991  ;;  %v1545_v35 = vmax.f32 %v1245_v19, 0.0  ;;  %v1598_v25 = vmax.f32 %v1456_v17, 0.0 }
 0x230   :  { %1994 = vst.msk [vmem:[#allocation3 + $0x60] sm:$0xff] %vm1753_vm3, %v1992_v32  ;;  %v1457_v19 = vpop.f32.mrb[67].mxu1 }
 0x231   :  { %v1546_v36 = vmax.f32 %v1248_v30, 0.0  ;;  %v1664_v30 = vpack.c.bf16 %v1598_v25, %v1597_v16  ;;  %v4150_v25 = vld [vmem:[%s5596_s3 + $0x80] sm:$0xff]  }
 0x233   :  { %v1638_v38 = vpack.c.bf16 %v1546_v36, %v1545_v35  ;;  %v2060_v40 = vpop.permute.xlu1 %2059  ;;  %1729 = vst.msk [vmem:[#allocation2 + $0x1e8] sm:$0xff] %vm1667_vm0, %v1664_v30  ;;  %v1460_v36 = vpop.f32.mrb[68].mxu1 }
 0x234   :  { %2062 = vst.msk [vmem:[#allocation3 + $0x80] sm:$0xff] %vm1739_vm1, %v2060_v40  ;;  %v1252_v41 = vpop.f32.mrb[144].mxu0  ;;  %v5058_v45 = vld [vmem:[#allocation2 + $0x110] sm:$0xff]  ;;  %v1462_v46 = vpop.f32.mrb[69].mxu1 }
 0x235   :  { %v2095_v47 = vld [vmem:[#allocation2 + $0x110] sm:$0xff]  ;;  %1703 = vst.msk [vmem:[#allocation2 + $0x118] sm:$0xff] %vm1667_vm0, %v1638_v38  ;;  %v1253_v48 = vadd.f32 %v4878_v22, %v1252_v41  ;;  %v1254_v49 = vpop.f32.mrb[145].mxu0  ;;  %2225 = vrot.lane.b32.xlu1 %v5058_v45, %s4206_s16  ;;  %2296 = vst.msk [vmem:[#allocation3 + $0xe0] sm:$0xff] %vm1667_vm0, %v5058_v45  ;;  %v1461_v41 = vadd.f32 %v4878_v22, %v1460_v36 }
 0x236   :  { %2096 = vst.msk [vmem:[#allocation3 + $0x90] sm:$0xff] %vm1667_vm0, %v2095_v47  ;;  %v1255_v52 = vpop.f32.mrb[146].mxu0 }
 0x237   :  { %v1256_v54 = vadd.f32 %v4878_v22, %v1255_v52  ;;  %v1257_v55 = vpop.f32.mrb[147].mxu0  ;;  %v1792_v56 = vpop.permute.xlu1 %1791  ;;  %v1547_v61 = vmax.f32 %v1253_v48, 0.0  ;;  %v1599_v52 = vmax.f32 %v1461_v41, 0.0 }
 0x238   :  { %1794 = vst.msk [vmem:[#allocation3 + $0x10] sm:$0xff] %vm1753_vm3, %v1792_v56  ;;  %v1463_v48 = vpop.f32.mrb[70].mxu1 }
 0x239   :  { %v1548_v62 = vmax.f32 %v1256_v54, 0.0  ;;  %v1464_v53 = vadd.f32 %v4878_v22, %v1463_v48  ;;  %v5104_v54 = vld [vmem:[#allocation2 + $0x1e0] sm:$0xff]  ;;  %v1465_v55 = vpop.f32.mrb[71].mxu1 }
 0x23a   :  { %2436 = vst.msk [vmem:[#allocation3 + $0x118] sm:$0xff] %vm1667_vm0, %v5104_v54  ;;  %v1468_v60 = vpop.f32.mrb[72].mxu1 }
 0x23b   :  { %v1639_v6 = vpack.c.bf16 %v1548_v62, %v1547_v61  ;;  %v1860_v7 = vpop.permute.xlu1 %1859  ;;  %v1600_v58 = vmax.f32 %v1464_v53, 0.0  ;;  %v1469_v61 = vadd.f32 %v4878_v22, %v1468_v60  ;;  %v1470_v62 = vpop.f32.mrb[73].mxu1 }
 0x23c   :  { %1862 = vst.msk [vmem:[#allocation3 + $0x30] sm:$0xff] %vm1739_vm1, %v1860_v7  ;;  %v1260_v9 = vpop.f32.mrb[148].mxu0  ;;  %v5078_v10 = vld [vmem:[#allocation2 + $0x118] sm:$0xff]  ;;  %v1471_v5 = vpop.f32.mrb[74].mxu1 }
 0x23d   :  { %1704 = vst.msk [vmem:[#allocation2 + $0x120] sm:$0xff] %vm1667_vm0, %v1639_v6  ;;  %v1261_v11 = vadd.f32 %v4878_v22, %v1260_v9  ;;  %v1262_v12 = vpop.f32.mrb[149].mxu0  ;;  %2231 = vrot.lane.b32.xlu1 %v5078_v10, %s4204_s1  ;;  %v1665_v4 = vpack.c.bf16 %v1600_v58, %v1599_v52  ;;  %v1601_v8 = vmax.f32 %v1469_v61, 0.0  ;;  %v1472_v9 = vadd.f32 %v4878_v22, %v1471_v5  ;;  %v4153_v61 = vld [vmem:[%s5596_s3 + $0xd0] sm:$0xff]  }
 0x23e   :  { %v1263_v14 = vpop.f32.mrb[150].mxu0  ;;  %v4149_v12 = vld [vmem:[%s5596_s3 + $0xc0] sm:$0xff]   ;;  %v4154_v5 = vld [vmem:[%s5596_s3 + $0x90] sm:$0xff]  }
 0x23f   :  { %v1264_v20 = vadd.f32 %v4878_v22, %v1263_v14  ;;  %v1265_v23 = vpop.f32.mrb[151].mxu0  ;;  %v2066_v24 = vpop.permute.xlu1 %2065  ;;  %v1549_v27 = vmax.f32 %v1261_v11, 0.0  ;;  %1730 = vst.msk [vmem:[#allocation2 + $0x1f0] sm:$0xff] %vm1667_vm0, %v1665_v4  ;;  %v1602_v17 = vmax.f32 %v1472_v9, 0.0  ;;  %3756 = vmatprep.subr.bf16.mxu1 %v4149_v12 }
 0x240   :  { %2068 = vst.msk [vmem:[#allocation3 + $0x80] sm:$0xff] %vm1746_vm2, %v2066_v24  ;;  %v1473_v11 = vpop.f32.mrb[75].mxu1  ;;  %3757 = vmatpush3.bf16.msra.mxu1 %v4150_v25 }
 0x241   :  { %v1550_v29 = vmax.f32 %v1264_v20, 0.0  ;;  %2299 = vrot.lane.b32.xlu1 %v5078_v10, %s4205_s30  ;;  %v1666_v24 = vpack.c.bf16 %v1602_v17, %v1601_v8  ;;  %v4155_v17 = vld [vmem:[%s5596_s3 + $0xd8] sm:$0xff]  }
 0x243   :  { %v1640_v31 = vpack.c.bf16 %v1550_v29, %v1549_v27  ;;  %v1866_v32 = vpop.permute.xlu1 %1865  ;;  %1731 = vst.msk [vmem:[#allocation2 + $0x1f8] sm:$0xff] %vm1667_vm0, %v1666_v24 }
 0x244   :  { %1868 = vst.msk [vmem:[#allocation3 + $0x30] sm:$0xff] %vm1746_vm2, %v1866_v32  ;;  %v1268_v34 = vpop.f32.mrb[152].mxu0  ;;  %v5091_v35 = vld [vmem:[#allocation2 + $0x120] sm:$0xff] }
 0x245   :  { %v2175_v37 = vld [vmem:[#allocation2 + $0x120] sm:$0xff]  ;;  %1705 = vst.msk [vmem:[#allocation2 + $0x128] sm:$0xff] %vm1667_vm0, %v1640_v31  ;;  %v1269_v38 = vadd.f32 %v4878_v22, %v1268_v34  ;;  %v1270_v40 = vpop.f32.mrb[153].mxu0  ;;  %2305 = vrot.lane.b32.xlu1 %v5091_v35, %s4206_s16  ;;  %2376 = vst.msk [vmem:[#allocation3 + $0x100] sm:$0xff] %vm1667_vm0, %v5091_v35 }
 0x246   :  { %2176 = vst.msk [vmem:[#allocation3 + $0xb0] sm:$0xff] %vm1667_vm0, %v2175_v37  ;;  %v1271_v47 = vpop.f32.mrb[154].mxu0  ;;  %v5137_v34 = vld [vmem:[%s5595_s2] ss:$0 sm:$0xff]  ;;  %v4152_v40 = vld [vmem:[%s5596_s3 + $0x88] sm:$0xff]  }
 0x247   :  { %v1272_v49 = vadd.f32 %v4878_v22, %v1271_v47  ;;  %v1273_v50 = vpop.f32.mrb[155].mxu0  ;;  %v2072_v51 = vpop.permute.xlu1 %2071  ;;  %v1551_v56 = vmax.f32 %v1269_v38, 0.0  ;;  %v4151_v38 = vld [vmem:[%s5596_s3 + $0xc8] sm:$0xff]  }
 0x248   :  { %2074 = vst.msk [vmem:[#allocation3 + $0x80] sm:$0xff] %vm1753_vm3, %v2072_v51  ;;  %3758 = vmatprep.subr.bf16.mxu1 %v4151_v38 }
 0x249   :  { %v1552_v57 = vmax.f32 %v1272_v49, 0.0  ;;  %3759 = vmatpush3.bf16.msra.mxu1 %v4152_v40 }
 0x24a   :  { %3760 = vmatprep.subr.bf16.mxu1 %v4153_v61 }
 0x24b   :  { %v1641_v63 = vpack.c.bf16 %v1552_v57, %v1551_v56  ;;  %v2140_v3 = vpop.permute.xlu1 %2139 }
 0x24c   :  { %2142 = vst.msk [vmem:[#allocation3 + $0xa0] sm:$0xff] %vm1739_vm1, %v2140_v3  ;;  %v1276_v6 = vpop.f32.mrb[156].mxu0  ;;  %v5111_v7 = vld [vmem:[#allocation2 + $0x128] sm:$0xff] }
 0x24d   :  { %1706 = vst.msk [vmem:[#allocation2 + $0x130] sm:$0xff] %vm1667_vm0, %v1641_v63  ;;  %v1277_v13 = vadd.f32 %v4878_v22, %v1276_v6  ;;  %v1278_v14 = vpop.f32.mrb[157].mxu0  ;;  %2311 = vrot.lane.b32.xlu1 %v5111_v7, %s4204_s1  ;;  %3761 = vmatpush3.bf16.msra.mxu1 %v4154_v5 }
 0x24e   :  { %v1279_v16 = vpop.f32.mrb[158].mxu0  ;;  %3762 = vmatprep.subr.bf16.mxu1 %v4155_v17 }
 0x24f   :  { %v1280_v19 = vadd.f32 %v4878_v22, %v1279_v16  ;;  %v1281_v20 = vpop.f32.mrb[159].mxu0  ;;  %v2146_v23 = vpop.permute.xlu1 %2145  ;;  %v1553_v27 = vmax.f32 %v1277_v13, 0.0 }
 0x250   :  { %2148 = vst.msk [vmem:[#allocation3 + $0xa0] sm:$0xff] %vm1746_vm2, %v2146_v23 }
 0x251   :  { %v1554_v29 = vmax.f32 %v1280_v19, 0.0  ;;  %2379 = vrot.lane.b32.xlu1 %v5111_v7, %s4205_s30 }
 0x253   :  { %v1642_v30 = vpack.c.bf16 %v1554_v29, %v1553_v27  ;;  %v2152_v31 = vpop.permute.xlu1 %2151 }
 0x254   :  { %2154 = vst.msk [vmem:[#allocation3 + $0xa0] sm:$0xff] %vm1753_vm3, %v2152_v31  ;;  %v1284_v22 = vpop.f32.mrb[160].mxu0  ;;  %v5131_v32 = vld [vmem:[#allocation2 + $0x130] sm:$0xff] }
 0x255   :  { %1707 = vst.msk [vmem:[#allocation2 + $0x138] sm:$0xff] %vm1667_vm0, %v1642_v30  ;;  %v1285_v36 = vadd.f32 %v5137_v34, %v1284_v22  ;;  %v1286_v37 = vpop.f32.mrb[161].mxu0  ;;  %2385 = vrot.lane.b32.xlu1 %v5131_v32, %s4206_s16 }
 0x256   :  { %v1287_v41 = vpop.f32.mrb[162].mxu0 }
 0x257   :  { %v1288_v46 = vadd.f32 %v5137_v34, %v1287_v41  ;;  %v1289_v47 = vpop.f32.mrb[163].mxu0  ;;  %v1555_v48 = vmax.f32 %v1285_v36, 0.0 }
 0x259   :  { %v1556_v49 = vmax.f32 %v1288_v46, 0.0  ;;  %v4158_v46 = vld [vmem:[%s5596_s3 + $0xa0] sm:$0xff]  }
 0x25b   :  { %v1643_v50 = vpack.c.bf16 %v1556_v49, %v1555_v48 }
 0x25c   :  { %v1292_v51 = vpop.f32.mrb[164].mxu0  ;;  %v5149_v52 = vld [vmem:[#allocation2 + $0x138] sm:$0xff] }
 0x25d   :  { %1708 = vst.msk [vmem:[#allocation2 + $0x140] sm:$0xff] %vm1667_vm0, %v1643_v50  ;;  %v1293_v53 = vadd.f32 %v5137_v34, %v1292_v51  ;;  %v1294_v55 = vpop.f32.mrb[165].mxu0  ;;  %2391 = vrot.lane.b32.xlu1 %v5149_v52, %s4204_s1 }
 0x25e   :  { %v1295_v56 = vpop.f32.mrb[166].mxu0 }
 0x25f   :  { %v1296_v57 = vadd.f32 %v5137_v34, %v1295_v56  ;;  %v1297_v58 = vpop.f32.mrb[167].mxu0  ;;  %v2000_v60 = vpop.permute.xlu0 %1999  ;;  %v1557_v62 = vmax.f32 %v1293_v53, 0.0 }
 0x260   :  { %2002 = vst.msk [vmem:[#allocation3 + $0x68] sm:$0xff] %vm1739_vm1, %v2000_v60  ;;  %v4159_v60 = vld [vmem:[%s5596_s3 + $0xe8] sm:$0xff]  }
 0x261   :  { %v1558_v63 = vmax.f32 %v1296_v57, 0.0  ;;  %1871 = vrot.lane.b32.xlu1 %v4910_v2, %s4204_s1 }
 0x263   :  { %v1644_v3 = vpack.c.bf16 %v1558_v63, %v1557_v62  ;;  %v1800_v4 = vpop.permute.xlu0 %1799 }
 0x264   :  { %1802 = vst.msk [vmem:[#allocation3 + $0x18] sm:$0xff] %vm1739_vm1, %v1800_v4  ;;  %v1300_v6 = vpop.f32.mrb[168].mxu0  ;;  %v2235_v8 = vld [vmem:[#allocation2 + $0x140] sm:$0xff]  ;;  %v4161_v4 = vld [vmem:[%s5596_s3 + $0xf0] sm:$0xff]  }
 0x265   :  { %1709 = vst.msk [vmem:[#allocation2 + $0x148] sm:$0xff] %vm1667_vm0, %v1644_v3  ;;  %v1301_v9 = vadd.f32 %v5137_v34, %v1300_v6  ;;  %v1302_v11 = vpop.f32.mrb[169].mxu0  ;;  %1939 = vrot.lane.b32.xlu1 %v4910_v2, %s4205_s30  ;;  %2236 = vst.msk [vmem:[#allocation3 + $0xc8] sm:$0xff] %vm1667_vm0, %v2235_v8  ;;  %v4156_v2 = vld [vmem:[%s5596_s3 + $0x98] sm:$0xff]  }
 0x266   :  { %2036 = vst.msk [vmem:[#allocation3 + $0x78] sm:$0xff] %vm1667_vm0, %v2235_v8  ;;  %v1303_v12 = vpop.f32.mrb[170].mxu0  ;;  %3763 = vmatpush3.bf16.msra.mxu1 %v4156_v2  ;;  %v2429_v2 = vld [vmem:[#allocation2 + $0x1b8] sm:$0xff] }
 0x267   :  { %v1304_v13 = vadd.f32 %v5137_v34, %v1303_v12  ;;  %v1305_v14 = vpop.f32.mrb[171].mxu0  ;;  %v2006_v16 = vpop.permute.xlu0 %2005  ;;  %v1559_v19 = vmax.f32 %v1301_v9, 0.0  ;;  %v2471_v9 = vld [vmem:[#allocation3 + $0x80] sm:$0xff] }
 0x268   :  { %2008 = vst.msk [vmem:[#allocation3 + $0x68] sm:$0xff] %vm1746_vm2, %v2006_v16  ;;  %v2423_v16 = vld [vmem:[#allocation2 + $0x1b0] sm:$0xff] }
 0x269   :  { %v1560_v20 = vmax.f32 %v1304_v13, 0.0  ;;  %1945 = vrot.lane.b32.xlu1 %v4923_v21, %s4206_s16  ;;  %v2129_v13 = vld [vmem:[#allocation2 + $0x168] sm:$0xff] }
 0x26b   :  { %v1645_v23 = vpack.c.bf16 %v1560_v20, %v1559_v19  ;;  %v1806_v24 = vpop.permute.xlu0 %1805  ;;  %v2209_v20 = vld [vmem:[#allocation2 + $0x178] sm:$0xff] }
 0x26c   :  { %1808 = vst.msk [vmem:[#allocation3 + $0x18] sm:$0xff] %vm1746_vm2, %v1806_v24  ;;  %v1308_v25 = vpop.f32.mrb[172].mxu0  ;;  %v5183_v27 = vld [vmem:[#allocation2 + $0x148] sm:$0xff] }
 0x26d   :  { %1710 = vst.msk [vmem:[#allocation2 + $0x150] sm:$0xff] %vm1667_vm0, %v1645_v23  ;;  %v1309_v29 = vadd.f32 %v5137_v34, %v1308_v25  ;;  %v1310_v30 = vpop.f32.mrb[173].mxu0  ;;  %1951 = vrot.lane.b32.xlu1 %v4933_v33, %s4204_s1  ;;  %2239 = vrot.lane.b32.xlu0 %v5183_v27, %s4205_s30  ;;  %v4157_v33 = vld [vmem:[%s5596_s3 + $0xe0] sm:$0xff]   ;;  %v2277_v23 = vld [vmem:[#allocation2 + $0x1c8] sm:$0xff] }
 0x26e   :  { %v1311_v21 = vpop.f32.mrb[174].mxu0  ;;  %3764 = vmatprep.subr.bf16.mxu1 %v4157_v33  ;;  %v2449_v33 = vld [vmem:[#allocation2 + $0x1f8] sm:$0xff] }
 0x26f   :  { %v1312_v31 = vadd.f32 %v5137_v34, %v1311_v21  ;;  %v1313_v22 = vpop.f32.mrb[175].mxu0  ;;  %v2012_v36 = vpop.permute.xlu0 %2011  ;;  %v1561_v37 = vmax.f32 %v1309_v29, 0.0  ;;  %3765 = vmatpush3.bf16.msra.mxu1 %v4158_v46 }
 0x270   :  { %2014 = vst.msk [vmem:[#allocation3 + $0x68] sm:$0xff] %vm1753_vm3, %v2012_v36  ;;  %3766 = vmatprep.subr.bf16.mxu1 %v4159_v60 }
 0x271   :  { %v1562_v38 = vmax.f32 %v1312_v31, 0.0  ;;  %2019 = vrot.lane.b32.xlu1 %v5047_v18, %s4205_s30 }
 0x273   :  { %v1646_v40 = vpack.c.bf16 %v1562_v38, %v1561_v37  ;;  %v2080_v41 = vpop.permute.xlu0 %2079  ;;  %v2369_v38 = vld [vmem:[#allocation2 + $0x1e8] sm:$0xff] }
 0x274   :  { %2082 = vst.msk [vmem:[#allocation3 + $0x88] sm:$0xff] %vm1739_vm1, %v2080_v41  ;;  %v1316_v47 = vpop.f32.mrb[176].mxu0  ;;  %v5202_v48 = vld [vmem:[#allocation2 + $0x150] sm:$0xff] }
 0x275   :  { %1711 = vst.msk [vmem:[#allocation2 + $0x158] sm:$0xff] %vm1667_vm0, %v1646_v40  ;;  %v1317_v49 = vadd.f32 %v5137_v34, %v1316_v47  ;;  %v1318_v18 = vpop.f32.mrb[177].mxu0  ;;  %2025 = vrot.lane.b32.xlu1 %v5058_v45, %s4206_s16  ;;  %2245 = vrot.lane.b32.xlu0 %v5202_v48, %s4206_s16  ;;  %2316 = vst.msk [vmem:[#allocation3 + $0xe8] sm:$0xff] %vm1667_vm0, %v5202_v48  ;;  %v2467_v45 = vld [vmem:[#allocation3 + $0x60] sm:$0xff]  ;;  %v2443_v41 = vld [vmem:[#allocation2 + $0x1f0] sm:$0xff] }
 0x276   :  { %2116 = vst.msk [vmem:[#allocation3 + $0x98] sm:$0xff] %vm1667_vm0, %v5202_v48  ;;  %v1319_v50 = vpop.f32.mrb[178].mxu0 }
 0x277   :  { %v1320_v51 = vadd.f32 %v5137_v34, %v1319_v50  ;;  %v1321_v53 = vpop.f32.mrb[179].mxu0  ;;  %v1812_v55 = vpop.permute.xlu0 %1811  ;;  %v2468_v56 = vld [vmem:[#allocation3 + $0x68] sm:$0xff]  ;;  %v1563_v57 = vmax.f32 %v1317_v49, 0.0 }
 0x278   :  { %1814 = vst.msk [vmem:[#allocation3 + $0x18] sm:$0xff] %vm1753_vm3, %v1812_v55  ;;  %2810 = vmatprep.mubr.bf16.mxu1 %v2468_v56  ;;  %v4160_v34 = vld [vmem:[%s5596_s3 + $0xa8] sm:$0xff]  }
 0x279   :  { %v1564_v58 = vmax.f32 %v1320_v51, 0.0  ;;  %2031 = vrot.lane.b32.xlu1 %v5078_v10, %s4204_s1  ;;  %2811 = vmatmul.mubr.bf16.gmra.mrb[88].mxu1 %v2467_v45 }
 0x27a   :  { %3767 = vmatpush3.bf16.msra.mxu1 %v4160_v34 }
 0x27b   :  { %v1647_v61 = vpack.c.bf16 %v1564_v58, %v1563_v57  ;;  %v1880_v62 = vpop.permute.xlu0 %1879  ;;  %3768 = vmatprep.subr.bf16.mxu1 %v4161_v4 }
 0x27c   :  { %1882 = vst.msk [vmem:[#allocation3 + $0x38] sm:$0xff] %vm1739_vm1, %v1880_v62  ;;  %v2249_v63 = vld [vmem:[#allocation2 + $0x158] sm:$0xff] }
 0x27d   :  { %1712 = vst.msk [vmem:[#allocation2 + $0x160] sm:$0xff] %vm1667_vm0, %v1647_v61  ;;  %2099 = vrot.lane.b32.xlu1 %v5078_v10, %s4205_s30  ;;  %2251 = vrot.lane.b32.xlu0 %v2249_v63, %s4204_s1  ;;  %v4162_v10 = vld [vmem:[%s5596_s3 + $0xb0] sm:$0xff]  }
 0x27e   :  { %3769 = vmatpush3.bf16.msra.mxu1 %v4162_v10 }
 0x27f   :  { %v2086_v3 = vpop.permute.xlu0 %2085 }
 0x280   :  { %2088 = vst.msk [vmem:[#allocation3 + $0x88] sm:$0xff] %vm1746_vm2, %v2086_v3 }
 0x281   :  { %2105 = vrot.lane.b32.xlu1 %v5091_v35, %s4206_s16  ;;  %2319 = vrot.lane.b32.xlu0 %v2249_v63, %s4205_s30 }
 0x283   :  { %v1886_v5 = vpop.permute.xlu0 %1885 }
 0x284   :  { %v5236_v6 = vld [vmem:[#allocation2 + $0x160] sm:$0xff]  ;;  %1888 = vst.msk [vmem:[#allocation3 + $0x38] sm:$0xff] %vm1746_vm2, %v1886_v5 }
 0x285   :  { %2396 = vst.msk [vmem:[#allocation3 + $0x108] sm:$0xff] %vm1667_vm0, %v5236_v6  ;;  %2111 = vrot.lane.b32.xlu1 %v5111_v7, %s4204_s1  ;;  %2325 = vrot.lane.b32.xlu0 %v5236_v6, %s4206_s16  ;;  %2196 = vst.msk [vmem:[#allocation3 + $0xb8] sm:$0xff] %vm1667_vm0, %v5236_v6 }
 0x286   :  { %2402 = vst.msk [vmem:[#allocation3 + $0x108] sm:$0xff] %vm1739_vm1, %v4851_v44  ;;  %v4163_v44 = vld [vmem:[%s5596_s3 + $0xf8] sm:$0xff]  }
 0x287   :  { %2408 = vst.msk [vmem:[#allocation3 + $0x108] sm:$0xff] %vm1746_vm2, %v4908_v0  ;;  %v2092_v35 = vpop.permute.xlu0 %2091  ;;  %v4164_v0 = vld [vmem:[%s5596_s3 + $0xb8] sm:$0xff]   ;;  %3770 = vmatprep.subr.bf16.mxu1 %v4163_v44 }
 0x288   :  { %2414 = vst.msk [vmem:[#allocation3 + $0x108] sm:$0xff] %vm1753_vm3, %v4920_v15  ;;  %2094 = vst.msk [vmem:[#allocation3 + $0x88] sm:$0xff] %vm1753_vm3, %v2092_v35  ;;  %3771 = vmatpush3.bf16.msra.mxu1 %v4164_v0 }
 0x289   :  { %2179 = vrot.lane.b32.xlu1 %v5111_v7, %s4205_s30  ;;  %1891 = vrot.lane.b32.xlu0 %v5007_v1, %s4204_s1 }
 0x28b   :  { %v2160_v8 = vpop.permute.xlu0 %2159 }
 0x28c   :  { %2162 = vst.msk [vmem:[#allocation3 + $0xa8] sm:$0xff] %vm1739_vm1, %v2160_v8 }
 0x28d   :  { %2185 = vrot.lane.b32.xlu1 %v5131_v32, %s4206_s16  ;;  %1959 = vrot.lane.b32.xlu0 %v5007_v1, %s4205_s30  ;;  %v2257_v32 = vld [vmem:[#allocation2 + $0x188] sm:$0xff] }
 0x28f   :  { %v2166_v15 = vpop.permute.xlu0 %2165  ;;  %v2472_v7 = vld [vmem:[#allocation3 + $0x88] sm:$0xff] }
 0x290   :  { %2168 = vst.msk [vmem:[#allocation3 + $0xa8] sm:$0xff] %vm1746_vm2, %v2166_v15  ;;  %2818 = vmatprep.mubr.bf16.mxu1 %v2472_v7 }
 0x291   :  { %2191 = vrot.lane.b32.xlu1 %v5149_v52, %s4204_s1  ;;  %1965 = vrot.lane.b32.xlu0 %v5019_v26, %s4206_s16  ;;  %v2269_v26 = vld [vmem:[#allocation2 + $0x198] sm:$0xff]  ;;  %v2475_v52 = vld [vmem:[#allocation3 + $0xa0] sm:$0xff] }
 0x292   :  { %2819 = vmatmul.mubr.bf16.gmra.mrb[92].mxu1 %v2471_v9 }
 0x293   :  { %v2172_v11 = vpop.permute.xlu0 %2171 }
 0x294   :  { %2174 = vst.msk [vmem:[#allocation3 + $0xa8] sm:$0xff] %vm1753_vm3, %v2172_v11 }
 0x295   :  { %2259 = vrot.lane.b32.xlu1 %v2257_v32, %s4205_s30  ;;  %1971 = vrot.lane.b32.xlu0 %v5030_v43, %s4204_s1  ;;  %v2349_v43 = vld [vmem:[#allocation2 + $0x1a8] sm:$0xff] }
 0x299   :  { %2265 = vrot.lane.b32.xlu1 %v4966_v42, %s4206_s16  ;;  %2039 = vrot.lane.b32.xlu0 %v5183_v27, %s4205_s30  ;;  %v2289_v27 = vld [vmem:[#allocation2 + $0x1d8] sm:$0xff] }
 0x29b   :  { %v2476_v1 = vld [vmem:[#allocation3 + $0xa8] sm:$0xff] }
 0x29c   :  { %2826 = vmatprep.mubr.bf16.mxu1 %v2476_v1 }
 0x29d   :  { %2271 = vrot.lane.b32.xlu1 %v2269_v26, %s4204_s1  ;;  %2045 = vrot.lane.b32.xlu0 %v5202_v48, %s4206_s16 }
 0x29e   :  { %2827 = vmatmul.mubr.bf16.gmra.mrb[96].mxu1 %v2475_v52 }
 0x29f   :  { %v2220_v12 = vpop.permute.xlu1 %2219 }
 0x2a0   :  { %2222 = vst.msk [vmem:[#allocation3 + $0xc0] sm:$0xff] %vm1739_vm1, %v2220_v12 }
 0x2a1   :  { %2339 = vrot.lane.b32.xlu1 %v2269_v26, %s4205_s30  ;;  %2051 = vrot.lane.b32.xlu0 %v2249_v63, %s4204_s1  ;;  %v2488_v26 = vld [vmem:[#allocation3 + $0x108] sm:$0xff] }
 0x2a5   :  { %2345 = vrot.lane.b32.xlu1 %v4990_v28, %s4206_s16  ;;  %2119 = vrot.lane.b32.xlu0 %v2249_v63, %s4205_s30  ;;  %v2203_v28 = vld [vmem:[#allocation2 + $0x170] sm:$0xff] }
 0x2a7   :  { %v2226_v42 = vpop.permute.xlu1 %2225 }
 0x2a8   :  { %2228 = vst.msk [vmem:[#allocation3 + $0xc0] sm:$0xff] %vm1746_vm2, %v2226_v42 }
 0x2a9   :  { %2351 = vrot.lane.b32.xlu1 %v2349_v43, %s4204_s1  ;;  %2131 = vrot.lane.b32.xlu0 %v2129_v13, %s4204_s1 }
 0x2ad   :  { %2419 = vrot.lane.b32.xlu1 %v2349_v43, %s4205_s30  ;;  %2199 = vrot.lane.b32.xlu0 %v2129_v13, %s4205_s30  ;;  %v2458_v13 = vld [vmem:[#allocation3 + $0x18] sm:$0xff] }
 0x2af   :  { %v2232_v14 = vpop.permute.xlu1 %2231 }
 0x2b0   :  { %2234 = vst.msk [vmem:[#allocation3 + $0xc0] sm:$0xff] %vm1753_vm3, %v2232_v14 }
 0x2b1   :  { %2425 = vrot.lane.b32.xlu1 %v2423_v16, %s4206_s16  ;;  %2205 = vrot.lane.b32.xlu0 %v2203_v28, %s4206_s16 }
 0x2b3   :  { %v2300_v17 = vpop.permute.xlu1 %2299 }
 0x2b4   :  { %2302 = vst.msk [vmem:[#allocation3 + $0xe0] sm:$0xff] %vm1739_vm1, %v2300_v17 }
 0x2b5   :  { %2431 = vrot.lane.b32.xlu1 %v2429_v2, %s4204_s1  ;;  %2125 = vrot.lane.b32.xlu0 %v5236_v6, %s4206_s16  ;;  %v2457_v2 = vld [vmem:[#allocation3 + $0x10] sm:$0xff] }
 0x2b7   :  { %v2306_v19 = vpop.permute.xlu1 %2305  ;;  %v2479_v0 = vld [vmem:[#allocation3 + $0xc0] sm:$0xff] }
 0x2b8   :  { %2308 = vst.msk [vmem:[#allocation3 + $0xe0] sm:$0xff] %vm1746_vm2, %v2306_v19 }
 0x2b9   :  { %2211 = vrot.lane.b32.xlu0 %v2209_v20, %s4204_s1 }
 0x2bd   :  { %2279 = vrot.lane.b32.xlu0 %v2277_v23, %s4205_s30 }
 0x2bf   :  { %v2312_v24 = vpop.permute.xlu1 %2311 }
 0x2c0   :  { %2314 = vst.msk [vmem:[#allocation3 + $0xe0] sm:$0xff] %vm1753_vm3, %v2312_v24 }
 0x2c1   :  { %2285 = vrot.lane.b32.xlu0 %v5071_v59, %s4206_s16 }
 0x2c3   :  { %v2380_v25 = vpop.permute.xlu1 %2379 }
 0x2c4   :  { %2382 = vst.msk [vmem:[#allocation3 + $0x100] sm:$0xff] %vm1739_vm1, %v2380_v25 }
 0x2c5   :  { %2291 = vrot.lane.b32.xlu0 %v2289_v27, %s4204_s1 }
 0x2c7   :  { %v2386_v29 = vpop.permute.xlu1 %2385  ;;  %v2483_v1 = vld [vmem:[#allocation3 + $0xe0] sm:$0xff] }
 0x2c8   :  { %2388 = vst.msk [vmem:[#allocation3 + $0x100] sm:$0xff] %vm1746_vm2, %v2386_v29 }
 0x2c9   :  { %2359 = vrot.lane.b32.xlu0 %v2289_v27, %s4205_s30 }
 0x2cc   :  { %v3702_v30 = vpop.f32.mrb[76].mxu1 }
 0x2cd   :  { %2365 = vrot.lane.b32.xlu0 %v5104_v54, %s4206_s16  ;;  %v3703_v21 = vpop.f32.mrb[77].mxu1 }
 0x2ce   :  { %v5318_v31 = vadd.f32 %v3703_v21, %v3702_v30  ;;  %v3705_v22 = vpop.f32.mrb[78].mxu1 }
 0x2cf   :  { %v2392_v59 = vpop.permute.xlu1 %2391  ;;  %v3706_v36 = vpop.f32.mrb[79].mxu1 }
 0x2d0   :  { %2394 = vst.msk [vmem:[#allocation3 + $0x100] sm:$0xff] %vm1753_vm3, %v2392_v59  ;;  %v5321_v37 = vadd.f32 %v3706_v36, %v3705_v22 }
 0x2d1   :  { %2371 = vrot.lane.b32.xlu0 %v2369_v38, %s4204_s1 }
 0x2d3   :  { %v1872_v40 = vpop.permute.xlu1 %1871 }
 0x2d4   :  { %1874 = vst.msk [vmem:[#allocation3 + $0x30] sm:$0xff] %vm1753_vm3, %v1872_v40 }
 0x2d5   :  { %2439 = vrot.lane.b32.xlu0 %v2369_v38, %s4205_s30 }
 0x2d7   :  { %v1940_v54 = vpop.permute.xlu1 %1939  ;;  %v2487_v43 = vld [vmem:[#allocation3 + $0x100] sm:$0xff] }
 0x2d8   :  { %1942 = vst.msk [vmem:[#allocation3 + $0x50] sm:$0xff] %vm1739_vm1, %v1940_v54 }
 0x2d9   :  { %2445 = vrot.lane.b32.xlu0 %v2443_v41, %s4206_s16 }
 0x2db   :  { %v1946_v46 = vpop.permute.xlu1 %1945  ;;  %v2461_v27 = vld [vmem:[#allocation3 + $0x30] sm:$0xff] }
 0x2dc   :  { %1948 = vst.msk [vmem:[#allocation3 + $0x50] sm:$0xff] %vm1746_vm2, %v1946_v46  ;;  %v3708_v47 = vpop.f32.mrb[80].mxu1 }
 0x2dd   :  { %2451 = vrot.lane.b32.xlu0 %v2449_v33, %s4204_s1  ;;  %v3709_v48 = vpop.f32.mrb[81].mxu1 }
 0x2de   :  { %v5330_v49 = vadd.f32 %v3709_v48, %v3708_v47  ;;  %v3711_v18 = vpop.f32.mrb[82].mxu1 }
 0x2df   :  { %v1952_v50 = vpop.permute.xlu1 %1951  ;;  %v2240_v51 = vpop.permute.xlu0 %2239 }
 0x2e0   :  { %1954 = vst.msk [vmem:[#allocation3 + $0x50] sm:$0xff] %vm1753_vm3, %v1952_v50  ;;  %v3712_v53 = vpop.f32.mrb[83].mxu1 }
 0x2e1   :  { %2242 = vst.msk [vmem:[#allocation3 + $0xc8] sm:$0xff] %vm1739_vm1, %v2240_v51  ;;  %v5334_v55 = vadd.f32 %v3712_v53, %v3711_v18 }
 0x2e3   :  { %v2020_v56 = vpop.permute.xlu1 %2019 }
 0x2e4   :  { %2022 = vst.msk [vmem:[#allocation3 + $0x70] sm:$0xff] %vm1739_vm1, %v2020_v56 }
 0x2e7   :  { %v2026_v45 = vpop.permute.xlu1 %2025  ;;  %v2246_v57 = vpop.permute.xlu0 %2245  ;;  %v2465_v36 = vld [vmem:[#allocation3 + $0x50] sm:$0xff] }
 0x2e8   :  { %2028 = vst.msk [vmem:[#allocation3 + $0x70] sm:$0xff] %vm1746_vm2, %v2026_v45  ;;  %2248 = vst.msk [vmem:[#allocation3 + $0xc8] sm:$0xff] %vm1746_vm2, %v2246_v57 }
 0x2eb   :  { %v2032_v58 = vpop.permute.xlu1 %2031 }
 0x2ec   :  { %2034 = vst.msk [vmem:[#allocation3 + $0x70] sm:$0xff] %vm1753_vm3, %v2032_v58  ;;  %v3714_v60 = vpop.f32.mrb[84].mxu1 }
 0x2ed   :  { %v3715_v34 = vpop.f32.mrb[85].mxu1 }
 0x2ee   :  { %v5340_v61 = vadd.f32 %v3715_v34, %v3714_v60  ;;  %v3717_v62 = vpop.f32.mrb[86].mxu1 }
 0x2ef   :  { %v2100_v63 = vpop.permute.xlu1 %2099  ;;  %v2252_v3 = vpop.permute.xlu0 %2251 }
 0x2f0   :  { %2102 = vst.msk [vmem:[#allocation3 + $0x90] sm:$0xff] %vm1739_vm1, %v2100_v63  ;;  %v3718_v4 = vpop.f32.mrb[87].mxu1 }
 0x2f1   :  { %2254 = vst.msk [vmem:[#allocation3 + $0xc8] sm:$0xff] %vm1753_vm3, %v2252_v3  ;;  %v5344_v5 = vadd.f32 %v3718_v4, %v3717_v62 }
 0x2f3   :  { %v2106_v6 = vpop.permute.xlu1 %2105  ;;  %v2320_v10 = vpop.permute.xlu0 %2319  ;;  %v2469_v46 = vld [vmem:[#allocation3 + $0x70] sm:$0xff] }
 0x2f4   :  { %2108 = vst.msk [vmem:[#allocation3 + $0x90] sm:$0xff] %vm1746_vm2, %v2106_v6 }
 0x2f5   :  { %2322 = vst.msk [vmem:[#allocation3 + $0xe8] sm:$0xff] %vm1739_vm1, %v2320_v10 }
 0x2f7   :  { %v2112_v35 = vpop.permute.xlu1 %2111  ;;  %v2326_v8 = vpop.permute.xlu0 %2325 }
 0x2f8   :  { %v2480_v44 = vld [vmem:[#allocation3 + $0xc8] sm:$0xff]  ;;  %2114 = vst.msk [vmem:[#allocation3 + $0x90] sm:$0xff] %vm1753_vm3, %v2112_v35 }
 0x2f9   :  { %2328 = vst.msk [vmem:[#allocation3 + $0xe8] sm:$0xff] %vm1746_vm2, %v2326_v8  ;;  %2834 = vmatprep.mubr.bf16.mxu1 %v2480_v44 }
 0x2fa   :  { %2334 = vst.msk [vmem:[#allocation3 + $0xe8] sm:$0xff] %vm1753_vm3, %v4849_v39  ;;  %2835 = vmatmul.mubr.bf16.gmra.mrb[100].mxu1 %v2479_v0 }
 0x2fb   :  { %v2180_v15 = vpop.permute.xlu1 %2179  ;;  %v1892_v7 = vpop.permute.xlu0 %1891 }
 0x2fc   :  { %2182 = vst.msk [vmem:[#allocation3 + $0xb0] sm:$0xff] %vm1739_vm1, %v2180_v15 }
 0x2fd   :  { %1894 = vst.msk [vmem:[#allocation3 + $0x38] sm:$0xff] %vm1753_vm3, %v1892_v7 }
 0x2ff   :  { %v2186_v9 = vpop.permute.xlu1 %2185  ;;  %v1960_v11 = vpop.permute.xlu0 %1959  ;;  %v2473_v50 = vld [vmem:[#allocation3 + $0x90] sm:$0xff] }
 0x300   :  { %2188 = vst.msk [vmem:[#allocation3 + $0xb0] sm:$0xff] %vm1746_vm2, %v2186_v9 }
 0x301   :  { %1962 = vst.msk [vmem:[#allocation3 + $0x58] sm:$0xff] %vm1739_vm1, %v1960_v11  ;;  %v2484_v32 = vld [vmem:[#allocation3 + $0xe8] sm:$0xff] }
 0x302   :  { %2842 = vmatprep.mubr.bf16.mxu1 %v2484_v32 }
 0x303   :  { %2843 = vmatmul.mubr.bf16.gmra.mrb[104].mxu1 %v2483_v1  ;;  %v2192_v52 = vpop.permute.xlu1 %2191  ;;  %v1966_v39 = vpop.permute.xlu0 %1965 }
 0x304   :  { %2850 = vmatprep.mubr.bf16.mxu1 %v2488_v26  ;;  %2194 = vst.msk [vmem:[#allocation3 + $0xb0] sm:$0xff] %vm1753_vm3, %v2192_v52  ;;  %v2462_v19 = vld [vmem:[#allocation3 + $0x38] sm:$0xff] }
 0x305   :  { %1968 = vst.msk [vmem:[#allocation3 + $0x58] sm:$0xff] %vm1746_vm2, %v1966_v39 }
 0x307   :  { %v2260_v12 = vpop.permute.xlu1 %2259  ;;  %v1972_v42 = vpop.permute.xlu0 %1971 }
 0x308   :  { %2262 = vst.msk [vmem:[#allocation3 + $0xd0] sm:$0xff] %vm1739_vm1, %v2260_v12 }
 0x309   :  { %1974 = vst.msk [vmem:[#allocation3 + $0x58] sm:$0xff] %vm1753_vm3, %v1972_v42 }
 0x30b   :  { %2851 = vmatmul.mubr.bf16.gmra.mrb[108].mxu1 %v2487_v43  ;;  %v2266_v14 = vpop.permute.xlu1 %2265  ;;  %v2040_v16 = vpop.permute.xlu0 %2039  ;;  %v2477_v45 = vld [vmem:[#allocation3 + $0xb0] sm:$0xff] }
 0x30c   :  { %2891 = vmatprep.mubr.bf16.mxu1 %v2458_v13  ;;  %2268 = vst.msk [vmem:[#allocation3 + $0xd0] sm:$0xff] %vm1746_vm2, %v2266_v14 }
 0x30d   :  { %2042 = vst.msk [vmem:[#allocation3 + $0x78] sm:$0xff] %vm1739_vm1, %v2040_v16 }
 0x30f   :  { %v2272_v28 = vpop.permute.xlu1 %2271  ;;  %v2046_v17 = vpop.permute.xlu0 %2045 }
 0x310   :  { %2274 = vst.msk [vmem:[#allocation3 + $0xd0] sm:$0xff] %vm1753_vm3, %v2272_v28  ;;  %v2466_v29 = vld [vmem:[#allocation3 + $0x58] sm:$0xff] }
 0x311   :  { %2048 = vst.msk [vmem:[#allocation3 + $0x78] sm:$0xff] %vm1746_vm2, %v2046_v17  ;;  %v4165_v17 = vld [vmem:[%s5597_s5 + $0x40] sm:$0xff]  }
 0x312   :  { %3826 = vmatprep.subr.bf16.mxu1 %v4165_v17 }
 0x313   :  { %2892 = vmatmul.mubr.bf16.vlgmr.msra.gmra.mrb[112].mxu1 %v2457_v2  ;;  %v2340_v20 = vpop.permute.xlu1 %2339  ;;  %v2052_v23 = vpop.permute.xlu0 %2051  ;;  %v4166_v2 = vld [vmem:[%s5597_s5] sm:$0xff]  }
 0x314   :  { %2899 = vmatprep.mubr.bf16.mxu1 %v2462_v19  ;;  %2342 = vst.msk [vmem:[#allocation3 + $0xf0] sm:$0xff] %vm1739_vm1, %v2340_v20  ;;  %v4167_v19 = vld [vmem:[%s5597_s5 + $0x48] sm:$0xff]   ;;  %3827 = vmatpush3.bf16.msra.mxu1 %v4166_v2 }
 0x315   :  { %2054 = vst.msk [vmem:[#allocation3 + $0x78] sm:$0xff] %vm1753_vm3, %v2052_v23  ;;  %v4168_v20 = vld [vmem:[%s5597_s5 + $0x8] sm:$0xff]   ;;  %3828 = vmatprep.subr.bf16.mxu1 %v4167_v19  ;;  %v4169_v23 = vld [vmem:[%s5597_s5 + $0x50] sm:$0xff]  }
 0x317   :  { %v2346_v24 = vpop.permute.xlu1 %2345  ;;  %v2120_v25 = vpop.permute.xlu0 %2119  ;;  %v2481_v34 = vld [vmem:[#allocation3 + $0xd0] sm:$0xff] }
 0x318   :  { %2348 = vst.msk [vmem:[#allocation3 + $0xf0] sm:$0xff] %vm1746_vm2, %v2346_v24  ;;  %3829 = vmatpush3.bf16.msra.mxu1 %v4168_v20  ;;  %v4170_v24 = vld [vmem:[%s5597_s5 + $0x10] sm:$0xff]  }
 0x319   :  { %2122 = vst.msk [vmem:[#allocation3 + $0x98] sm:$0xff] %vm1739_vm1, %v2120_v25  ;;  %3830 = vmatprep.subr.bf16.mxu1 %v4169_v23  ;;  %v4171_v25 = vld [vmem:[%s5597_s5 + $0x58] sm:$0xff]  }
 0x31b   :  { %2900 = vmatmul.mubr.bf16.gmra.mrb[116].mxu1 %v2461_v27  ;;  %v2352_v30 = vpop.permute.xlu1 %2351  ;;  %v2132_v21 = vpop.permute.xlu0 %2131  ;;  %v4172_v27 = vld [vmem:[%s5597_s5 + $0x18] sm:$0xff]  }
 0x31c   :  { %2907 = vmatprep.mubr.bf16.mxu1 %v2466_v29  ;;  %2354 = vst.msk [vmem:[#allocation3 + $0xf0] sm:$0xff] %vm1753_vm3, %v2352_v30  ;;  %v2470_v38 = vld [vmem:[#allocation3 + $0x78] sm:$0xff]  ;;  %v4173_v29 = vld [vmem:[%s5597_s5 + $0x60] sm:$0xff]   ;;  %3831 = vmatpush3.bf16.msra.mxu1 %v4170_v24 }
 0x31d   :  { %3832 = vmatprep.subr.bf16.mxu1 %v4171_v25  ;;  %v4174_v30 = vld [vmem:[%s5597_s5 + $0x20] sm:$0xff]  }
 0x31f   :  { %v2420_v22 = vpop.permute.xlu1 %2419  ;;  %v2200_v59 = vpop.permute.xlu0 %2199 }
 0x320   :  { %2422 = vst.msk [vmem:[#allocation3 + $0x110] sm:$0xff] %vm1739_vm1, %v2420_v22  ;;  %2202 = vst.msk [vmem:[#allocation3 + $0xb8] sm:$0xff] %vm1739_vm1, %v2200_v59  ;;  %3833 = vmatpush3.bf16.msra.mxu1 %v4172_v27  ;;  %v4178_v27 = vld [vmem:[%s5597_s5 + $0x30] sm:$0xff]  }
 0x321   :  { %3834 = vmatprep.subr.bf16.mxu1 %v4173_v29 }
 0x323   :  { %2908 = vmatmul.mubr.bf16.gmra.mrb[120].mxu1 %v2465_v36  ;;  %v2426_v40 = vpop.permute.xlu1 %2425  ;;  %v2206_v41 = vpop.permute.xlu0 %2205  ;;  %v2485_v10 = vld [vmem:[#allocation3 + $0xf0] sm:$0xff] }
 0x324   :  { %2915 = vmatprep.mubr.bf16.mxu1 %v2470_v38  ;;  %2428 = vst.msk [vmem:[#allocation3 + $0x110] sm:$0xff] %vm1746_vm2, %v2426_v40  ;;  %2208 = vst.msk [vmem:[#allocation3 + $0xb8] sm:$0xff] %vm1746_vm2, %v2206_v41  ;;  %3835 = vmatpush3.bf16.msra.mxu1 %v4174_v30 }
 0x327   :  { %v2432_v54 = vpop.permute.xlu1 %2431  ;;  %v2126_v33 = vpop.permute.xlu0 %2125 }
 0x328   :  { %2434 = vst.msk [vmem:[#allocation3 + $0x110] sm:$0xff] %vm1753_vm3, %v2432_v54 }
 0x329   :  { %2128 = vst.msk [vmem:[#allocation3 + $0x98] sm:$0xff] %vm1746_vm2, %v2126_v33 }
 0x32a   :  { %2134 = vst.msk [vmem:[#allocation3 + $0x98] sm:$0xff] %vm1753_vm3, %v2132_v21 }
 0x32b   :  { %2916 = vmatmul.mubr.bf16.gmra.mrb[124].mxu1 %v2469_v46  ;;  %v2212_v47 = vpop.permute.xlu0 %2211 }
 0x32c   :  { %2214 = vst.msk [vmem:[#allocation3 + $0xb8] sm:$0xff] %vm1753_vm3, %v2212_v47 }
 0x32f   :  { %v2280_v48 = vpop.permute.xlu0 %2279  ;;  %v2489_v11 = vld [vmem:[#allocation3 + $0x110] sm:$0xff] }
 0x330   :  { %2282 = vst.msk [vmem:[#allocation3 + $0xd8] sm:$0xff] %vm1739_vm1, %v2280_v48 }
 0x331   :  { %v2474_v18 = vld [vmem:[#allocation3 + $0x98] sm:$0xff] }
 0x332   :  { %2923 = vmatprep.mubr.bf16.mxu1 %v2474_v18 }
 0x333   :  { %2924 = vmatmul.mubr.bf16.gmra.mrb[128].mxu1 %v2473_v50  ;;  %v2286_v51 = vpop.permute.xlu0 %2285  ;;  %v2478_v53 = vld [vmem:[#allocation3 + $0xb8] sm:$0xff] }
 0x334   :  { %2288 = vst.msk [vmem:[#allocation3 + $0xd8] sm:$0xff] %vm1746_vm2, %v2286_v51  ;;  %2931 = vmatprep.mubr.bf16.mxu1 %v2478_v53 }
 0x337   :  { %v2292_v56 = vpop.permute.xlu0 %2291 }
 0x338   :  { %2294 = vst.msk [vmem:[#allocation3 + $0xd8] sm:$0xff] %vm1753_vm3, %v2292_v56 }
 0x33b   :  { %2932 = vmatmul.mubr.bf16.gmra.mrb[132].mxu1 %v2477_v45  ;;  %v2360_v57 = vpop.permute.xlu0 %2359 }
 0x33c   :  { %2362 = vst.msk [vmem:[#allocation3 + $0xf8] sm:$0xff] %vm1739_vm1, %v2360_v57  ;;  %v5443_v57 = vld [vmem:[%s5598_s4] ss:$0 sm:$0xff] }
 0x33d   :  { %v2805_v20 = vadd.f32 %v5340_v61, %v5443_v57 }
 0x33f   :  { %v2366_v58 = vpop.permute.xlu0 %2365  ;;  %v2482_v60 = vld [vmem:[#allocation3 + $0xd8] sm:$0xff] }
 0x340   :  { %2368 = vst.msk [vmem:[#allocation3 + $0xf8] sm:$0xff] %vm1746_vm2, %v2366_v58  ;;  %2939 = vmatprep.mubr.bf16.mxu1 %v2482_v60 }
 0x343   :  { %2940 = vmatmul.mubr.bf16.gmra.mrb[136].mxu1 %v2481_v34  ;;  %v2372_v62 = vpop.permute.xlu0 %2371  ;;  %v2789_v34 = vadd.f32 %v5318_v31, %v5443_v57 }
 0x344   :  { %2374 = vst.msk [vmem:[#allocation3 + $0xf8] sm:$0xff] %vm1753_vm3, %v2372_v62 }
 0x347   :  { %v2440_v63 = vpop.permute.xlu0 %2439 }
 0x348   :  { %2442 = vst.msk [vmem:[#allocation3 + $0x118] sm:$0xff] %vm1739_vm1, %v2440_v63 }
 0x34b   :  { %v2446_v3 = vpop.permute.xlu0 %2445  ;;  %v2486_v4 = vld [vmem:[#allocation3 + $0xf8] sm:$0xff] }
 0x34c   :  { %2448 = vst.msk [vmem:[#allocation3 + $0x118] sm:$0xff] %vm1746_vm2, %v2446_v3  ;;  %v3720_v6 = vpop.f32.mrb[88].mxu1  ;;  %2947 = vmatprep.mubr.bf16.mxu1 %v2486_v4  ;;  %v2792_v4 = vadd.f32 %v5321_v37, %v5443_v57 }
 0x34d   :  { %v3721_v35 = vpop.f32.mrb[89].mxu1  ;;  %2948 = vmatmul.mubr.bf16.gmra.mrb[140].mxu1 %v2485_v10 }
 0x34e   :  { %v5385_v8 = vadd.f32 %v3721_v35, %v3720_v6  ;;  %v3723_v44 = vpop.f32.mrb[90].mxu1 }
 0x34f   :  { %v2452_v0 = vpop.permute.xlu0 %2451  ;;  %v3724_v15 = vpop.f32.mrb[91].mxu1 }
 0x350   :  { %2454 = vst.msk [vmem:[#allocation3 + $0x118] sm:$0xff] %vm1753_vm3, %v2452_v0  ;;  %v5388_v7 = vadd.f32 %v3724_v15, %v3723_v44 }
 0x357   :  { %v2490_v9 = vld [vmem:[#allocation3 + $0x118] sm:$0xff] }
 0x358   :  { %2955 = vmatprep.mubr.bf16.mxu1 %v2490_v9 }
 0x359   :  { %2956 = vmatmul.mubr.bf16.gmra.mrb[144].mxu1 %v2489_v11  ;;  %v2797_v11 = vadd.f32 %v5330_v49, %v5443_v57  ;;  %v4176_v49 = vld [vmem:[%s5597_s5 + $0x28] sm:$0xff]  }
 0x365   :  { %v3726_v32 = vpop.f32.mrb[92].mxu1 }
 0x366   :  { %v3727_v1 = vpop.f32.mrb[93].mxu1 }
 0x367   :  { %v5390_v26 = vadd.f32 %v3727_v1, %v3726_v32  ;;  %v3729_v52 = vpop.f32.mrb[94].mxu1 }
 0x368   :  { %v3730_v39 = vpop.f32.mrb[95].mxu1 }
 0x369   :  { %v5392_v12 = vadd.f32 %v3730_v39, %v3729_v52  ;;  %v2800_v39 = vadd.f32 %v5334_v55, %v5443_v57 }
 0x371   :  { %v3732_v42 = vpop.f32.mrb[96].mxu1 }
 0x372   :  { %v3733_v43 = vpop.f32.mrb[97].mxu1 }
 0x373   :  { %v5394_v13 = vadd.f32 %v3733_v43, %v3732_v42  ;;  %v3735_v14 = vpop.f32.mrb[98].mxu1 }
 0x374   :  { %v3736_v16 = vpop.f32.mrb[99].mxu1 }
 0x375   :  { %v5396_v28 = vadd.f32 %v3736_v16, %v3735_v14  ;;  %v4175_v14 = vld [vmem:[%s5597_s5 + $0x68] sm:$0xff]   ;;  %v4177_v16 = vld [vmem:[%s5597_s5 + $0x70] sm:$0xff]  }
 0x376   :  { %3836 = vmatprep.subr.bf16.mxu1 %v4175_v14 }
 0x377   :  { %3837 = vmatpush3.bf16.msra.mxu1 %v4176_v49 }
 0x378   :  { %3838 = vmatprep.subr.bf16.mxu1 %v4177_v16 }
 0x37b   :  { %3839 = vmatpush3.bf16.msra.mxu1 %v4178_v27 }
 0x3cd   :  { %v3738_v21 = vpop.f32.mrb[100].mxu1 }
 0x3ce   :  { %v3739_v22 = vpop.f32.mrb[101].mxu1 }
 0x3cf   :  { %v5428_v59 = vadd.f32 %v3739_v22, %v3738_v21  ;;  %v3741_v36 = vpop.f32.mrb[102].mxu1  ;;  %v2808_v21 = vadd.f32 %v5344_v5, %v5443_v57 }
 0x3d0   :  { %v3742_v38 = vpop.f32.mrb[103].mxu1 }
 0x3d1   :  { %v5430_v40 = vadd.f32 %v3742_v38, %v3741_v36  ;;  %v2837_v27 = vadd.f32 %v5428_v59, %v5443_v57 }
 0x3d6   :  { %v3744_v41 = vpop.f32.mrb[104].mxu1 }
 0x3d7   :  { %v3745_v54 = vpop.f32.mrb[105].mxu1 }
 0x3d8   :  { %v5432_v33 = vadd.f32 %v3745_v54, %v3744_v41  ;;  %v3747_v46 = vpop.f32.mrb[106].mxu1 }
 0x3d9   :  { %v3748_v47 = vpop.f32.mrb[107].mxu1 }
 0x3da   :  { %v5434_v48 = vadd.f32 %v3748_v47, %v3747_v46  ;;  %v2813_v47 = vadd.f32 %v5385_v8, %v5443_v57  ;;  %v4180_v8 = vld [vmem:[%s5597_s5 + $0x38] sm:$0xff]  }
 0x3de   :  { %v3750_v18 = vpop.f32.mrb[108].mxu1 }
 0x3df   :  { %v3751_v50 = vpop.f32.mrb[109].mxu1 }
 0x3e0   :  { %v5436_v51 = vadd.f32 %v3751_v50, %v3750_v18  ;;  %v3753_v53 = vpop.f32.mrb[110].mxu1 }
 0x3e1   :  { %v3754_v56 = vpop.f32.mrb[111].mxu1 }
 0x3e2   :  { %v5438_v45 = vadd.f32 %v3754_v56, %v3753_v53 }
 0x3e6   :  { %v3772_v58 = vpop.f32.mrb[112].mxu1 }
 0x3e7   :  { %v3773_v60 = vpop.f32.mrb[113].mxu1 }
 0x3e8   :  { %v3774_v62 = vadd.f32 %v3773_v60, %v3772_v58  ;;  %v3775_v63 = vpop.f32.mrb[114].mxu1  ;;  %v2816_v58 = vadd.f32 %v5388_v7, %v5443_v57  ;;  %v2821_v7 = vadd.f32 %v5390_v26, %v5443_v57  ;;  %v4181_v26 = vld [vmem:[%s5597_s5 + $0xc0] sm:$0xff]  }
 0x3e9   :  { %v3776_v3 = vpop.f32.mrb[115].mxu1 }
 0x3ea   :  { %v2894_v6 = vadd.f32 %v3774_v62, %v2789_v34  ;;  %v3777_v10 = vadd.f32 %v3776_v3, %v3775_v63  ;;  %v4179_v63 = vld [vmem:[%s5597_s5 + $0x78] sm:$0xff]  }
 0x3eb   :  { %3840 = vmatprep.subr.bf16.mxu1 %v4179_v63 }
 0x3ec   :  { %v2897_v35 = vadd.f32 %v3777_v10, %v2792_v4  ;;  %v2964_v44 = vmax.f32 %v2894_v6, 0.0  ;;  %3841 = vmatpush3.bf16.msra.mxu1 %v4180_v8 }
 0x3ed   :  { %3848 = vmatprep.subr.bf16.mxu1 %v4181_v26 }
 0x3ee   :  { %v2965_v0 = vmax.f32 %v2897_v35, 0.0  ;;  %v3778_v15 = vpop.f32.mrb[116].mxu1 }
 0x3ef   :  { %v3779_v9 = vpop.f32.mrb[117].mxu1 }
 0x3f0   :  { %v2982_v32 = vpack.c.bf16 %v2965_v0, %v2964_v44  ;;  %v3780_v1 = vadd.f32 %v3779_v9, %v3778_v15  ;;  %v3781_v31 = vpop.f32.mrb[118].mxu1 }
 0x3f1   :  { %v3782_v52 = vpop.f32.mrb[119].mxu1 }
 0x3f2   :  { %2992 = vst.msk [vmem:[#allocation4] sm:$0xff] %vm2991_vm4, %v2982_v32  ;;  %v2902_v37 = vadd.f32 %v3780_v1, %v2797_v11  ;;  %v3783_v42 = vadd.f32 %v3782_v52, %v3781_v31  ;;  %v2824_v11 = vadd.f32 %v5392_v12, %v5443_v57 }
 0x3f4   :  { %v2905_v43 = vadd.f32 %v3783_v42, %v2800_v39  ;;  %v2966_v17 = vmax.f32 %v2902_v37, 0.0 }
 0x3f6   :  { %v2967_v2 = vmax.f32 %v2905_v43, 0.0  ;;  %v3784_v55 = vpop.f32.mrb[120].mxu1  ;;  %v2829_v43 = vadd.f32 %v5394_v13, %v5443_v57 }
 0x3f7   :  { %v3785_v19 = vpop.f32.mrb[121].mxu1 }
 0x3f8   :  { %v2983_v23 = vpack.c.bf16 %v2967_v2, %v2966_v17  ;;  %v3786_v24 = vadd.f32 %v3785_v19, %v3784_v55  ;;  %v3787_v25 = vpop.f32.mrb[122].mxu1  ;;  %v2832_v2 = vadd.f32 %v5396_v28, %v5443_v57  ;;  %v2840_v28 = vadd.f32 %v5430_v40, %v5443_v57 }
 0x3f9   :  { %v3788_v29 = vpop.f32.mrb[123].mxu1  ;;  %v3001_v30 = vld [vmem:[#allocation4] sm:$0xff]  ;;  %v2845_v40 = vadd.f32 %v5432_v33, %v5443_v57  ;;  %v2853_v33 = vadd.f32 %v5436_v51, %v5443_v57 }
 0x3fa   :  { %2993 = vst.msk [vmem:[#allocation4 + $0x8] sm:$0xff] %vm2991_vm4, %v2983_v23  ;;  %v2910_v22 = vadd.f32 %v3786_v24, %v2805_v20  ;;  %v3789_v36 = vadd.f32 %v3788_v29, %v3787_v25  ;;  %3002 = vst.msk [vmem:[#allocation5] sm:$0xff] %vm2991_vm4, %v3001_v30 }
 0x3fc   :  { %v2913_v61 = vadd.f32 %v3789_v36, %v2808_v21  ;;  %v2968_v38 = vmax.f32 %v2910_v22, 0.0 }
 0x3fe   :  { %v2969_v41 = vmax.f32 %v2913_v61, 0.0  ;;  %v3790_v54 = vpop.f32.mrb[124].mxu1 }
 0x3ff   :  { %v3791_v46 = vpop.f32.mrb[125].mxu1 }
 0x400   :  { %v2984_v18 = vpack.c.bf16 %v2969_v41, %v2968_v38  ;;  %v3792_v50 = vadd.f32 %v3791_v46, %v3790_v54  ;;  %v3793_v53 = vpop.f32.mrb[126].mxu1 }
 0x401   :  { %v3794_v56 = vpop.f32.mrb[127].mxu1  ;;  %v3003_v5 = vld [vmem:[#allocation4 + $0x8] sm:$0xff] }
 0x402   :  { %2994 = vst.msk [vmem:[#allocation4 + $0x10] sm:$0xff] %vm2991_vm4, %v2984_v18  ;;  %v2918_v60 = vadd.f32 %v3792_v50, %v2813_v47  ;;  %v3795_v34 = vadd.f32 %v3794_v56, %v3793_v53  ;;  %3005 = vrot.lane.b32.xlu1 %v3003_v5, %s4206_s16 }
 0x404   :  { %v2921_v62 = vadd.f32 %v3795_v34, %v2816_v58  ;;  %v2970_v3 = vmax.f32 %v2918_v60, 0.0  ;;  %v2848_v58 = vadd.f32 %v5434_v48, %v5443_v57  ;;  %v2856_v48 = vadd.f32 %v5438_v45, %v5443_v57  ;;  %v4182_v45 = vld [vmem:[%s5597_s5 + $0x80] sm:$0xff]  }
 0x406   :  { %v2971_v4 = vmax.f32 %v2921_v62, 0.0  ;;  %v3796_v6 = vpop.f32.mrb[128].mxu1 }
 0x407   :  { %v3797_v10 = vpop.f32.mrb[129].mxu1 }
 0x408   :  { %v2985_v35 = vpack.c.bf16 %v2971_v4, %v2970_v3  ;;  %v3798_v44 = vadd.f32 %v3797_v10, %v3796_v6  ;;  %v3799_v0 = vpop.f32.mrb[130].mxu1 }
 0x409   :  { %v3800_v15 = vpop.f32.mrb[131].mxu1  ;;  %v3010_v9 = vld [vmem:[#allocation4 + $0x10] sm:$0xff] }
 0x40a   :  { %2995 = vst.msk [vmem:[#allocation4 + $0x18] sm:$0xff] %vm2991_vm4, %v2985_v35  ;;  %v2926_v32 = vadd.f32 %v3798_v44, %v2821_v7  ;;  %v3801_v1 = vadd.f32 %v3800_v15, %v3799_v0  ;;  %3011 = vst.msk [vmem:[#allocation5 + $0x8] sm:$0xff] %vm2991_vm4, %v3010_v9 }
 0x40c   :  { %v2929_v31 = vadd.f32 %v3801_v1, %v2824_v11  ;;  %v2972_v52 = vmax.f32 %v2926_v32, 0.0 }
 0x40e   :  { %v2973_v39 = vmax.f32 %v2929_v31, 0.0  ;;  %v3802_v37 = vpop.f32.mrb[132].mxu1 }
 0x40f   :  { %v3803_v42 = vpop.f32.mrb[133].mxu1 }
 0x410   :  { %v2986_v14 = vpack.c.bf16 %v2973_v39, %v2972_v52  ;;  %v3804_v12 = vadd.f32 %v3803_v42, %v3802_v37  ;;  %v3805_v49 = vpop.f32.mrb[134].mxu1  ;;  %v4183_v37 = vld [vmem:[%s5597_s5 + $0xc8] sm:$0xff]  }
 0x411   :  { %v3806_v16 = vpop.f32.mrb[135].mxu1  ;;  %v3012_v17 = vld [vmem:[#allocation4 + $0x18] sm:$0xff]  ;;  %v4184_v42 = vld [vmem:[%s5597_s5 + $0x88] sm:$0xff]  }
 0x412   :  { %2996 = vst.msk [vmem:[#allocation4 + $0x20] sm:$0xff] %vm2991_vm4, %v2986_v14  ;;  %v2934_v55 = vadd.f32 %v3804_v12, %v2829_v43  ;;  %v3807_v19 = vadd.f32 %v3806_v16, %v3805_v49  ;;  %3014 = vrot.lane.b32.xlu0 %v3012_v17, %s4206_s16  ;;  %v4185_v43 = vld [vmem:[%s5597_s5 + $0xd0] sm:$0xff]   ;;  %v4187_v49 = vld [vmem:[%s5597_s5 + $0xd8] sm:$0xff]   ;;  %v4189_v17 = vld [vmem:[%s5597_s5 + $0xe0] sm:$0xff]  }
 0x413   :  { %v4186_v14 = vld [vmem:[%s5597_s5 + $0x90] sm:$0xff]   ;;  %v4188_v16 = vld [vmem:[%s5597_s5 + $0x98] sm:$0xff]  }
 0x414   :  { %v2937_v20 = vadd.f32 %v3807_v19, %v2832_v2  ;;  %v2974_v23 = vmax.f32 %v2934_v55, 0.0  ;;  %v4190_v2 = vld [vmem:[%s5597_s5 + $0xa0] sm:$0xff]   ;;  %v4191_v55 = vld [vmem:[%s5597_s5 + $0xe8] sm:$0xff]  }
 0x415   :  { %v4192_v19 = vld [vmem:[%s5597_s5 + $0xa8] sm:$0xff]  }
 0x416   :  { %v2975_v24 = vmax.f32 %v2937_v20, 0.0  ;;  %v3808_v25 = vpop.f32.mrb[136].mxu1  ;;  %v4193_v20 = vld [vmem:[%s5597_s5 + $0xf0] sm:$0xff]  }
 0x417   :  { %v3809_v13 = vpop.f32.mrb[137].mxu1 }
 0x418   :  { %v2987_v29 = vpack.c.bf16 %v2975_v24, %v2974_v23  ;;  %v3810_v30 = vadd.f32 %v3809_v13, %v3808_v25  ;;  %v3811_v21 = vpop.f32.mrb[138].mxu1  ;;  %v4194_v23 = vld [vmem:[%s5597_s5 + $0xb0] sm:$0xff]   ;;  %v4195_v24 = vld [vmem:[%s5597_s5 + $0xf8] sm:$0xff]  }
 0x419   :  { %v3812_v22 = vpop.f32.mrb[139].mxu1  ;;  %v3018_v36 = vld [vmem:[#allocation4 + $0x20] sm:$0xff]  ;;  %v4196_v13 = vld [vmem:[%s5597_s5 + $0xb8] sm:$0xff]  }
 0x41a   :  { %2997 = vst.msk [vmem:[#allocation4 + $0x28] sm:$0xff] %vm2991_vm4, %v2987_v29  ;;  %v2942_v61 = vadd.f32 %v3810_v30, %v2837_v27  ;;  %v3813_v38 = vadd.f32 %v3812_v22, %v3811_v21  ;;  %3019 = vst.msk [vmem:[#allocation5 + $0x10] sm:$0xff] %vm2991_vm4, %v3018_v36  ;;  %v4207_v27 = vmov 0.0   ;;  %v4197_v29 = vld [vmem:[%s5597_s5 + $0x100] sm:$0xff]   ;;  %v4198_v22 = vld [vmem:[%s5597_s5 + $0x108] sm:$0xff]  }
 0x41b   :  { %v4199_v36 = vld [vmem:[%s5597_s5 + $0x110] sm:$0xff]  }
 0x41c   :  { %v2945_v41 = vadd.f32 %v3813_v38, %v2840_v28  ;;  %v2976_v54 = vmax.f32 %v2942_v61, 0.0  ;;  %v4200_v28 = vld [vmem:[%s5597_s5 + $0x118] sm:$0xff]  }
 0x41e   :  { %v2977_v46 = vmax.f32 %v2945_v41, 0.0 }
 0x420   :  { %v2988_v47 = vpack.c.bf16 %v2977_v46, %v2976_v54  ;;  %v3814_v18 = vpop.f32.mrb[140].mxu1 }
 0x421   :  { %v3020_v59 = vld [vmem:[#allocation4 + $0x28] sm:$0xff]  ;;  %v3815_v50 = vpop.f32.mrb[141].mxu1 }
 0x422   :  { %2998 = vst.msk [vmem:[#allocation4 + $0x30] sm:$0xff] %vm2991_vm4, %v2988_v47  ;;  %3022 = vrot.lane.b32.xlu1 %v3020_v59, %s4206_s16  ;;  %v3816_v53 = vadd.f32 %v3815_v50, %v3814_v18  ;;  %v3817_v56 = vpop.f32.mrb[142].mxu1  ;;  %v3648_v59 = vld [vmem:[%s5599_s6] ss:$0 sm:$0xff] }
 0x423   :  { %v3818_v5 = vpop.f32.mrb[143].mxu1 }
 0x424   :  { %v2950_v60 = vadd.f32 %v3816_v53, %v2845_v40  ;;  %v3819_v34 = vadd.f32 %v3818_v5, %v3817_v56 }
 0x426   :  { %v2953_v62 = vadd.f32 %v3819_v34, %v2848_v58  ;;  %v2978_v63 = vmax.f32 %v2950_v60, 0.0 }
 0x428   :  { %v2979_v8 = vmax.f32 %v2953_v62, 0.0 }
 0x429   :  { %v3026_v3 = vld [vmem:[#allocation4 + $0x30] sm:$0xff] }
 0x42a   :  { %3027 = vst.msk [vmem:[#allocation5 + $0x18] sm:$0xff] %vm2991_vm4, %v3026_v3  ;;  %v2989_v4 = vpack.c.bf16 %v2979_v8, %v2978_v63 }
 0x42c   :  { %2999 = vst.msk [vmem:[#allocation4 + $0x38] sm:$0xff] %vm2991_vm4, %v2989_v4  ;;  %v3820_v6 = vpop.f32.mrb[144].mxu1 }
 0x42d   :  { %v3821_v10 = vpop.f32.mrb[145].mxu1 }
 0x42e   :  { %v3822_v7 = vadd.f32 %v3821_v10, %v3820_v6  ;;  %v3823_v35 = vpop.f32.mrb[146].mxu1 }
 0x42f   :  { %v3824_v44 = vpop.f32.mrb[147].mxu1 }
 0x430   :  { %v2958_v0 = vadd.f32 %v3822_v7, %v2853_v33  ;;  %v3825_v15 = vadd.f32 %v3824_v44, %v3823_v35 }
 0x432   :  { %v2961_v9 = vadd.f32 %v3825_v15, %v2856_v48  ;;  %v2980_v32 = vmax.f32 %v2958_v0, 0.0 }
 0x433   :  { %v3028_v11 = vld [vmem:[#allocation4 + $0x38] sm:$0xff] }
 0x434   :  { %v2981_v1 = vmax.f32 %v2961_v9, 0.0  ;;  %3030 = vrot.lane.b32.xlu0 %v3028_v11, %s4206_s16 }
 0x436   :  { %v2990_v31 = vpack.c.bf16 %v2981_v1, %v2980_v32 }
 0x438   :  { %3000 = vst.msk [vmem:[#allocation4 + $0x40] sm:$0xff] %vm2991_vm4, %v2990_v31 }
 0x43f   :  { %v3034_v52 = vld [vmem:[#allocation4 + $0x40] sm:$0xff] }
 0x440   :  { %3035 = vst.msk [vmem:[#allocation5 + $0x20] sm:$0xff] %vm2991_vm4, %v3034_v52 }
 0x447   :  { %v3040_v61 = vld [vmem:[#allocation5 + $0x20] sm:$0xff] }
 0x474   :  { %v3006_v51 = vpop.permute.xlu1 %3005 }
 0x475   :  { %3009 = vst.msk [vmem:[#allocation5] sm:$0xff] %vm3008_vm5, %v3006_v51 }
 0x47c   :  { %v3036_v26 = vld [vmem:[#allocation5] sm:$0xff] }
 0x484   :  { %v3015_v39 = vpop.permute.xlu0 %3014 }
 0x485   :  { %3017 = vst.msk [vmem:[#allocation5 + $0x8] sm:$0xff] %vm3008_vm5, %v3015_v39 }
 0x48c   :  { %v3037_v57 = vld [vmem:[#allocation5 + $0x8] sm:$0xff] }
 0x48d   :  { %3371 = vmatprep.mubr.bf16.mxu1 %v3037_v57 }
 0x48e   :  { %3372 = vmatmul.mubr.bf16.vlgmr.msra.gmra.mrb[148].mxu1 %v3036_v26 }
 0x48f   :  { %3849 = vmatpush3.bf16.msra.mxu1 %v4182_v45 }
 0x490   :  { %3850 = vmatprep.subr.bf16.mxu1 %v4183_v37 }
 0x493   :  { %3851 = vmatpush3.bf16.msra.mxu1 %v4184_v42 }
 0x494   :  { %v3023_v12 = vpop.permute.xlu1 %3022  ;;  %3852 = vmatprep.subr.bf16.mxu1 %v4185_v43 }
 0x495   :  { %3025 = vst.msk [vmem:[#allocation5 + $0x10] sm:$0xff] %vm3008_vm5, %v3023_v12 }
 0x497   :  { %3853 = vmatpush3.bf16.msra.mxu1 %v4186_v14 }
 0x498   :  { %3854 = vmatprep.subr.bf16.mxu1 %v4187_v49 }
 0x49b   :  { %3855 = vmatpush3.bf16.msra.mxu1 %v4188_v16 }
 0x49c   :  { %3856 = vmatprep.subr.bf16.mxu1 %v4189_v17  ;;  %v3038_v21 = vld [vmem:[#allocation5 + $0x10] sm:$0xff] }
 0x49f   :  { %3857 = vmatpush3.bf16.msra.mxu1 %v4190_v2 }
 0x4a0   :  { %3858 = vmatprep.subr.bf16.mxu1 %v4191_v55 }
 0x4a3   :  { %3859 = vmatpush3.bf16.msra.mxu1 %v4192_v19 }
 0x4a4   :  { %3860 = vmatprep.subr.bf16.mxu1 %v4193_v20 }
 0x4a6   :  { %v3031_v25 = vpop.permute.xlu0 %3030 }
 0x4a7   :  { %3861 = vmatpush3.bf16.msra.mxu1 %v4194_v23  ;;  %3033 = vst.msk [vmem:[#allocation5 + $0x18] sm:$0xff] %vm3008_vm5, %v3031_v25 }
 0x4a8   :  { %3862 = vmatprep.subr.bf16.mxu1 %v4195_v24 }
 0x4ab   :  { %3863 = vmatpush3.bf16.msra.mxu1 %v4196_v13 }
 0x4ac   :  { %3875 = vmatprep.subr.bf16.mxu1 %v4207_v27 }
 0x4ae   :  { %v3039_v30 = vld [vmem:[#allocation5 + $0x18] sm:$0xff] }
 0x4af   :  { %3412 = vmatprep.mubr.bf16.mxu1 %v3039_v30 }
 0x4b0   :  { %3413 = vmatmul.mubr.bf16.vlgmr.msra.gmra.mrb[152].mxu1 %v3038_v21 }
 0x4b1   :  { %3876 = vmatpush3.bf16.msra.mxu1 %v4197_v29  ;;  %3883 = vmatprep.mubr.msk.bf16.mxu1 %vm4208_vm6, %v4207_v27 }
 0x4b2   :  { %3877 = vmatprep.subr.bf16.mxu1 %v4207_v27 }
 0x4b5   :  { %3878 = vmatpush3.bf16.msra.mxu1 %v4198_v22 }
 0x4b6   :  { %3879 = vmatprep.subr.bf16.mxu1 %v4207_v27 }
 0x4b9   :  { %3880 = vmatpush3.bf16.msra.mxu1 %v4199_v36 }
 0x4ba   :  { %3881 = vmatprep.subr.bf16.mxu1 %v4207_v27 }
 0x4bd   :  { %3882 = vmatpush3.bf16.msra.mxu1 %v4200_v28 }
 0x4c0   :  { %3884 = vmatmul.mubr.msk.bf16.vlgmr.msra.gmra.mrb[156].mxu1 %vm2991_vm4, %v3040_v61 }
 0x561   :  { %v3842_v38 = vpop.f32.mrb[148].mxu1 }
 0x562   :  { %v3843_v41 = vpop.f32.mrb[149].mxu1 }
 0x563   :  { %v3844_v54 = vadd.f32 %v3843_v41, %v3842_v38  ;;  %v3845_v46 = vpop.f32.mrb[150].mxu1 }
 0x564   :  { %v3846_v47 = vpop.f32.mrb[151].mxu1 }
 0x565   :  { %v3847_v18 = vadd.f32 %v3846_v47, %v3845_v46  ;;  %v3374_v53 = vadd.f32 %v3844_v54, %v3648_v59 }
 0x567   :  { %v3377_v60 = vadd.f32 %v3847_v18, %v3648_v59 }
 0x583   :  { %v3864_v50 = vpop.f32.mrb[152].mxu1 }
 0x584   :  { %v3865_v40 = vpop.f32.mrb[153].mxu1 }
 0x585   :  { %v3866_v56 = vadd.f32 %v3865_v40, %v3864_v50  ;;  %v3867_v5 = vpop.f32.mrb[154].mxu1 }
 0x586   :  { %v3868_v58 = vpop.f32.mrb[155].mxu1 }
 0x587   :  { %v3869_v34 = vadd.f32 %v3868_v58, %v3867_v5  ;;  %v3415_v62 = vadd.f32 %v3866_v56, %v3374_v53 }
 0x589   :  { %v3418_v63 = vadd.f32 %v3869_v34, %v3377_v60 }
 0x593   :  { %v3455_v8 = vpop.f32.mrb[156].mxu1 }
 0x594   :  { %v3456_v3 = vadd.f32 %v3455_v8, %v3415_v62  ;;  %v3885_v4 = vpop.f32.mrb[157].mxu1 }
 0x595   :  { %v3458_v6 = vpop.f32.mrb[158].mxu1 }
 0x596   :  { %v3462_v10 = vmax.f32 %v3456_v3, 0.0  ;;  %v3459_v33 = vadd.f32 %v3458_v6, %v3418_v63  ;;  %v3886_v7 = vpop.f32.mrb[159].mxu1 }
 0x598   :  { %3464 = vst.msk [vmem:[%s5600_s7] sm:$0xff] %vm2991_vm4, %v3462_v10  ;;  %v3463_v35 = vmax.f32 %v3459_v33, 0.0 }
 0x59a   :  { %3465 = vst.msk [vmem:[%s5600_s7 + $0x8] sm:$0xff] %vm2991_vm4, %v3463_v35 }

</bundles_post_ra>
